<compile_context>
chip_gen: v6e
topology: v6e:2x2x1
jax: 0.10.0
libtpu: 0.0.40
codegen_flags: <defaults>
</compile_context>

<pallas_src>
import functools

import jax
import jax.numpy as jnp
from jax import lax
from jax.experimental import pallas as pl
from jax.experimental.pallas import tpu as pltpu

# ----------------------------- config (small) --------------------------------
N_VOCAB = 512     # stands in for 49408
N_EMBD = 128      # stands in for 768
N_TOKENS = 16     # stands in for 77
N_HEAD = 4        # stands in for 12
N_LAYERS = 2      # stands in for 12
EPS = 1e-5        # nn.LayerNorm default
NEG_BIG = -1e30   # finite "-inf" for the additive causal mask


def _layernorm(x, g, b):
    mu = jnp.mean(x, axis=-1, keepdims=True)
    var = jnp.mean(jnp.square(x - mu), axis=-1, keepdims=True)
    return (x - mu) * lax.rsqrt(var + EPS) * g + b


# --------------------- fused CLIP kernel (embed + L layers + LN) -------------
def _clip_fused_kernel(B, S, n_head,
                       tok_ids, tok_emb, pos,
                       ln1_g, ln1_b, wqkv, bqkv, wo3, bo,
                       ln2_g, ln2_b, w1, b1, w2, b2,
                       lnf_g, lnf_b,
                       out_ref, h_ref):
    l = pl.program_id(0)
    BS, E = h_ref.shape
    H = n_head
    Dh = E // H
    inv_sqrt_dh = 1.0 / float(Dh) ** 0.5

    # ---- l == 0 prologue: token-embedding gather + position add ------------
    # Toy-size table is VMEM-resident; gather is plain dynamic row reads.
    # TODO(synk): at full CLIP size (49408 x 768) the table does not fit VMEM;
    # keep it in HBM (memory_space=pl.ANY) with double-buffered row DMAs.
    @pl.when(l == 0)
    def _():
        for r in range(BS):                        # static unroll (BS small)
            tid = tok_ids[r]
            pp = r % S
            h_ref[r:r + 1, :] = tok_emb[pl.ds(tid, 1), :] + pos[pp:pp + 1, :]

    x = h_ref[...]                                 # (BS, E) f32, VMEM-resident
    residue = x

    # ---- layernorm_1 + causal multi-head self-attention ---------------------
    h = _layernorm(x, ln1_g[...], ln1_b[...])
    qkv = jnp.dot(h.astype(jnp.bfloat16), wqkv[...],
                  preferred_element_type=jnp.float32) + bqkv[...]
    q2 = qkv[:, 0 * E:1 * E] * inv_sqrt_dh         # fold 1/sqrt(Dh) into q
    k2 = qkv[:, 1 * E:2 * E]
    v2 = qkv[:, 2 * E:3 * E]

    def split_heads(t2):
        # (BS, E) -> (H*B, S, Dh); leading index x = head*B + batch.
        # Only lane slices + leading-axis concat (no 4D transpose needed).
        parts = [t2[:, hi * Dh:(hi + 1) * Dh].reshape(B, S, Dh)
                 for hi in range(H)]
        return jnp.concatenate(parts, axis=0)

    qh = split_heads(q2).astype(jnp.bfloat16)
    kh = split_heads(k2).astype(jnp.bfloat16)
    vh = split_heads(v2).astype(jnp.bfloat16)

    # Per-(batch, head) S x S scores; causal mask built in-kernel via iota.
    s = jnp.einsum('xqd,xkd->xqk', qh, kh,
                   preferred_element_type=jnp.float32)       # (H*B, S, S)
    ri = lax.broadcasted_iota(jnp.int32, (S, S), 0)
    ci = lax.broadcasted_iota(jnp.int32, (S, S), 1)
    s = s + jnp.where(ci <= ri, 0.0, NEG_BIG).astype(jnp.float32)

    mx = jnp.max(s, axis=-1, keepdims=True)
    p = jnp.exp(s - mx)
    p = p / jnp.sum(p, axis=-1, keepdims=True)     # exact division (parity)

    o = jnp.einsum('xqk,xkd->xqd', p.astype(jnp.bfloat16), vh,
                   preferred_element_type=jnp.float32)       # (H*B, S, Dh)

    # Head merge + out-projection as ONE heads-batched matmul:
    # wo3 = wo reshaped to (H, Dh, E); sum over heads == concat(heads) @ wo.
    o = o.reshape(H, B * S, Dh)
    attn = jnp.einsum('hmd,hde->hme', o.astype(jnp.bfloat16), wo3[...],
                      preferred_element_type=jnp.float32)    # (H, BS, E)
    attn = jnp.sum(attn, axis=0) + bo[...]
    x = attn + residue

    # ---- layernorm_2 + quick-GELU MLP ---------------------------------------
    residue = x
    h = _layernorm(x, ln2_g[...], ln2_b[...])
    h = jnp.dot(h.astype(jnp.bfloat16), w1[...],
                preferred_element_type=jnp.float32) + b1[...]
    h = h * jax.nn.sigmoid(1.702 * h)              # quick GELU (f32 VPU/EUP)
    h = jnp.dot(h.astype(jnp.bfloat16), w2[...],
                preferred_element_type=jnp.float32) + b2[...]
    x = h + residue
    h_ref[...] = x

    # ---- fused final LayerNorm epilogue: single HBM writeback ---------------
    @pl.when(l == pl.num_programs(0) - 1)
    def _():
        out_ref[...] = _layernorm(x, lnf_g[...], lnf_b[...])


_STACKED_ORDER = ('ln1_g', 'ln1_b', 'wqkv', 'bqkv', 'wo3', 'bo',
                  'ln2_g', 'ln2_b', 'w1', 'b1', 'w2', 'b2')


def _prepare_stacked(layers, n_head):
    """Stack per-layer weights along a leading layer axis (matmuls in bf16).

    TODO(synk): at full size, quantize matmul weights (int8 on v6e, fp8 on
    v7x) and tile w1/w2 along the 4E dim to fit v7x's 64 MiB VMEM.
    """
    L = len(layers)
    E = layers[0]['wqkv'].shape[0]
    Dh = E // n_head

    def st(name):
        return jnp.stack([lp[name] for lp in layers], axis=0)

    return {
        'ln1_g': st('ln1_g'), 'ln1_b': st('ln1_b'),
        'wqkv': st('wqkv').astype(jnp.bfloat16), 'bqkv': st('bqkv'),
        'wo3': st('wo').reshape(L, n_head, Dh, E).astype(jnp.bfloat16),
        'bo': st('bo'),
        'ln2_g': st('ln2_g'), 'ln2_b': st('ln2_b'),
        'w1': st('w1').astype(jnp.bfloat16), 'b1': st('b1'),
        'w2': st('w2').astype(jnp.bfloat16), 'b2': st('b2'),
    }


def _stacked_spec(arr):
    rest = arr.shape[1:]
    n = len(rest)
    return pl.BlockSpec((None,) + rest, lambda l, tok, _n=n: (l,) + (0,) * _n)


def clip_forward(tokens, params, n_head=N_HEAD):
    B, S = tokens.shape
    tok_emb = params['tok_emb']
    pos_emb = params['pos_emb']
    V, E = tok_emb.shape
    assert S == pos_emb.shape[0]
    L = len(params['layers'])
    BS = B * S

    stacked = _prepare_stacked(params['layers'], n_head)
    flat_tokens = tokens.reshape(BS).astype(jnp.int32)

    kernel = functools.partial(_clip_fused_kernel, B, S, n_head)
    full = lambda l, tok: (0, 0)   # whole-array blocks, resident across layers

    out = pl.pallas_call(
        kernel,
        out_shape=jax.ShapeDtypeStruct((BS, E), jnp.float32),
        grid_spec=pltpu.PrefetchScalarGridSpec(
            num_scalar_prefetch=1,                 # token ids -> SMEM
            grid=(L,),                             # one step per layer
            in_specs=[pl.BlockSpec((V, E), full),  # token-embedding table
                      pl.BlockSpec((S, E), full)]  # position embedding
                     + [_stacked_spec(stacked[n]) for n in _STACKED_ORDER]
                     + [pl.BlockSpec((1, E), full),   # final LN gamma
                        pl.BlockSpec((1, E), full)],  # final LN beta
            out_specs=pl.BlockSpec((BS, E), full),
            scratch_shapes=[pltpu.VMEM((BS, E), jnp.float32)],  # resident act.
        ),
        compiler_params=pltpu.CompilerParams(
            # Single layer axis; no batch-block "parallel" axis (megacore
            # batch-sharding would double the per-layer weight HBM stream).
            dimension_semantics=("arbitrary",),
            vmem_limit_bytes=32 * 1024 * 1024),
    )(flat_tokens, tok_emb, pos_emb,
      *[stacked[n] for n in _STACKED_ORDER],
      params['ln_g'], params['ln_b'])
    return out.reshape(B, S, E)


# ------------------------------ parameters ------------------------------------
def _init_layer(key, E):
    k = jax.random.split(key, 4)
    scale = 0.02
    return {
        'ln1_g': jnp.ones((1, E), jnp.float32),
        'ln1_b': jnp.zeros((1, E), jnp.float32),
        'wqkv': jax.random.normal(k[0], (E, 3 * E), jnp.float32) * scale,
        'bqkv': jnp.zeros((1, 3 * E), jnp.float32),
        'wo': jax.random.normal(k[1], (E, E), jnp.float32) * scale,
        'bo': jnp.zeros((1, E), jnp.float32),
        'ln2_g': jnp.ones((1, E), jnp.float32),
        'ln2_b': jnp.zeros((1, E), jnp.float32),
        'w1': jax.random.normal(k[2], (E, 4 * E), jnp.float32) * scale,
        'b1': jnp.zeros((1, 4 * E), jnp.float32),
        'w2': jax.random.normal(k[3], (4 * E, E), jnp.float32) * scale,
        'b2': jnp.zeros((1, E), jnp.float32),
    }


def init_params(key):
    E = N_EMBD
    keys = jax.random.split(key, 2 + N_LAYERS)
    return {
        'tok_emb': jax.random.normal(keys[0], (N_VOCAB, E), jnp.float32) * 0.02,
        # module inits this to zeros; small random keeps the add non-trivial
        'pos_emb': jax.random.normal(keys[1], (N_TOKENS, E), jnp.float32) * 0.01,
        'layers': [_init_layer(keys[2 + i], E) for i in range(N_LAYERS)],
        'ln_g': jnp.ones((1, E), jnp.float32),
        'ln_b': jnp.zeros((1, E), jnp.float32),
    }


# --------------------------- pure-JAX reference --------------------------------
def clip_reference(tokens, params, n_head=N_HEAD):
    x = params['tok_emb'][tokens] + params['pos_emb'][None]
    B, S, E = x.shape
    H, Dh = n_head, E // n_head
    causal = jnp.tril(jnp.ones((S, S), bool))
    for lp in params['layers']:
        res = x
        h = _layernorm(x, lp['ln1_g'], lp['ln1_b'])
        qkv = h @ lp['wqkv'] + lp['bqkv']
        q, k, v = jnp.split(qkv, 3, axis=-1)
        heads = lambda t: t.reshape(B, S, H, Dh).transpose(0, 2, 1, 3)
        q, k, v = heads(q), heads(k), heads(v)
        s = jnp.einsum('bhid,bhjd->bhij', q, k) / (Dh ** 0.5)
        s = jnp.where(causal, s, -jnp.inf)
        p = jax.nn.softmax(s, axis=-1)
        o = jnp.einsum('bhij,bhjd->bhid', p, v)
        o = o.transpose(0, 2, 1, 3).reshape(B, S, E)
        x = o @ lp['wo'] + lp['bo'] + res
        res = x
        h = _layernorm(x, lp['ln2_g'], lp['ln2_b'])
        h = h @ lp['w1'] + lp['b1']
        h = h * jax.nn.sigmoid(1.702 * h)
        h = h @ lp['w2'] + lp['b2']
        x = h + res
    return _layernorm(x, params['ln_g'], params['ln_b'])


# ------------------------------ run / check ------------------------------------
if __name__ == "__main__":
    key = jax.random.PRNGKey(0)
    pkey, tkey = jax.random.split(key)
    params = init_params(pkey)
    tokens = jax.random.randint(tkey, (2, N_TOKENS), 0, N_VOCAB, dtype=jnp.int32)

    out = clip_forward(tokens, params)
    out = jax.block_until_ready(out)

    assert out.shape == (2, N_TOKENS, N_EMBD), out.shape
    assert out.dtype == jnp.float32
    assert bool(jnp.isfinite(out).all())

    # Loose tolerance: kernel uses bf16 matmul operands with f32 accumulation.
    ref = clip_reference(tokens, params)
    err = float(jnp.max(jnp.abs(out - ref)))
    assert err < 1e-1, f"max abs diff vs reference: {err}"

    print("KERNEL_OK")
</pallas_src>

<mosaic_0001>
module attributes {stable_mosaic.version = 11 : i64} {
  func.func @_clip_fused_kernel(%arg0: i32, %arg1: memref<32xi32, #tpu.memory_space<smem>>, %arg2: memref<512x128xf32, #tpu.memory_space<vmem>>, %arg3: memref<16x128xf32, #tpu.memory_space<vmem>>, %arg4: memref<1x1x128xf32, #tpu.memory_space<vmem>>, %arg5: memref<1x1x128xf32, #tpu.memory_space<vmem>>, %arg6: memref<1x128x384xbf16, #tpu.memory_space<vmem>>, %arg7: memref<1x1x384xf32, #tpu.memory_space<vmem>>, %arg8: memref<1x4x32x128xbf16, #tpu.memory_space<vmem>>, %arg9: memref<1x1x128xf32, #tpu.memory_space<vmem>>, %arg10: memref<1x1x128xf32, #tpu.memory_space<vmem>>, %arg11: memref<1x1x128xf32, #tpu.memory_space<vmem>>, %arg12: memref<1x128x512xbf16, #tpu.memory_space<vmem>>, %arg13: memref<1x1x512xf32, #tpu.memory_space<vmem>>, %arg14: memref<1x512x128xbf16, #tpu.memory_space<vmem>>, %arg15: memref<1x1x128xf32, #tpu.memory_space<vmem>>, %arg16: memref<1x128xf32, #tpu.memory_space<vmem>>, %arg17: memref<1x128xf32, #tpu.memory_space<vmem>>, %arg18: memref<32x128xf32, #tpu.memory_space<vmem>>, %arg19: memref<32x128xf32, #tpu.memory_space<vmem>>) attributes {dimension_semantics = [#tpu.dimension_semantics<arbitrary>], iteration_bounds = array<i64: 2>, scalar_prefetch = 1 : i64, scratch_operands = 1 : i64, tpu.core_type = #tpu.core_type<tc>, window_params = [{pipeline_mode = #tpu.pipeline_mode<synchronous>, transform_indices = @transform_0, window_bounds = array<i64: 512, 128>}, {pipeline_mode = #tpu.pipeline_mode<synchronous>, transform_indices = @transform_1, window_bounds = array<i64: 16, 128>}, {transform_indices = @transform_2, window_bounds = array<i64: 1, 1, 128>}, {transform_indices = @transform_3, window_bounds = array<i64: 1, 1, 128>}, {transform_indices = @transform_4, window_bounds = array<i64: 1, 128, 384>}, {transform_indices = @transform_5, window_bounds = array<i64: 1, 1, 384>}, {transform_indices = @transform_6, window_bounds = array<i64: 1, 4, 32, 128>}, {transform_indices = @transform_7, window_bounds = array<i64: 1, 1, 128>}, {transform_indices = @transform_8, window_bounds = array<i64: 1, 1, 128>}, {transform_indices = @transform_9, window_bounds = array<i64: 1, 1, 128>}, {transform_indices = @transform_10, window_bounds = array<i64: 1, 128, 512>}, {transform_indices = @transform_11, window_bounds = array<i64: 1, 1, 512>}, {transform_indices = @transform_12, window_bounds = array<i64: 1, 512, 128>}, {transform_indices = @transform_13, window_bounds = array<i64: 1, 1, 128>}, {pipeline_mode = #tpu.pipeline_mode<synchronous>, transform_indices = @transform_14, window_bounds = array<i64: 1, 128>}, {pipeline_mode = #tpu.pipeline_mode<synchronous>, transform_indices = @transform_15, window_bounds = array<i64: 1, 128>}, {pipeline_mode = #tpu.pipeline_mode<synchronous>, transform_indices = @transform_16, window_bounds = array<i64: 32, 128>}]} {
    %c0_i32 = arith.constant 0 : i32
    %0 = arith.cmpi eq, %arg0, %c0_i32 : i32
    %1 = arith.extui %0 : i1 to i32
    %c0_i32_0 = arith.constant 0 : i32
    %2 = arith.cmpi ne, %1, %c0_i32_0 : i32
    scf.if %2 {
      %c0_65 = arith.constant 0 : index
      %160 = memref.load %arg1[%c0_65] : memref<32xi32, #tpu.memory_space<smem>>
      %161 = arith.index_cast %160 : i32 to index
      %c0_66 = arith.constant 0 : index
      %162 = vector.load %arg2[%161, %c0_66] : memref<512x128xf32, #tpu.memory_space<vmem>>, vector<1x128xf32>
      %c0_67 = arith.constant 0 : index
      %c0_68 = arith.constant 0 : index
      %163 = vector.load %arg3[%c0_67, %c0_68] : memref<16x128xf32, #tpu.memory_space<vmem>>, vector<1x128xf32>
      %164 = arith.addf %162, %163 : vector<1x128xf32>
      %c0_69 = arith.constant 0 : index
      %c0_70 = arith.constant 0 : index
      %165 = vector.load %arg19[%c0_69, %c0_70] : memref<32x128xf32, #tpu.memory_space<vmem>>, vector<1x128xf32>
      tpu.vector_store %arg19[%c0_69, %c0_70], %164 {strides = array<i32>} : memref<32x128xf32, #tpu.memory_space<vmem>>, vector<1x128xf32>,
      %c1 = arith.constant 1 : index
      %166 = memref.load %arg1[%c1] : memref<32xi32, #tpu.memory_space<smem>>
      %167 = arith.index_cast %166 : i32 to index
      %c0_71 = arith.constant 0 : index
      %168 = vector.load %arg2[%167, %c0_71] : memref<512x128xf32, #tpu.memory_space<vmem>>, vector<1x128xf32>
      %c1_72 = arith.constant 1 : index
      %c0_73 = arith.constant 0 : index
      %169 = vector.load %arg3[%c1_72, %c0_73] : memref<16x128xf32, #tpu.memory_space<vmem>>, vector<1x128xf32>
      %170 = arith.addf %168, %169 : vector<1x128xf32>
      %c1_74 = arith.constant 1 : index
      %c0_75 = arith.constant 0 : index
      %171 = vector.load %arg19[%c1_74, %c0_75] : memref<32x128xf32, #tpu.memory_space<vmem>>, vector<1x128xf32>
      tpu.vector_store %arg19[%c1_74, %c0_75], %170 {strides = array<i32>} : memref<32x128xf32, #tpu.memory_space<vmem>>, vector<1x128xf32>,
      %c2 = arith.constant 2 : index
      %172 = memref.load %arg1[%c2] : memref<32xi32, #tpu.memory_space<smem>>
      %173 = arith.index_cast %172 : i32 to index
      %c0_76 = arith.constant 0 : index
      %174 = vector.load %arg2[%173, %c0_76] : memref<512x128xf32, #tpu.memory_space<vmem>>, vector<1x128xf32>
      %c2_77 = arith.constant 2 : index
      %c0_78 = arith.constant 0 : index
      %175 = vector.load %arg3[%c2_77, %c0_78] : memref<16x128xf32, #tpu.memory_space<vmem>>, vector<1x128xf32>
      %176 = arith.addf %174, %175 : vector<1x128xf32>
      %c2_79 = arith.constant 2 : index
      %c0_80 = arith.constant 0 : index
      %177 = vector.load %arg19[%c2_79, %c0_80] : memref<32x128xf32, #tpu.memory_space<vmem>>, vector<1x128xf32>
      tpu.vector_store %arg19[%c2_79, %c0_80], %176 {strides = array<i32>} : memref<32x128xf32, #tpu.memory_space<vmem>>, vector<1x128xf32>,
      %c3 = arith.constant 3 : index
      %178 = memref.load %arg1[%c3] : memref<32xi32, #tpu.memory_space<smem>>
      %179 = arith.index_cast %178 : i32 to index
      %c0_81 = arith.constant 0 : index
      %180 = vector.load %arg2[%179, %c0_81] : memref<512x128xf32, #tpu.memory_space<vmem>>, vector<1x128xf32>
      %c3_82 = arith.constant 3 : index
      %c0_83 = arith.constant 0 : index
      %181 = vector.load %arg3[%c3_82, %c0_83] : memref<16x128xf32, #tpu.memory_space<vmem>>, vector<1x128xf32>
      %182 = arith.addf %180, %181 : vector<1x128xf32>
      %c3_84 = arith.constant 3 : index
      %c0_85 = arith.constant 0 : index
      %183 = vector.load %arg19[%c3_84, %c0_85] : memref<32x128xf32, #tpu.memory_space<vmem>>, vector<1x128xf32>
      tpu.vector_store %arg19[%c3_84, %c0_85], %182 {strides = array<i32>} : memref<32x128xf32, #tpu.memory_space<vmem>>, vector<1x128xf32>,
      %c4 = arith.constant 4 : index
      %184 = memref.load %arg1[%c4] : memref<32xi32, #tpu.memory_space<smem>>
      %185 = arith.index_cast %184 : i32 to index
      %c0_86 = arith.constant 0 : index
      %186 = vector.load %arg2[%185, %c0_86] : memref<512x128xf32, #tpu.memory_space<vmem>>, vector<1x128xf32>
      %c4_87 = arith.constant 4 : index
      %c0_88 = arith.constant 0 : index
      %187 = vector.load %arg3[%c4_87, %c0_88] : memref<16x128xf32, #tpu.memory_space<vmem>>, vector<1x128xf32>
      %188 = arith.addf %186, %187 : vector<1x128xf32>
      %c4_89 = arith.constant 4 : index
      %c0_90 = arith.constant 0 : index
      %189 = vector.load %arg19[%c4_89, %c0_90] : memref<32x128xf32, #tpu.memory_space<vmem>>, vector<1x128xf32>
      tpu.vector_store %arg19[%c4_89, %c0_90], %188 {strides = array<i32>} : memref<32x128xf32, #tpu.memory_space<vmem>>, vector<1x128xf32>,
      %c5 = arith.constant 5 : index
      %190 = memref.load %arg1[%c5] : memref<32xi32, #tpu.memory_space<smem>>
      %191 = arith.index_cast %190 : i32 to index
      %c0_91 = arith.constant 0 : index
      %192 = vector.load %arg2[%191, %c0_91] : memref<512x128xf32, #tpu.memory_space<vmem>>, vector<1x128xf32>
      %c5_92 = arith.constant 5 : index
      %c0_93 = arith.constant 0 : index
      %193 = vector.load %arg3[%c5_92, %c0_93] : memref<16x128xf32, #tpu.memory_space<vmem>>, vector<1x128xf32>
      %194 = arith.addf %192, %193 : vector<1x128xf32>
      %c5_94 = arith.constant 5 : index
      %c0_95 = arith.constant 0 : index
      %195 = vector.load %arg19[%c5_94, %c0_95] : memref<32x128xf32, #tpu.memory_space<vmem>>, vector<1x128xf32>
      tpu.vector_store %arg19[%c5_94, %c0_95], %194 {strides = array<i32>} : memref<32x128xf32, #tpu.memory_space<vmem>>, vector<1x128xf32>,
      %c6 = arith.constant 6 : index
      %196 = memref.load %arg1[%c6] : memref<32xi32, #tpu.memory_space<smem>>
      %197 = arith.index_cast %196 : i32 to index
      %c0_96 = arith.constant 0 : index
      %198 = vector.load %arg2[%197, %c0_96] : memref<512x128xf32, #tpu.memory_space<vmem>>, vector<1x128xf32>
      %c6_97 = arith.constant 6 : index
      %c0_98 = arith.constant 0 : index
      %199 = vector.load %arg3[%c6_97, %c0_98] : memref<16x128xf32, #tpu.memory_space<vmem>>, vector<1x128xf32>
      %200 = arith.addf %198, %199 : vector<1x128xf32>
      %c6_99 = arith.constant 6 : index
      %c0_100 = arith.constant 0 : index
      %201 = vector.load %arg19[%c6_99, %c0_100] : memref<32x128xf32, #tpu.memory_space<vmem>>, vector<1x128xf32>
      tpu.vector_store %arg19[%c6_99, %c0_100], %200 {strides = array<i32>} : memref<32x128xf32, #tpu.memory_space<vmem>>, vector<1x128xf32>,
      %c7 = arith.constant 7 : index
      %202 = memref.load %arg1[%c7] : memref<32xi32, #tpu.memory_space<smem>>
      %203 = arith.index_cast %202 : i32 to index
      %c0_101 = arith.constant 0 : index
      %204 = vector.load %arg2[%203, %c0_101] : memref<512x128xf32, #tpu.memory_space<vmem>>, vector<1x128xf32>
      %c7_102 = arith.constant 7 : index
      %c0_103 = arith.constant 0 : index
      %205 = vector.load %arg3[%c7_102, %c0_103] : memref<16x128xf32, #tpu.memory_space<vmem>>, vector<1x128xf32>
      %206 = arith.addf %204, %205 : vector<1x128xf32>
      %c7_104 = arith.constant 7 : index
      %c0_105 = arith.constant 0 : index
      %207 = vector.load %arg19[%c7_104, %c0_105] : memref<32x128xf32, #tpu.memory_space<vmem>>, vector<1x128xf32>
      tpu.vector_store %arg19[%c7_104, %c0_105], %206 {strides = array<i32>} : memref<32x128xf32, #tpu.memory_space<vmem>>, vector<1x128xf32>,
      %c8 = arith.constant 8 : index
      %208 = memref.load %arg1[%c8] : memref<32xi32, #tpu.memory_space<smem>>
      %209 = arith.index_cast %208 : i32 to index
      %c0_106 = arith.constant 0 : index
      %210 = vector.load %arg2[%209, %c0_106] : memref<512x128xf32, #tpu.memory_space<vmem>>, vector<1x128xf32>
      %c8_107 = arith.constant 8 : index
      %c0_108 = arith.constant 0 : index
      %211 = vector.load %arg3[%c8_107, %c0_108] : memref<16x128xf32, #tpu.memory_space<vmem>>, vector<1x128xf32>
      %212 = arith.addf %210, %211 : vector<1x128xf32>
      %c8_109 = arith.constant 8 : index
      %c0_110 = arith.constant 0 : index
      %213 = vector.load %arg19[%c8_109, %c0_110] : memref<32x128xf32, #tpu.memory_space<vmem>>, vector<1x128xf32>
      tpu.vector_store %arg19[%c8_109, %c0_110], %212 {strides = array<i32>} : memref<32x128xf32, #tpu.memory_space<vmem>>, vector<1x128xf32>,
      %c9 = arith.constant 9 : index
      %214 = memref.load %arg1[%c9] : memref<32xi32, #tpu.memory_space<smem>>
      %215 = arith.index_cast %214 : i32 to index
      %c0_111 = arith.constant 0 : index
      %216 = vector.load %arg2[%215, %c0_111] : memref<512x128xf32, #tpu.memory_space<vmem>>, vector<1x128xf32>
      %c9_112 = arith.constant 9 : index
      %c0_113 = arith.constant 0 : index
      %217 = vector.load %arg3[%c9_112, %c0_113] : memref<16x128xf32, #tpu.memory_space<vmem>>, vector<1x128xf32>
      %218 = arith.addf %216, %217 : vector<1x128xf32>
      %c9_114 = arith.constant 9 : index
      %c0_115 = arith.constant 0 : index
      %219 = vector.load %arg19[%c9_114, %c0_115] : memref<32x128xf32, #tpu.memory_space<vmem>>, vector<1x128xf32>
      tpu.vector_store %arg19[%c9_114, %c0_115], %218 {strides = array<i32>} : memref<32x128xf32, #tpu.memory_space<vmem>>, vector<1x128xf32>,
      %c10 = arith.constant 10 : index
      %220 = memref.load %arg1[%c10] : memref<32xi32, #tpu.memory_space<smem>>
      %221 = arith.index_cast %220 : i32 to index
      %c0_116 = arith.constant 0 : index
      %222 = vector.load %arg2[%221, %c0_116] : memref<512x128xf32, #tpu.memory_space<vmem>>, vector<1x128xf32>
      %c10_117 = arith.constant 10 : index
      %c0_118 = arith.constant 0 : index
      %223 = vector.load %arg3[%c10_117, %c0_118] : memref<16x128xf32, #tpu.memory_space<vmem>>, vector<1x128xf32>
      %224 = arith.addf %222, %223 : vector<1x128xf32>
      %c10_119 = arith.constant 10 : index
      %c0_120 = arith.constant 0 : index
      %225 = vector.load %arg19[%c10_119, %c0_120] : memref<32x128xf32, #tpu.memory_space<vmem>>, vector<1x128xf32>
      tpu.vector_store %arg19[%c10_119, %c0_120], %224 {strides = array<i32>} : memref<32x128xf32, #tpu.memory_space<vmem>>, vector<1x128xf32>,
      %c11 = arith.constant 11 : index
      %226 = memref.load %arg1[%c11] : memref<32xi32, #tpu.memory_space<smem>>
      %227 = arith.index_cast %226 : i32 to index
      %c0_121 = arith.constant 0 : index
      %228 = vector.load %arg2[%227, %c0_121] : memref<512x128xf32, #tpu.memory_space<vmem>>, vector<1x128xf32>
      %c11_122 = arith.constant 11 : index
      %c0_123 = arith.constant 0 : index
      %229 = vector.load %arg3[%c11_122, %c0_123] : memref<16x128xf32, #tpu.memory_space<vmem>>, vector<1x128xf32>
      %230 = arith.addf %228, %229 : vector<1x128xf32>
      %c11_124 = arith.constant 11 : index
      %c0_125 = arith.constant 0 : index
      %231 = vector.load %arg19[%c11_124, %c0_125] : memref<32x128xf32, #tpu.memory_space<vmem>>, vector<1x128xf32>
      tpu.vector_store %arg19[%c11_124, %c0_125], %230 {strides = array<i32>} : memref<32x128xf32, #tpu.memory_space<vmem>>, vector<1x128xf32>,
      %c12 = arith.constant 12 : index
      %232 = memref.load %arg1[%c12] : memref<32xi32, #tpu.memory_space<smem>>
      %233 = arith.index_cast %232 : i32 to index
      %c0_126 = arith.constant 0 : index
      %234 = vector.load %arg2[%233, %c0_126] : memref<512x128xf32, #tpu.memory_space<vmem>>, vector<1x128xf32>
      %c12_127 = arith.constant 12 : index
      %c0_128 = arith.constant 0 : index
      %235 = vector.load %arg3[%c12_127, %c0_128] : memref<16x128xf32, #tpu.memory_space<vmem>>, vector<1x128xf32>
      %236 = arith.addf %234, %235 : vector<1x128xf32>
      %c12_129 = arith.constant 12 : index
      %c0_130 = arith.constant 0 : index
      %237 = vector.load %arg19[%c12_129, %c0_130] : memref<32x128xf32, #tpu.memory_space<vmem>>, vector<1x128xf32>
      tpu.vector_store %arg19[%c12_129, %c0_130], %236 {strides = array<i32>} : memref<32x128xf32, #tpu.memory_space<vmem>>, vector<1x128xf32>,
      %c13 = arith.constant 13 : index
      %238 = memref.load %arg1[%c13] : memref<32xi32, #tpu.memory_space<smem>>
      %239 = arith.index_cast %238 : i32 to index
      %c0_131 = arith.constant 0 : index
      %240 = vector.load %arg2[%239, %c0_131] : memref<512x128xf32, #tpu.memory_space<vmem>>, vector<1x128xf32>
      %c13_132 = arith.constant 13 : index
      %c0_133 = arith.constant 0 : index
      %241 = vector.load %arg3[%c13_132, %c0_133] : memref<16x128xf32, #tpu.memory_space<vmem>>, vector<1x128xf32>
      %242 = arith.addf %240, %241 : vector<1x128xf32>
      %c13_134 = arith.constant 13 : index
      %c0_135 = arith.constant 0 : index
      %243 = vector.load %arg19[%c13_134, %c0_135] : memref<32x128xf32, #tpu.memory_space<vmem>>, vector<1x128xf32>
      tpu.vector_store %arg19[%c13_134, %c0_135], %242 {strides = array<i32>} : memref<32x128xf32, #tpu.memory_space<vmem>>, vector<1x128xf32>,
      %c14 = arith.constant 14 : index
      %244 = memref.load %arg1[%c14] : memref<32xi32, #tpu.memory_space<smem>>
      %245 = arith.index_cast %244 : i32 to index
      %c0_136 = arith.constant 0 : index
      %246 = vector.load %arg2[%245, %c0_136] : memref<512x128xf32, #tpu.memory_space<vmem>>, vector<1x128xf32>
      %c14_137 = arith.constant 14 : index
      %c0_138 = arith.constant 0 : index
      %247 = vector.load %arg3[%c14_137, %c0_138] : memref<16x128xf32, #tpu.memory_space<vmem>>, vector<1x128xf32>
      %248 = arith.addf %246, %247 : vector<1x128xf32>
      %c14_139 = arith.constant 14 : index
      %c0_140 = arith.constant 0 : index
      %249 = vector.load %arg19[%c14_139, %c0_140] : memref<32x128xf32, #tpu.memory_space<vmem>>, vector<1x128xf32>
      tpu.vector_store %arg19[%c14_139, %c0_140], %248 {strides = array<i32>} : memref<32x128xf32, #tpu.memory_space<vmem>>, vector<1x128xf32>,
      %c15 = arith.constant 15 : index
      %250 = memref.load %arg1[%c15] : memref<32xi32, #tpu.memory_space<smem>>
      %251 = arith.index_cast %250 : i32 to index
      %c0_141 = arith.constant 0 : index
      %252 = vector.load %arg2[%251, %c0_141] : memref<512x128xf32, #tpu.memory_space<vmem>>, vector<1x128xf32>
      %c15_142 = arith.constant 15 : index
      %c0_143 = arith.constant 0 : index
      %253 = vector.load %arg3[%c15_142, %c0_143] : memref<16x128xf32, #tpu.memory_space<vmem>>, vector<1x128xf32>
      %254 = arith.addf %252, %253 : vector<1x128xf32>
      %c15_144 = arith.constant 15 : index
      %c0_145 = arith.constant 0 : index
      %255 = vector.load %arg19[%c15_144, %c0_145] : memref<32x128xf32, #tpu.memory_space<vmem>>, vector<1x128xf32>
      tpu.vector_store %arg19[%c15_144, %c0_145], %254 {strides = array<i32>} : memref<32x128xf32, #tpu.memory_space<vmem>>, vector<1x128xf32>,
      %c16 = arith.constant 16 : index
      %256 = memref.load %arg1[%c16] : memref<32xi32, #tpu.memory_space<smem>>
      %257 = arith.index_cast %256 : i32 to index
      %c0_146 = arith.constant 0 : index
      %258 = vector.load %arg2[%257, %c0_146] : memref<512x128xf32, #tpu.memory_space<vmem>>, vector<1x128xf32>
      %c0_147 = arith.constant 0 : index
      %c0_148 = arith.constant 0 : index
      %259 = vector.load %arg3[%c0_147, %c0_148] : memref<16x128xf32, #tpu.memory_space<vmem>>, vector<1x128xf32>
      %260 = arith.addf %258, %259 : vector<1x128xf32>
      %c16_149 = arith.constant 16 : index
      %c0_150 = arith.constant 0 : index
      %261 = vector.load %arg19[%c16_149, %c0_150] : memref<32x128xf32, #tpu.memory_space<vmem>>, vector<1x128xf32>
      tpu.vector_store %arg19[%c16_149, %c0_150], %260 {strides = array<i32>} : memref<32x128xf32, #tpu.memory_space<vmem>>, vector<1x128xf32>,
      %c17 = arith.constant 17 : index
      %262 = memref.load %arg1[%c17] : memref<32xi32, #tpu.memory_space<smem>>
      %263 = arith.index_cast %262 : i32 to index
      %c0_151 = arith.constant 0 : index
      %264 = vector.load %arg2[%263, %c0_151] : memref<512x128xf32, #tpu.memory_space<vmem>>, vector<1x128xf32>
      %c1_152 = arith.constant 1 : index
      %c0_153 = arith.constant 0 : index
      %265 = vector.load %arg3[%c1_152, %c0_153] : memref<16x128xf32, #tpu.memory_space<vmem>>, vector<1x128xf32>
      %266 = arith.addf %264, %265 : vector<1x128xf32>
      %c17_154 = arith.constant 17 : index
      %c0_155 = arith.constant 0 : index
      %267 = vector.load %arg19[%c17_154, %c0_155] : memref<32x128xf32, #tpu.memory_space<vmem>>, vector<1x128xf32>
      tpu.vector_store %arg19[%c17_154, %c0_155], %266 {strides = array<i32>} : memref<32x128xf32, #tpu.memory_space<vmem>>, vector<1x128xf32>,
      %c18 = arith.constant 18 : index
      %268 = memref.load %arg1[%c18] : memref<32xi32, #tpu.memory_space<smem>>
      %269 = arith.index_cast %268 : i32 to index
      %c0_156 = arith.constant 0 : index
      %270 = vector.load %arg2[%269, %c0_156] : memref<512x128xf32, #tpu.memory_space<vmem>>, vector<1x128xf32>
      %c2_157 = arith.constant 2 : index
      %c0_158 = arith.constant 0 : index
      %271 = vector.load %arg3[%c2_157, %c0_158] : memref<16x128xf32, #tpu.memory_space<vmem>>, vector<1x128xf32>
      %272 = arith.addf %270, %271 : vector<1x128xf32>
      %c18_159 = arith.constant 18 : index
      %c0_160 = arith.constant 0 : index
      %273 = vector.load %arg19[%c18_159, %c0_160] : memref<32x128xf32, #tpu.memory_space<vmem>>, vector<1x128xf32>
      tpu.vector_store %arg19[%c18_159, %c0_160], %272 {strides = array<i32>} : memref<32x128xf32, #tpu.memory_space<vmem>>, vector<1x128xf32>,
      %c19 = arith.constant 19 : index
      %274 = memref.load %arg1[%c19] : memref<32xi32, #tpu.memory_space<smem>>
      %275 = arith.index_cast %274 : i32 to index
      %c0_161 = arith.constant 0 : index
      %276 = vector.load %arg2[%275, %c0_161] : memref<512x128xf32, #tpu.memory_space<vmem>>, vector<1x128xf32>
      %c3_162 = arith.constant 3 : index
      %c0_163 = arith.constant 0 : index
      %277 = vector.load %arg3[%c3_162, %c0_163] : memref<16x128xf32, #tpu.memory_space<vmem>>, vector<1x128xf32>
      %278 = arith.addf %276, %277 : vector<1x128xf32>
      %c19_164 = arith.constant 19 : index
      %c0_165 = arith.constant 0 : index
      %279 = vector.load %arg19[%c19_164, %c0_165] : memref<32x128xf32, #tpu.memory_space<vmem>>, vector<1x128xf32>
      tpu.vector_store %arg19[%c19_164, %c0_165], %278 {strides = array<i32>} : memref<32x128xf32, #tpu.memory_space<vmem>>, vector<1x128xf32>,
      %c20 = arith.constant 20 : index
      %280 = memref.load %arg1[%c20] : memref<32xi32, #tpu.memory_space<smem>>
      %281 = arith.index_cast %280 : i32 to index
      %c0_166 = arith.constant 0 : index
      %282 = vector.load %arg2[%281, %c0_166] : memref<512x128xf32, #tpu.memory_space<vmem>>, vector<1x128xf32>
      %c4_167 = arith.constant 4 : index
      %c0_168 = arith.constant 0 : index
      %283 = vector.load %arg3[%c4_167, %c0_168] : memref<16x128xf32, #tpu.memory_space<vmem>>, vector<1x128xf32>
      %284 = arith.addf %282, %283 : vector<1x128xf32>
      %c20_169 = arith.constant 20 : index
      %c0_170 = arith.constant 0 : index
      %285 = vector.load %arg19[%c20_169, %c0_170] : memref<32x128xf32, #tpu.memory_space<vmem>>, vector<1x128xf32>
      tpu.vector_store %arg19[%c20_169, %c0_170], %284 {strides = array<i32>} : memref<32x128xf32, #tpu.memory_space<vmem>>, vector<1x128xf32>,
      %c21 = arith.constant 21 : index
      %286 = memref.load %arg1[%c21] : memref<32xi32, #tpu.memory_space<smem>>
      %287 = arith.index_cast %286 : i32 to index
      %c0_171 = arith.constant 0 : index
      %288 = vector.load %arg2[%287, %c0_171] : memref<512x128xf32, #tpu.memory_space<vmem>>, vector<1x128xf32>
      %c5_172 = arith.constant 5 : index
      %c0_173 = arith.constant 0 : index
      %289 = vector.load %arg3[%c5_172, %c0_173] : memref<16x128xf32, #tpu.memory_space<vmem>>, vector<1x128xf32>
      %290 = arith.addf %288, %289 : vector<1x128xf32>
      %c21_174 = arith.constant 21 : index
      %c0_175 = arith.constant 0 : index
      %291 = vector.load %arg19[%c21_174, %c0_175] : memref<32x128xf32, #tpu.memory_space<vmem>>, vector<1x128xf32>
      tpu.vector_store %arg19[%c21_174, %c0_175], %290 {strides = array<i32>} : memref<32x128xf32, #tpu.memory_space<vmem>>, vector<1x128xf32>,
      %c22 = arith.constant 22 : index
      %292 = memref.load %arg1[%c22] : memref<32xi32, #tpu.memory_space<smem>>
      %293 = arith.index_cast %292 : i32 to index
      %c0_176 = arith.constant 0 : index
      %294 = vector.load %arg2[%293, %c0_176] : memref<512x128xf32, #tpu.memory_space<vmem>>, vector<1x128xf32>
      %c6_177 = arith.constant 6 : index
      %c0_178 = arith.constant 0 : index
      %295 = vector.load %arg3[%c6_177, %c0_178] : memref<16x128xf32, #tpu.memory_space<vmem>>, vector<1x128xf32>
      %296 = arith.addf %294, %295 : vector<1x128xf32>
      %c22_179 = arith.constant 22 : index
      %c0_180 = arith.constant 0 : index
      %297 = vector.load %arg19[%c22_179, %c0_180] : memref<32x128xf32, #tpu.memory_space<vmem>>, vector<1x128xf32>
      tpu.vector_store %arg19[%c22_179, %c0_180], %296 {strides = array<i32>} : memref<32x128xf32, #tpu.memory_space<vmem>>, vector<1x128xf32>,
      %c23 = arith.constant 23 : index
      %298 = memref.load %arg1[%c23] : memref<32xi32, #tpu.memory_space<smem>>
      %299 = arith.index_cast %298 : i32 to index
      %c0_181 = arith.constant 0 : index
      %300 = vector.load %arg2[%299, %c0_181] : memref<512x128xf32, #tpu.memory_space<vmem>>, vector<1x128xf32>
      %c7_182 = arith.constant 7 : index
      %c0_183 = arith.constant 0 : index
      %301 = vector.load %arg3[%c7_182, %c0_183] : memref<16x128xf32, #tpu.memory_space<vmem>>, vector<1x128xf32>
      %302 = arith.addf %300, %301 : vector<1x128xf32>
      %c23_184 = arith.constant 23 : index
      %c0_185 = arith.constant 0 : index
      %303 = vector.load %arg19[%c23_184, %c0_185] : memref<32x128xf32, #tpu.memory_space<vmem>>, vector<1x128xf32>
      tpu.vector_store %arg19[%c23_184, %c0_185], %302 {strides = array<i32>} : memref<32x128xf32, #tpu.memory_space<vmem>>, vector<1x128xf32>,
      %c24 = arith.constant 24 : index
      %304 = memref.load %arg1[%c24] : memref<32xi32, #tpu.memory_space<smem>>
      %305 = arith.index_cast %304 : i32 to index
      %c0_186 = arith.constant 0 : index
      %306 = vector.load %arg2[%305, %c0_186] : memref<512x128xf32, #tpu.memory_space<vmem>>, vector<1x128xf32>
      %c8_187 = arith.constant 8 : index
      %c0_188 = arith.constant 0 : index
      %307 = vector.load %arg3[%c8_187, %c0_188] : memref<16x128xf32, #tpu.memory_space<vmem>>, vector<1x128xf32>
      %308 = arith.addf %306, %307 : vector<1x128xf32>
      %c24_189 = arith.constant 24 : index
      %c0_190 = arith.constant 0 : index
      %309 = vector.load %arg19[%c24_189, %c0_190] : memref<32x128xf32, #tpu.memory_space<vmem>>, vector<1x128xf32>
      tpu.vector_store %arg19[%c24_189, %c0_190], %308 {strides = array<i32>} : memref<32x128xf32, #tpu.memory_space<vmem>>, vector<1x128xf32>,
      %c25 = arith.constant 25 : index
      %310 = memref.load %arg1[%c25] : memref<32xi32, #tpu.memory_space<smem>>
      %311 = arith.index_cast %310 : i32 to index
      %c0_191 = arith.constant 0 : index
      %312 = vector.load %arg2[%311, %c0_191] : memref<512x128xf32, #tpu.memory_space<vmem>>, vector<1x128xf32>
      %c9_192 = arith.constant 9 : index
      %c0_193 = arith.constant 0 : index
      %313 = vector.load %arg3[%c9_192, %c0_193] : memref<16x128xf32, #tpu.memory_space<vmem>>, vector<1x128xf32>
      %314 = arith.addf %312, %313 : vector<1x128xf32>
      %c25_194 = arith.constant 25 : index
      %c0_195 = arith.constant 0 : index
      %315 = vector.load %arg19[%c25_194, %c0_195] : memref<32x128xf32, #tpu.memory_space<vmem>>, vector<1x128xf32>
      tpu.vector_store %arg19[%c25_194, %c0_195], %314 {strides = array<i32>} : memref<32x128xf32, #tpu.memory_space<vmem>>, vector<1x128xf32>,
      %c26 = arith.constant 26 : index
      %316 = memref.load %arg1[%c26] : memref<32xi32, #tpu.memory_space<smem>>
      %317 = arith.index_cast %316 : i32 to index
      %c0_196 = arith.constant 0 : index
      %318 = vector.load %arg2[%317, %c0_196] : memref<512x128xf32, #tpu.memory_space<vmem>>, vector<1x128xf32>
      %c10_197 = arith.constant 10 : index
      %c0_198 = arith.constant 0 : index
      %319 = vector.load %arg3[%c10_197, %c0_198] : memref<16x128xf32, #tpu.memory_space<vmem>>, vector<1x128xf32>
      %320 = arith.addf %318, %319 : vector<1x128xf32>
      %c26_199 = arith.constant 26 : index
      %c0_200 = arith.constant 0 : index
      %321 = vector.load %arg19[%c26_199, %c0_200] : memref<32x128xf32, #tpu.memory_space<vmem>>, vector<1x128xf32>
      tpu.vector_store %arg19[%c26_199, %c0_200], %320 {strides = array<i32>} : memref<32x128xf32, #tpu.memory_space<vmem>>, vector<1x128xf32>,
      %c27 = arith.constant 27 : index
      %322 = memref.load %arg1[%c27] : memref<32xi32, #tpu.memory_space<smem>>
      %323 = arith.index_cast %322 : i32 to index
      %c0_201 = arith.constant 0 : index
      %324 = vector.load %arg2[%323, %c0_201] : memref<512x128xf32, #tpu.memory_space<vmem>>, vector<1x128xf32>
      %c11_202 = arith.constant 11 : index
      %c0_203 = arith.constant 0 : index
      %325 = vector.load %arg3[%c11_202, %c0_203] : memref<16x128xf32, #tpu.memory_space<vmem>>, vector<1x128xf32>
      %326 = arith.addf %324, %325 : vector<1x128xf32>
      %c27_204 = arith.constant 27 : index
      %c0_205 = arith.constant 0 : index
      %327 = vector.load %arg19[%c27_204, %c0_205] : memref<32x128xf32, #tpu.memory_space<vmem>>, vector<1x128xf32>
      tpu.vector_store %arg19[%c27_204, %c0_205], %326 {strides = array<i32>} : memref<32x128xf32, #tpu.memory_space<vmem>>, vector<1x128xf32>,
      %c28 = arith.constant 28 : index
      %328 = memref.load %arg1[%c28] : memref<32xi32, #tpu.memory_space<smem>>
      %329 = arith.index_cast %328 : i32 to index
      %c0_206 = arith.constant 0 : index
      %330 = vector.load %arg2[%329, %c0_206] : memref<512x128xf32, #tpu.memory_space<vmem>>, vector<1x128xf32>
      %c12_207 = arith.constant 12 : index
      %c0_208 = arith.constant 0 : index
      %331 = vector.load %arg3[%c12_207, %c0_208] : memref<16x128xf32, #tpu.memory_space<vmem>>, vector<1x128xf32>
      %332 = arith.addf %330, %331 : vector<1x128xf32>
      %c28_209 = arith.constant 28 : index
      %c0_210 = arith.constant 0 : index
      %333 = vector.load %arg19[%c28_209, %c0_210] : memref<32x128xf32, #tpu.memory_space<vmem>>, vector<1x128xf32>
      tpu.vector_store %arg19[%c28_209, %c0_210], %332 {strides = array<i32>} : memref<32x128xf32, #tpu.memory_space<vmem>>, vector<1x128xf32>,
      %c29 = arith.constant 29 : index
      %334 = memref.load %arg1[%c29] : memref<32xi32, #tpu.memory_space<smem>>
      %335 = arith.index_cast %334 : i32 to index
      %c0_211 = arith.constant 0 : index
      %336 = vector.load %arg2[%335, %c0_211] : memref<512x128xf32, #tpu.memory_space<vmem>>, vector<1x128xf32>
      %c13_212 = arith.constant 13 : index
      %c0_213 = arith.constant 0 : index
      %337 = vector.load %arg3[%c13_212, %c0_213] : memref<16x128xf32, #tpu.memory_space<vmem>>, vector<1x128xf32>
      %338 = arith.addf %336, %337 : vector<1x128xf32>
      %c29_214 = arith.constant 29 : index
      %c0_215 = arith.constant 0 : index
      %339 = vector.load %arg19[%c29_214, %c0_215] : memref<32x128xf32, #tpu.memory_space<vmem>>, vector<1x128xf32>
      tpu.vector_store %arg19[%c29_214, %c0_215], %338 {strides = array<i32>} : memref<32x128xf32, #tpu.memory_space<vmem>>, vector<1x128xf32>,
      %c30 = arith.constant 30 : index
      %340 = memref.load %arg1[%c30] : memref<32xi32, #tpu.memory_space<smem>>
      %341 = arith.index_cast %340 : i32 to index
      %c0_216 = arith.constant 0 : index
      %342 = vector.load %arg2[%341, %c0_216] : memref<512x128xf32, #tpu.memory_space<vmem>>, vector<1x128xf32>
      %c14_217 = arith.constant 14 : index
      %c0_218 = arith.constant 0 : index
      %343 = vector.load %arg3[%c14_217, %c0_218] : memref<16x128xf32, #tpu.memory_space<vmem>>, vector<1x128xf32>
      %344 = arith.addf %342, %343 : vector<1x128xf32>
      %c30_219 = arith.constant 30 : index
      %c0_220 = arith.constant 0 : index
      %345 = vector.load %arg19[%c30_219, %c0_220] : memref<32x128xf32, #tpu.memory_space<vmem>>, vector<1x128xf32>
      tpu.vector_store %arg19[%c30_219, %c0_220], %344 {strides = array<i32>} : memref<32x128xf32, #tpu.memory_space<vmem>>, vector<1x128xf32>,
      %c31 = arith.constant 31 : index
      %346 = memref.load %arg1[%c31] : memref<32xi32, #tpu.memory_space<smem>>
      %347 = arith.index_cast %346 : i32 to index
      %c0_221 = arith.constant 0 : index
      %348 = vector.load %arg2[%347, %c0_221] : memref<512x128xf32, #tpu.memory_space<vmem>>, vector<1x128xf32>
      %c15_222 = arith.constant 15 : index
      %c0_223 = arith.constant 0 : index
      %349 = vector.load %arg3[%c15_222, %c0_223] : memref<16x128xf32, #tpu.memory_space<vmem>>, vector<1x128xf32>
      %350 = arith.addf %348, %349 : vector<1x128xf32>
      %c31_224 = arith.constant 31 : index
      %c0_225 = arith.constant 0 : index
      %351 = vector.load %arg19[%c31_224, %c0_225] : memref<32x128xf32, #tpu.memory_space<vmem>>, vector<1x128xf32>
      tpu.vector_store %arg19[%c31_224, %c0_225], %350 {strides = array<i32>} : memref<32x128xf32, #tpu.memory_space<vmem>>, vector<1x128xf32>,
    } else {
    }
    %c0 = arith.constant 0 : index
    %c0_1 = arith.constant 0 : index
    %3 = vector.load %arg19[%c0, %c0_1] : memref<32x128xf32, #tpu.memory_space<vmem>>, vector<32x128xf32>
    %c0_2 = arith.constant 0 : index
    %c0_3 = arith.constant 0 : index
    %c0_4 = arith.constant 0 : index
    %4 = vector.load %arg4[%c0_2, %c0_3, %c0_4] : memref<1x1x128xf32, #tpu.memory_space<vmem>>, vector<1x1x128xf32>
    %5 = vector.shape_cast %4 : vector<1x1x128xf32> to vector<1x128xf32>
    %c0_5 = arith.constant 0 : index
    %c0_6 = arith.constant 0 : index
    %c0_7 = arith.constant 0 : index
    %6 = vector.load %arg5[%c0_5, %c0_6, %c0_7] : memref<1x1x128xf32, #tpu.memory_space<vmem>>, vector<1x1x128xf32>
    %7 = vector.shape_cast %6 : vector<1x1x128xf32> to vector<1x128xf32>
    %cst = arith.constant dense<0.000000e+00> : vector<32xf32>
    %8 = vector.multi_reduction <add>, %3, %cst [1] : vector<32x128xf32> to vector<32xf32>
    %9 = vector.shape_cast %8 : vector<32xf32> to vector<32x1xf32>
    %cst_8 = arith.constant 1.280000e+02 : f32
    %10 = vector.broadcast %cst_8 : f32 to vector<32x1xf32>
    %11 = arith.divf %9, %10 : vector<32x1xf32>
    %12 = vector.broadcast %11 : vector<32x1xf32> to vector<32x128xf32>
    %13 = arith.subf %3, %12 : vector<32x128xf32>
    %14 = arith.mulf %13, %13 : vector<32x128xf32>
    %cst_9 = arith.constant dense<0.000000e+00> : vector<32xf32>
    %15 = vector.multi_reduction <add>, %14, %cst_9 [1] : vector<32x128xf32> to vector<32xf32>
    %16 = vector.shape_cast %15 : vector<32xf32> to vector<32x1xf32>
    %cst_10 = arith.constant 1.280000e+02 : f32
    %17 = vector.broadcast %cst_10 : f32 to vector<32x1xf32>
    %18 = arith.divf %16, %17 : vector<32x1xf32>
    %19 = vector.broadcast %11 : vector<32x1xf32> to vector<32x128xf32>
    %20 = arith.subf %3, %19 : vector<32x128xf32>
    %cst_11 = arith.constant 9.99999974E-6 : f32
    %21 = vector.broadcast %cst_11 : f32 to vector<32x1xf32>
    %22 = arith.addf %18, %21 : vector<32x1xf32>
    %23 = math.rsqrt %22 : vector<32x1xf32>
    %24 = vector.broadcast %23 : vector<32x1xf32> to vector<32x128xf32>
    %25 = arith.mulf %20, %24 : vector<32x128xf32>
    %26 = vector.broadcast %5 : vector<1x128xf32> to vector<32x128xf32>
    %27 = arith.mulf %25, %26 : vector<32x128xf32>
    %28 = vector.broadcast %7 : vector<1x128xf32> to vector<32x128xf32>
    %29 = arith.addf %27, %28 : vector<32x128xf32>
    %30 = arith.truncf %29 : vector<32x128xf32> to vector<32x128xbf16>
    %c0_12 = arith.constant 0 : index
    %c0_13 = arith.constant 0 : index
    %c0_14 = arith.constant 0 : index
    %31 = vector.load %arg6[%c0_12, %c0_13, %c0_14] : memref<1x128x384xbf16, #tpu.memory_space<vmem>>, vector<1x128x384xbf16>
    %32 = vector.shape_cast %31 : vector<1x128x384xbf16> to vector<128x384xbf16>
    %cst_15 = arith.constant dense<0.000000e+00> : vector<32x384xf32>
    %33 = tpu.matmul %30, %32, %cst_15 {dimension_numbers = #tpu.dot_dimension_numbers<[1], [0], [0], [1], [0, 0, 1, 1], [], []>} : vector<32x128xbf16>, vector<128x384xbf16>, vector<32x384xf32> -> vector<32x384xf32>
    %c0_16 = arith.constant 0 : index
    %c0_17 = arith.constant 0 : index
    %c0_18 = arith.constant 0 : index
    %34 = vector.load %arg7[%c0_16, %c0_17, %c0_18] : memref<1x1x384xf32, #tpu.memory_space<vmem>>, vector<1x1x384xf32>
    %35 = vector.shape_cast %34 : vector<1x1x384xf32> to vector<1x384xf32>
    %36 = vector.broadcast %35 : vector<1x384xf32> to vector<32x384xf32>
    %37 = arith.addf %33, %36 : vector<32x384xf32>
    %38 = vector.extract_strided_slice %37 {offsets = [0, 0], sizes = [32, 128], strides = [1, 1]} : vector<32x384xf32> to vector<32x128xf32>
    %cst_19 = arith.constant 0.176776692 : f32
    %39 = vector.broadcast %cst_19 : f32 to vector<32x128xf32>
    %40 = arith.mulf %38, %39 : vector<32x128xf32>
    %41 = vector.extract_strided_slice %37 {offsets = [0, 128], sizes = [32, 128], strides = [1, 1]} : vector<32x384xf32> to vector<32x128xf32>
    %42 = vector.extract_strided_slice %37 {offsets = [0, 256], sizes = [32, 128], strides = [1, 1]} : vector<32x384xf32> to vector<32x128xf32>
    %43 = vector.extract_strided_slice %40 {offsets = [0, 0], sizes = [32, 32], strides = [1, 1]} : vector<32x128xf32> to vector<32x32xf32>
    %44 = vector.shape_cast %43 : vector<32x32xf32> to vector<2x16x32xf32>
    %45 = vector.extract_strided_slice %40 {offsets = [0, 32], sizes = [32, 32], strides = [1, 1]} : vector<32x128xf32> to vector<32x32xf32>
    %46 = vector.shape_cast %45 : vector<32x32xf32> to vector<2x16x32xf32>
    %47 = vector.extract_strided_slice %40 {offsets = [0, 64], sizes = [32, 32], strides = [1, 1]} : vector<32x128xf32> to vector<32x32xf32>
    %48 = vector.shape_cast %47 : vector<32x32xf32> to vector<2x16x32xf32>
    %49 = vector.extract_strided_slice %40 {offsets = [0, 96], sizes = [32, 32], strides = [1, 1]} : vector<32x128xf32> to vector<32x32xf32>
    %50 = vector.shape_cast %49 : vector<32x32xf32> to vector<2x16x32xf32>
    %51 = tpu.concatenate %44, %46, %48, %50 in 0 : vector<2x16x32xf32>, vector<2x16x32xf32>, vector<2x16x32xf32>, vector<2x16x32xf32> -> vector<8x16x32xf32>
    %52 = arith.truncf %51 : vector<8x16x32xf32> to vector<8x16x32xbf16>
    %53 = vector.extract_strided_slice %41 {offsets = [0, 0], sizes = [32, 32], strides = [1, 1]} : vector<32x128xf32> to vector<32x32xf32>
    %54 = vector.shape_cast %53 : vector<32x32xf32> to vector<2x16x32xf32>
    %55 = vector.extract_strided_slice %41 {offsets = [0, 32], sizes = [32, 32], strides = [1, 1]} : vector<32x128xf32> to vector<32x32xf32>
    %56 = vector.shape_cast %55 : vector<32x32xf32> to vector<2x16x32xf32>
    %57 = vector.extract_strided_slice %41 {offsets = [0, 64], sizes = [32, 32], strides = [1, 1]} : vector<32x128xf32> to vector<32x32xf32>
    %58 = vector.shape_cast %57 : vector<32x32xf32> to vector<2x16x32xf32>
    %59 = vector.extract_strided_slice %41 {offsets = [0, 96], sizes = [32, 32], strides = [1, 1]} : vector<32x128xf32> to vector<32x32xf32>
    %60 = vector.shape_cast %59 : vector<32x32xf32> to vector<2x16x32xf32>
    %61 = tpu.concatenate %54, %56, %58, %60 in 0 : vector<2x16x32xf32>, vector<2x16x32xf32>, vector<2x16x32xf32>, vector<2x16x32xf32> -> vector<8x16x32xf32>
    %62 = arith.truncf %61 : vector<8x16x32xf32> to vector<8x16x32xbf16>
    %63 = vector.extract_strided_slice %42 {offsets = [0, 0], sizes = [32, 32], strides = [1, 1]} : vector<32x128xf32> to vector<32x32xf32>
    %64 = vector.shape_cast %63 : vector<32x32xf32> to vector<2x16x32xf32>
    %65 = vector.extract_strided_slice %42 {offsets = [0, 32], sizes = [32, 32], strides = [1, 1]} : vector<32x128xf32> to vector<32x32xf32>
    %66 = vector.shape_cast %65 : vector<32x32xf32> to vector<2x16x32xf32>
    %67 = vector.extract_strided_slice %42 {offsets = [0, 64], sizes = [32, 32], strides = [1, 1]} : vector<32x128xf32> to vector<32x32xf32>
    %68 = vector.shape_cast %67 : vector<32x32xf32> to vector<2x16x32xf32>
    %69 = vector.extract_strided_slice %42 {offsets = [0, 96], sizes = [32, 32], strides = [1, 1]} : vector<32x128xf32> to vector<32x32xf32>
    %70 = vector.shape_cast %69 : vector<32x32xf32> to vector<2x16x32xf32>
    %71 = tpu.concatenate %64, %66, %68, %70 in 0 : vector<2x16x32xf32>, vector<2x16x32xf32>, vector<2x16x32xf32>, vector<2x16x32xf32> -> vector<8x16x32xf32>
    %72 = arith.truncf %71 : vector<8x16x32xf32> to vector<8x16x32xbf16>
    "tpu.trace_start"() <{level = 10 : i32, message = "xqd,xkd->xqk"}> : () -> ()
    %cst_20 = arith.constant dense<0.000000e+00> : vector<8x16x16xf32>
    %73 = tpu.matmul %52, %62, %cst_20 {dimension_numbers = #tpu.dot_dimension_numbers<[2], [2], [1], [1], [0, 0, 0, 1, 1, 1], [0], [0]>} : vector<8x16x32xbf16>, vector<8x16x32xbf16>, vector<8x16x16xf32> -> vector<8x16x16xf32>
    "tpu.trace_stop"() : () -> ()
    %74 = tpu.iota {dimensions = array<i32: 0>} : vector<16x16xi32>
    %75 = tpu.iota {dimensions = array<i32: 1>} : vector<16x16xi32>
    %76 = arith.cmpi sle, %75, %74 : vector<16x16xi32>
    %cst_21 = arith.constant 0.000000e+00 : f32
    %cst_22 = arith.constant -1.000000e+30 : f32
    %77 = vector.broadcast %cst_21 : f32 to vector<16x16xf32>
    %78 = vector.broadcast %cst_22 : f32 to vector<16x16xf32>
    %79 = arith.select %76, %77, %78 : vector<16x16xi1>, vector<16x16xf32>
    %80 = vector.shape_cast %79 : vector<16x16xf32> to vector<1x16x16xf32>
    %81 = vector.broadcast %80 : vector<1x16x16xf32> to vector<8x16x16xf32>
    %82 = arith.addf %73, %81 : vector<8x16x16xf32>
    %cst_23 = arith.constant dense<0xFF800000> : vector<8x16xf32>
    %83 = vector.multi_reduction <maximumf>, %82, %cst_23 [2] : vector<8x16x16xf32> to vector<8x16xf32>
    %84 = vector.shape_cast %83 : vector<8x16xf32> to vector<8x16x1xf32>
    %85 = vector.broadcast %84 : vector<8x16x1xf32> to vector<8x16x16xf32>
    %86 = arith.subf %82, %85 : vector<8x16x16xf32>
    %87 = math.exp %86 : vector<8x16x16xf32>
    %cst_24 = arith.constant dense<0.000000e+00> : vector<8x16xf32>
    %88 = vector.multi_reduction <add>, %87, %cst_24 [2] : vector<8x16x16xf32> to vector<8x16xf32>
    %89 = vector.shape_cast %88 : vector<8x16xf32> to vector<8x16x1xf32>
    %90 = vector.broadcast %89 : vector<8x16x1xf32> to vector<8x16x16xf32>
    %91 = arith.divf %87, %90 : vector<8x16x16xf32>
    %92 = arith.truncf %91 : vector<8x16x16xf32> to vector<8x16x16xbf16>
    "tpu.trace_start"() <{level = 10 : i32, message = "xqk,xkd->xqd"}> : () -> ()
    %cst_25 = arith.constant dense<0.000000e+00> : vector<8x16x32xf32>
    %93 = tpu.matmul %92, %72, %cst_25 {dimension_numbers = #tpu.dot_dimension_numbers<[2], [1], [1], [2], [0, 0, 0, 1, 1, 2], [0], [0]>} : vector<8x16x16xbf16>, vector<8x16x32xbf16>, vector<8x16x32xf32> -> vector<8x16x32xf32>
    "tpu.trace_stop"() : () -> ()
    %94 = vector.shape_cast %93 : vector<8x16x32xf32> to vector<4x32x32xf32>
    %95 = arith.truncf %94 : vector<4x32x32xf32> to vector<4x32x32xbf16>
    %c0_26 = arith.constant 0 : index
    %c0_27 = arith.constant 0 : index
    %c0_28 = arith.constant 0 : index
    %c0_29 = arith.constant 0 : index
    %96 = vector.load %arg8[%c0_26, %c0_27, %c0_28, %c0_29] : memref<1x4x32x128xbf16, #tpu.memory_space<vmem>>, vector<1x4x32x128xbf16>
    %97 = vector.shape_cast %96 : vector<1x4x32x128xbf16> to vector<4x32x128xbf16>
    "tpu.trace_start"() <{level = 10 : i32, message = "hmd,hde->hme"}> : () -> ()
    %cst_30 = arith.constant dense<0.000000e+00> : vector<4x32x128xf32>
    %98 = tpu.matmul %95, %97, %cst_30 {dimension_numbers = #tpu.dot_dimension_numbers<[2], [1], [1], [2], [0, 0, 0, 1, 1, 2], [0], [0]>} : vector<4x32x32xbf16>, vector<4x32x128xbf16>, vector<4x32x128xf32> -> vector<4x32x128xf32>
    "tpu.trace_stop"() : () -> ()
    %cst_31 = arith.constant dense<0.000000e+00> : vector<32x128xf32>
    %99 = vector.multi_reduction <add>, %98, %cst_31 [0] : vector<4x32x128xf32> to vector<32x128xf32>
    %c0_32 = arith.constant 0 : index
    %c0_33 = arith.constant 0 : index
    %c0_34 = arith.constant 0 : index
    %100 = vector.load %arg9[%c0_32, %c0_33, %c0_34] : memref<1x1x128xf32, #tpu.memory_space<vmem>>, vector<1x1x128xf32>
    %101 = vector.shape_cast %100 : vector<1x1x128xf32> to vector<1x128xf32>
    %102 = vector.broadcast %101 : vector<1x128xf32> to vector<32x128xf32>
    %103 = arith.addf %99, %102 : vector<32x128xf32>
    %104 = arith.addf %103, %3 : vector<32x128xf32>
    %c0_35 = arith.constant 0 : index
    %c0_36 = arith.constant 0 : index
    %c0_37 = arith.constant 0 : index
    %105 = vector.load %arg10[%c0_35, %c0_36, %c0_37] : memref<1x1x128xf32, #tpu.memory_space<vmem>>, vector<1x1x128xf32>
    %106 = vector.shape_cast %105 : vector<1x1x128xf32> to vector<1x128xf32>
    %c0_38 = arith.constant 0 : index
    %c0_39 = arith.constant 0 : index
    %c0_40 = arith.constant 0 : index
    %107 = vector.load %arg11[%c0_38, %c0_39, %c0_40] : memref<1x1x128xf32, #tpu.memory_space<vmem>>, vector<1x1x128xf32>
    %108 = vector.shape_cast %107 : vector<1x1x128xf32> to vector<1x128xf32>
    %cst_41 = arith.constant dense<0.000000e+00> : vector<32xf32>
    %109 = vector.multi_reduction <add>, %104, %cst_41 [1] : vector<32x128xf32> to vector<32xf32>
    %110 = vector.shape_cast %109 : vector<32xf32> to vector<32x1xf32>
    %cst_42 = arith.constant 1.280000e+02 : f32
    %111 = vector.broadcast %cst_42 : f32 to vector<32x1xf32>
    %112 = arith.divf %110, %111 : vector<32x1xf32>
    %113 = vector.broadcast %112 : vector<32x1xf32> to vector<32x128xf32>
    %114 = arith.subf %104, %113 : vector<32x128xf32>
    %115 = arith.mulf %114, %114 : vector<32x128xf32>
    %cst_43 = arith.constant dense<0.000000e+00> : vector<32xf32>
    %116 = vector.multi_reduction <add>, %115, %cst_43 [1] : vector<32x128xf32> to vector<32xf32>
    %117 = vector.shape_cast %116 : vector<32xf32> to vector<32x1xf32>
    %cst_44 = arith.constant 1.280000e+02 : f32
    %118 = vector.broadcast %cst_44 : f32 to vector<32x1xf32>
    %119 = arith.divf %117, %118 : vector<32x1xf32>
    %120 = vector.broadcast %112 : vector<32x1xf32> to vector<32x128xf32>
    %121 = arith.subf %104, %120 : vector<32x128xf32>
    %cst_45 = arith.constant 9.99999974E-6 : f32
    %122 = vector.broadcast %cst_45 : f32 to vector<32x1xf32>
    %123 = arith.addf %119, %122 : vector<32x1xf32>
    %124 = math.rsqrt %123 : vector<32x1xf32>
    %125 = vector.broadcast %124 : vector<32x1xf32> to vector<32x128xf32>
    %126 = arith.mulf %121, %125 : vector<32x128xf32>
    %127 = vector.broadcast %106 : vector<1x128xf32> to vector<32x128xf32>
    %128 = arith.mulf %126, %127 : vector<32x128xf32>
    %129 = vector.broadcast %108 : vector<1x128xf32> to vector<32x128xf32>
    %130 = arith.addf %128, %129 : vector<32x128xf32>
    %131 = arith.truncf %130 : vector<32x128xf32> to vector<32x128xbf16>
    %c0_46 = arith.constant 0 : index
    %c0_47 = arith.constant 0 : index
    %c0_48 = arith.constant 0 : index
    %132 = vector.load %arg12[%c0_46, %c0_47, %c0_48] : memref<1x128x512xbf16, #tpu.memory_space<vmem>>, vector<1x128x512xbf16>
    %133 = vector.shape_cast %132 : vector<1x128x512xbf16> to vector<128x512xbf16>
    %cst_49 = arith.constant dense<0.000000e+00> : vector<32x512xf32>
    %134 = tpu.matmul %131, %133, %cst_49 {dimension_numbers = #tpu.dot_dimension_numbers<[1], [0], [0], [1], [0, 0, 1, 1], [], []>} : vector<32x128xbf16>, vector<128x512xbf16>, vector<32x512xf32> -> vector<32x512xf32>
    %c0_50 = arith.constant 0 : index
    %c0_51 = arith.constant 0 : index
    %c0_52 = arith.constant 0 : index
    %135 = vector.load %arg13[%c0_50, %c0_51, %c0_52] : memref<1x1x512xf32, #tpu.memory_space<vmem>>, vector<1x1x512xf32>
    %136 = vector.shape_cast %135 : vector<1x1x512xf32> to vector<1x512xf32>
    %137 = vector.broadcast %136 : vector<1x512xf32> to vector<32x512xf32>
    %138 = arith.addf %134, %137 : vector<32x512xf32>
    %cst_53 = arith.constant 1.702000e+00 : f32
    %139 = vector.broadcast %cst_53 : f32 to vector<32x512xf32>
    %140 = arith.mulf %139, %138 : vector<32x512xf32>
    %141 = arith.negf %140 : vector<32x512xf32>
    %142 = math.exp %141 : vector<32x512xf32>
    %cst_54 = arith.constant 1.000000e+00 : f32
    %143 = vector.broadcast %cst_54 : f32 to vector<32x512xf32>
    %144 = arith.addf %143, %142 : vector<32x512xf32>
    %145 = arith.divf %143, %144 : vector<32x512xf32>
    %146 = arith.mulf %138, %145 : vector<32x512xf32>
    %147 = arith.truncf %146 : vector<32x512xf32> to vector<32x512xbf16>
    %c0_55 = arith.constant 0 : index
    %c0_56 = arith.constant 0 : index
    %c0_57 = arith.constant 0 : index
    %148 = vector.load %arg14[%c0_55, %c0_56, %c0_57] : memref<1x512x128xbf16, #tpu.memory_space<vmem>>, vector<1x512x128xbf16>
    %149 = vector.shape_cast %148 : vector<1x512x128xbf16> to vector<512x128xbf16>
    %cst_58 = arith.constant dense<0.000000e+00> : vector<32x128xf32>
    %150 = tpu.matmul %147, %149, %cst_58 {dimension_numbers = #tpu.dot_dimension_numbers<[1], [0], [0], [1], [0, 0, 1, 1], [], []>} : vector<32x512xbf16>, vector<512x128xbf16>, vector<32x128xf32> -> vector<32x128xf32>
    %c0_59 = arith.constant 0 : index
    %c0_60 = arith.constant 0 : index
    %c0_61 = arith.constant 0 : index
    %151 = vector.load %arg15[%c0_59, %c0_60, %c0_61] : memref<1x1x128xf32, #tpu.memory_space<vmem>>, vector<1x1x128xf32>
    %152 = vector.shape_cast %151 : vector<1x1x128xf32> to vector<1x128xf32>
    %153 = vector.broadcast %152 : vector<1x128xf32> to vector<32x128xf32>
    %154 = arith.addf %150, %153 : vector<32x128xf32>
    %155 = arith.addf %154, %104 : vector<32x128xf32>
    %c0_62 = arith.constant 0 : index
    %c0_63 = arith.constant 0 : index
    %156 = vector.load %arg19[%c0_62, %c0_63] : memref<32x128xf32, #tpu.memory_space<vmem>>, vector<32x128xf32>
    tpu.vector_store %arg19[%c0_62, %c0_63], %155 {strides = array<i32>} : memref<32x128xf32, #tpu.memory_space<vmem>>, vector<32x128xf32>,
    %c1_i32 = arith.constant 1 : i32
    %157 = arith.cmpi eq, %arg0, %c1_i32 : i32
    %158 = arith.extui %157 : i1 to i32
    %c0_i32_64 = arith.constant 0 : i32
    %159 = arith.cmpi ne, %158, %c0_i32_64 : i32
    scf.if %159 {
      %c0_65 = arith.constant 0 : index
      %c0_66 = arith.constant 0 : index
      %160 = vector.load %arg16[%c0_65, %c0_66] : memref<1x128xf32, #tpu.memory_space<vmem>>, vector<1x128xf32>
      %c0_67 = arith.constant 0 : index
      %c0_68 = arith.constant 0 : index
      %161 = vector.load %arg17[%c0_67, %c0_68] : memref<1x128xf32, #tpu.memory_space<vmem>>, vector<1x128xf32>
      %cst_69 = arith.constant dense<0.000000e+00> : vector<32xf32>
      %162 = vector.multi_reduction <add>, %155, %cst_69 [1] : vector<32x128xf32> to vector<32xf32>
      %163 = vector.shape_cast %162 : vector<32xf32> to vector<32x1xf32>
      %cst_70 = arith.constant 1.280000e+02 : f32
      %164 = vector.broadcast %cst_70 : f32 to vector<32x1xf32>
      %165 = arith.divf %163, %164 : vector<32x1xf32>
      %166 = vector.broadcast %165 : vector<32x1xf32> to vector<32x128xf32>
      %167 = arith.subf %155, %166 : vector<32x128xf32>
      %168 = arith.mulf %167, %167 : vector<32x128xf32>
      %cst_71 = arith.constant dense<0.000000e+00> : vector<32xf32>
      %169 = vector.multi_reduction <add>, %168, %cst_71 [1] : vector<32x128xf32> to vector<32xf32>
      %170 = vector.shape_cast %169 : vector<32xf32> to vector<32x1xf32>
      %cst_72 = arith.constant 1.280000e+02 : f32
      %171 = vector.broadcast %cst_72 : f32 to vector<32x1xf32>
      %172 = arith.divf %170, %171 : vector<32x1xf32>
      %173 = vector.broadcast %165 : vector<32x1xf32> to vector<32x128xf32>
      %174 = arith.subf %155, %173 : vector<32x128xf32>
      %cst_73 = arith.constant 9.99999974E-6 : f32
      %175 = vector.broadcast %cst_73 : f32 to vector<32x1xf32>
      %176 = arith.addf %172, %175 : vector<32x1xf32>
      %177 = math.rsqrt %176 : vector<32x1xf32>
      %178 = vector.broadcast %177 : vector<32x1xf32> to vector<32x128xf32>
      %179 = arith.mulf %174, %178 : vector<32x128xf32>
      %180 = vector.broadcast %160 : vector<1x128xf32> to vector<32x128xf32>
      %181 = arith.mulf %179, %180 : vector<32x128xf32>
      %182 = vector.broadcast %161 : vector<1x128xf32> to vector<32x128xf32>
      %183 = arith.addf %181, %182 : vector<32x128xf32>
      %c0_74 = arith.constant 0 : index
      %c0_75 = arith.constant 0 : index
      %184 = vector.load %arg18[%c0_74, %c0_75] : memref<32x128xf32, #tpu.memory_space<vmem>>, vector<32x128xf32>
      tpu.vector_store %arg18[%c0_74, %c0_75], %183 {strides = array<i32>} : memref<32x128xf32, #tpu.memory_space<vmem>>, vector<32x128xf32>,
    } else {
    }
    return
  }
  func.func @transform_0(%arg0: i32, %arg1: memref<32xi32, #tpu.memory_space<smem>>) -> (i32, i32) {
    %c0_i32 = arith.constant 0 : i32
    %c0_i32_0 = arith.constant 0 : i32
    %c0_i32_1 = arith.constant 0 : i32
    return %c0_i32, %c0_i32_0 : i32, i32
  }
  func.func @transform_1(%arg0: i32, %arg1: memref<32xi32, #tpu.memory_space<smem>>) -> (i32, i32) {
    %c0_i32 = arith.constant 0 : i32
    %c0_i32_0 = arith.constant 0 : i32
    %c0_i32_1 = arith.constant 0 : i32
    return %c0_i32, %c0_i32_0 : i32, i32
  }
  func.func @transform_2(%arg0: i32, %arg1: memref<32xi32, #tpu.memory_space<smem>>) -> (i32, i32, i32) {
    %c0_i32 = arith.constant 0 : i32
    %c0_i32_0 = arith.constant 0 : i32
    %c0_i32_1 = arith.constant 0 : i32
    return %arg0, %c0_i32, %c0_i32_0 : i32, i32, i32
  }
  func.func @transform_3(%arg0: i32, %arg1: memref<32xi32, #tpu.memory_space<smem>>) -> (i32, i32, i32) {
    %c0_i32 = arith.constant 0 : i32
    %c0_i32_0 = arith.constant 0 : i32
    %c0_i32_1 = arith.constant 0 : i32
    return %arg0, %c0_i32, %c0_i32_0 : i32, i32, i32
  }
  func.func @transform_4(%arg0: i32, %arg1: memref<32xi32, #tpu.memory_space<smem>>) -> (i32, i32, i32) {
    %c0_i32 = arith.constant 0 : i32
    %c0_i32_0 = arith.constant 0 : i32
    %c0_i32_1 = arith.constant 0 : i32
    return %arg0, %c0_i32, %c0_i32_0 : i32, i32, i32
  }
  func.func @transform_5(%arg0: i32, %arg1: memref<32xi32, #tpu.memory_space<smem>>) -> (i32, i32, i32) {
    %c0_i32 = arith.constant 0 : i32
    %c0_i32_0 = arith.constant 0 : i32
    %c0_i32_1 = arith.constant 0 : i32
    return %arg0, %c0_i32, %c0_i32_0 : i32, i32, i32
  }
  func.func @transform_6(%arg0: i32, %arg1: memref<32xi32, #tpu.memory_space<smem>>) -> (i32, i32, i32, i32) {
    %c0_i32 = arith.constant 0 : i32
    %c0_i32_0 = arith.constant 0 : i32
    %c0_i32_1 = arith.constant 0 : i32
    %c0_i32_2 = arith.constant 0 : i32
    return %arg0, %c0_i32, %c0_i32_0, %c0_i32_1 : i32, i32, i32, i32
  }
  func.func @transform_7(%arg0: i32, %arg1: memref<32xi32, #tpu.memory_space<smem>>) -> (i32, i32, i32) {
    %c0_i32 = arith.constant 0 : i32
    %c0_i32_0 = arith.constant 0 : i32
    %c0_i32_1 = arith.constant 0 : i32
    return %arg0, %c0_i32, %c0_i32_0 : i32, i32, i32
  }
  func.func @transform_8(%arg0: i32, %arg1: memref<32xi32, #tpu.memory_space<smem>>) -> (i32, i32, i32) {
    %c0_i32 = arith.constant 0 : i32
    %c0_i32_0 = arith.constant 0 : i32
    %c0_i32_1 = arith.constant 0 : i32
    return %arg0, %c0_i32, %c0_i32_0 : i32, i32, i32
  }
  func.func @transform_9(%arg0: i32, %arg1: memref<32xi32, #tpu.memory_space<smem>>) -> (i32, i32, i32) {
    %c0_i32 = arith.constant 0 : i32
    %c0_i32_0 = arith.constant 0 : i32
    %c0_i32_1 = arith.constant 0 : i32
    return %arg0, %c0_i32, %c0_i32_0 : i32, i32, i32
  }
  func.func @transform_10(%arg0: i32, %arg1: memref<32xi32, #tpu.memory_space<smem>>) -> (i32, i32, i32) {
    %c0_i32 = arith.constant 0 : i32
    %c0_i32_0 = arith.constant 0 : i32
    %c0_i32_1 = arith.constant 0 : i32
    return %arg0, %c0_i32, %c0_i32_0 : i32, i32, i32
  }
  func.func @transform_11(%arg0: i32, %arg1: memref<32xi32, #tpu.memory_space<smem>>) -> (i32, i32, i32) {
    %c0_i32 = arith.constant 0 : i32
    %c0_i32_0 = arith.constant 0 : i32
    %c0_i32_1 = arith.constant 0 : i32
    return %arg0, %c0_i32, %c0_i32_0 : i32, i32, i32
  }
  func.func @transform_12(%arg0: i32, %arg1: memref<32xi32, #tpu.memory_space<smem>>) -> (i32, i32, i32) {
    %c0_i32 = arith.constant 0 : i32
    %c0_i32_0 = arith.constant 0 : i32
    %c0_i32_1 = arith.constant 0 : i32
    return %arg0, %c0_i32, %c0_i32_0 : i32, i32, i32
  }
  func.func @transform_13(%arg0: i32, %arg1: memref<32xi32, #tpu.memory_space<smem>>) -> (i32, i32, i32) {
    %c0_i32 = arith.constant 0 : i32
    %c0_i32_0 = arith.constant 0 : i32
    %c0_i32_1 = arith.constant 0 : i32
    return %arg0, %c0_i32, %c0_i32_0 : i32, i32, i32
  }
  func.func @transform_14(%arg0: i32, %arg1: memref<32xi32, #tpu.memory_space<smem>>) -> (i32, i32) {
    %c0_i32 = arith.constant 0 : i32
    %c0_i32_0 = arith.constant 0 : i32
    %c0_i32_1 = arith.constant 0 : i32
    return %c0_i32, %c0_i32_0 : i32, i32
  }
  func.func @transform_15(%arg0: i32, %arg1: memref<32xi32, #tpu.memory_space<smem>>) -> (i32, i32) {
    %c0_i32 = arith.constant 0 : i32
    %c0_i32_0 = arith.constant 0 : i32
    %c0_i32_1 = arith.constant 0 : i32
    return %c0_i32, %c0_i32_0 : i32, i32
  }
  func.func @transform_16(%arg0: i32, %arg1: memref<32xi32, #tpu.memory_space<smem>>) -> (i32, i32) {
    %c0_i32 = arith.constant 0 : i32
    %c0_i32_0 = arith.constant 0 : i32
    %c0_i32_1 = arith.constant 0 : i32
    return %c0_i32, %c0_i32_0 : i32, i32
  }
}

</mosaic_0001>

<bundles_post_ra>
// kernel: tpu_custom_call.1
= control target key start
LH: loop header
LB: loop body
LE: loop exit
PB: predicated region body
PF: predicated region fallthrough
CT: control target
= control target key end

     0   :  { %s5304_s24 = smov [#allocation4]   ;;  %s6477_s0 = inlined_call_operand.hbm [shape: s32[32], index: 0, kind: input, shape index: {}]   ;;  %s6478_s1 = inlined_call_operand.hbm [shape: f32[512,128], index: 1, kind: input, shape index: {}]   ;;  %s6479_s2 = inlined_call_operand.hbm [shape: f32[16,128], index: 2, kind: input, shape index: {}]   ;;  %s6480_s3 = inlined_call_operand.vmem [shape: f32[2,1,128], index: 3, kind: input, shape index: {}]   ;;  %s6481_s4 = inlined_call_operand.hbm [shape: f32[2,1,128], index: 4, kind: input, shape index: {}]   ;;  %s6482_s5 = inlined_call_operand.hbm [shape: bf16[2,128,384], index: 5, kind: input, shape index: {}]   ;;  %s6483_s6 = inlined_call_operand.vmem [shape: f32[2,1,384], index: 6, kind: input, shape index: {}]   ;;  %s6484_s7 = inlined_call_operand.hbm [shape: bf16[2,4,32,128], index: 7, kind: input, shape index: {}]   ;;  %s6485_s8 = inlined_call_operand.hbm [shape: f32[2,1,128], index: 8, kind: input, shape index: {}]   ;;  %s6486_s9 = inlined_call_operand.hbm [shape: f32[2,1,128], index: 9, kind: input, shape index: {}]   ;;  %s6487_s10 = inlined_call_operand.vmem [shape: f32[2,1,128], index: 10, kind: input, shape index: {}]   ;;  %s6488_s11 = inlined_call_operand.hbm [shape: bf16[2,128,512], index: 11, kind: input, shape index: {}]   ;;  %s6489_s12 = inlined_call_operand.vmem [shape: f32[2,1,512], index: 12, kind: input, shape index: {}]   ;;  %s6490_s13 = inlined_call_operand.hbm [shape: bf16[2,512,128], index: 13, kind: input, shape index: {}]   ;;  %s6491_s14 = inlined_call_operand.vmem [shape: f32[2,1,128], index: 14, kind: input, shape index: {}]   ;;  %s6492_s15 = inlined_call_operand.vmem [shape: f32[1,128], index: 15, kind: input, shape index: {}]   ;;  %s6493_s16 = inlined_call_operand.vmem [shape: f32[1,128], index: 16, kind: input, shape index: {}]   ;;  %s6494_s17 = inlined_call_operand.hbm [shape: f32[32,128], index: 17, kind: output, shape index: {}]  }
   0x1   :  { %6508 = sst [smem:[#allocation27_spill]] %s6477_s0 }
   0x2   :  { %6509 = sst [smem:[#allocation28_spill]] %s6478_s1 }
   0x3   :  { %6510 = sst [smem:[#allocation29_spill]] %s6479_s2 }
   0x4   :  { %6511 = sst [smem:[#allocation30_spill]] %s6480_s3 }
   0x5   :  { %6512 = sst [smem:[#allocation31_spill]] %s6481_s4 }
   0x6   :  { %6513 = sst [smem:[#allocation32_spill]] %s6482_s5 }
   0x7   :  { %6514 = sst [smem:[#allocation33_spill]] %s6483_s6 }
   0x8   :  { %6515 = sst [smem:[#allocation34_spill]] %s6484_s7 }
   0x9   :  { %6516 = sst [smem:[#allocation35_spill]] %s6487_s10 }
   0xa   :  { %6517 = sst [smem:[#allocation36_spill]] %s6489_s12 }
   0xb   :  { %6518 = sst [smem:[#allocation37_spill]] %s6491_s14 }
   0xc   :  { %6519 = sst [smem:[#allocation38_spill]] %s6492_s15 }
   0xd   :  { %6520 = sst [smem:[#allocation39_spill]] %s6493_s16 }
   0xe   :  { %6521 = sst [smem:[#allocation40_spill]] %s6494_s17 }
   0xf   :  { %s6522_s6 = sld [smem:[#allocation27_spill]] }
  0x15   :  { %23 = dma.hbm_to_smem %s6522_s6, 16, %s5304_s24, [#allocation3] }
  0x16   :  { %5270 = dma.done.wait [#allocation3], 16 }
  0x17   :  { %5271 = vsyncadd [#allocation3], 4294967280 }
  0x18   :  { %25 = sfence }
  0x19   :  { %26 = vsyncpa [#allocation6], 0 }
  0x1a   :  { %27 = vsyncpa [#allocation9], 0 }
  0x1b   :  { %28 = vsyncpa [#allocation7], 0  ;;  %s5425_s27 = smov 0   ;;  %s5427_s28 = smov 0  }
  0x1c   :  { %s5429_s29 = smov 0   ;;  %s5431_s0 = smov 0  }
  0x1d LB: > { %6523 = sst [smem:[#allocation23_spill]] %s5298_s29  ;;  %s5444_s6 = sadd.s32 4294967295, %s5302_s0   ;;  %s5302_s0 = sphi %s5431_s0, %s6563_s0   ;;  %s5298_s29 = sphi %s5429_s29, %s6565_s29   ;;  %s5294_s28 = sphi %s5427_s28, %s6567_s28   ;;  %s5290_s27 = sphi %s5425_s27, %s6566_s27  }
  0x1e   : > { %s5447_s30 = sadd.s32 1, %s5302_s0   ;;  %s109_s19 = sadd.s32 1, %s5298_s29 }
  0x1f   : > { %6524 = sst [smem:[#allocation24_spill]] %s5447_s30  ;;  %s106_s18 = ssub.s32 %s5302_s0, %s5447_s30 }
  0x20   : > { %p107_p0 = scmp.eq.s32.totalorder %s106_s18, 0  ;;  %p116_p1 = scmp.ne.s32.totalorder %s5298_s29, %s5294_s28 }
  0x21   : > { %p117_p2 = scmp.eq.s32.totalorder %s5302_s0, 0  ;;  %p122_p3 = scmp.ne.s32.totalorder %s5294_s28, %s5290_s27 }
  0x22   : > { %s5457_s1 = scalar_select %p107_p0, %s5298_s29, %s109_s19  }
  0x23   : > { %p5459_p4 = por %p117_p2, %p116_p1  ;;  %p6495_p5 = scmp.eq.s32.totalorder %s5444_s6, 0 }
  0x24   : > { %6525 = sst [smem:[#allocation25_spill]] %s5457_s1  ;;  %p4019_p6 = scmp.ge.s32.totalorder %s5302_s0, 1 }
  0x25   : > { %p456_p7 = scmp.lt.s32.totalorder %s5302_s0, 3  ;;  %p5468_p8 = por %p6495_p5, %p122_p3 }
  0x26   : > { %s5305_s23 = smov [#allocation5]   ;;  %p4550_p13 = scmp.lt.s32.totalorder %s5302_s0, 2 }
  0x27   : > { %s6527_s21 = scalar_select %p5468_p8, 1, 0 }
  0x28   : > { %p5473_p10 = pnand %p4019_p6, %p456_p7  ;;  %s468_s24 = sshll.u32 %s5305_s23, 4  ;;  %s469_s24 = int_to_ptr.vmem [resolvable:$true] %s468_s24 }
  0x29   : > { %6528 = sst [smem:[#allocation26_spill]] %s6527_s21  ;;  %s507_s26 = sand.u32 1, %s5302_s0  }
  0x2a   : > { %s6529_s22 = scalar_select %p5473_p10, 1, 0 }
  0x2b   : > { %p4519_p11 = pneg %p5473_p10  ;;  %s5488_s27 = sand.u32 1, %s5298_s29  }
  0x2c   : > { %p5492_p0 = pnand %p4550_p13, %p5459_p4  ;;  %s4993_s19 = scalar_lea.vmem %s469_s24, 8192 }
  0x2d   : > { %p5481_p12 = pnand %p4519_p11, %p6495_p5  ;;  %p4994_p2 = scmp.ne.s32.totalorder %s469_s24, %s4993_s19 }
  0x2e   : > { %p5001_p7 = scmp.lt.s32.totalorder %s469_s24, %s469_s24  ;;  %p5002_p11 = scmp.lt.s32.totalorder %s4993_s19, %s4993_s19 }
  0x2f   : > { %s6530_s25 = scalar_select %p5481_p12, 1, 0 }
  0x30   : > { %p6501_p1 = pneg %p5481_p12  ;;  %p5003_p9 = por %p5002_p11, %p5001_p7 }
  0x32   : > { %p4996_p3 = pnand %p4994_p2, %p6501_p1 }
  0x34   : > { %p4997_p6 = pneg %p4996_p3 }
  0x36   : > { %p5004_p5 = pnand %p5003_p9, %p4997_p6 }
  0x38   : > { %5007 = shalt.err (!%p5004_p5)
}
  0x39   : > { %s6503_s23 = smov 128   ;;  %s6504_s20 = smov 8  }
  0x3a   : > { %s6532_s30 = sld [smem:[#allocation28_spill]]  ;;  %s5510_s17 = sshll.u32 %s5302_s0, 4 }
  0x3b   : > { %s6533_s4 = sld [smem:[#allocation31_spill]]  ;;  %s510_s14 = scalar_lea.vmem [#allocation10], %s5488_s27 }
  0x3c   : > { %s517_s12 = sshll.u32 %s510_s14, 4  ;;  %s4489_s10 = smul.u32 192, %s5488_s27  ;;  %s518_s12 = int_to_ptr.vmem [resolvable:$true] %s517_s12 }
  0x3d   : > { %s5520_s3 = scalar_lea.sflag [#allocation6], %s507_s26  ;;  %p5526_p5 = pneg %p5492_p0 }
  0x40   : > { %4522 = dma.hbm_to_vmem [thread:$0]  (!%p5481_p12), %s6532_s30, 8192, %s469_s24, [#allocation6], %s6503_s23, %s6503_s23, %s6504_s20  }
  0x41   : > { %s5516_s15 = scalar_lea.hbm %s6533_s4, %s5510_s17  ;;  %s5013_s1 = scalar_lea.hbm %s6533_s4, 32 }
  0x42   : > { %s5008_s21 = scalar_lea.hbm %s5516_s15, 16  ;;  %p5014_p2 = scmp.lt.s32.totalorder %s5516_s15, %s6533_s4 }
  0x43   : > { %p5009_p4 = scmp.ne.s32.totalorder %s5516_s15, %s5008_s21  ;;  %p5015_p3 = scmp.lt.s32.totalorder %s5013_s1, %s5008_s21 }
  0x45   : > { %p5011_p9 = pnand %p5526_p5, %p5009_p4  ;;  %p5016_p6 = por %p5015_p3, %p5014_p2 }
  0x47   : > { %p5012_p13 = pneg %p5011_p9 }
  0x49   : > { %p5017_p7 = pnand %p5016_p6, %p5012_p13 }
  0x4b   : > { %5020 = shalt.err (!%p5017_p7)
}
  0x4c   : > { %s5021_s26 = scalar_lea.vmem %s518_s12, 16  ;;  %s5308_s19 = smov [#allocation10]  }
  0x4d   : > { %p5022_p11 = scmp.ne.s32.totalorder %s518_s12, %s5021_s26  ;;  %s5026_s23 = sshll.u32 %s5308_s19, 4  ;;  %s5027_s23 = int_to_ptr.vmem [resolvable:$false] %s5026_s23 }
  0x4e   : > { %s5028_s20 = scalar_lea.vmem %s5027_s23, 32  ;;  %p5029_p4 = scmp.lt.s32.totalorder %s518_s12, %s5027_s23 }
  0x4f   : > { %p5024_p1 = pnand %p5022_p11, %p5526_p5  ;;  %p5030_p9 = scmp.lt.s32.totalorder %s5028_s20, %s5021_s26 }
  0x51   : > { %p5025_p8 = pneg %p5024_p1  ;;  %p5031_p10 = por %p5030_p9, %p5029_p4 }
  0x53   : > { %p5032_p12 = pnand %p5031_p10, %p5025_p8 }
  0x55   : > { %5035 = shalt.err (!%p5032_p12)
}
  0x56   : > { %4529 = dma.hbm_to_vmem [thread:$0]  (!%p5492_p0), %s5516_s15, 16, %s518_s12, %s5520_s3  }
  0x57   : > { %s4490_s21 = smul.u32 3072, %s5302_s0  ;;  %s528_s16 = scalar_lea.vmem [#allocation11], %s4489_s10 }
  0x58   : > { %s535_s30 = sshll.u32 %s528_s16, 4  ;;  %s6535_s5 = sld [smem:[#allocation32_spill]]  ;;  %s5551_s30 = int_to_ptr.vmem [resolvable:$true] %s535_s30 }
  0x59   : > { %s4025_s23 = sshll.u32 %s5488_s27, 6 }
  0x5e   : > { %s5549_s24 = scalar_lea.hbm %s6535_s5, %s4490_s21  ;;  %s5041_s10 = scalar_lea.hbm %s6535_s5, 6144 }
  0x5f   : > { %s5036_s20 = scalar_lea.hbm %s5549_s24, 3072  ;;  %p5042_p1 = scmp.lt.s32.totalorder %s5549_s24, %s6535_s5 }
  0x60   : > { %p5037_p8 = scmp.ne.s32.totalorder %s5549_s24, %s5036_s20  ;;  %p5043_p13 = scmp.lt.s32.totalorder %s5041_s10, %s5036_s20 }
  0x62   : > { %p5039_p10 = pnand %p5037_p8, %p5526_p5  ;;  %p5044_p2 = por %p5043_p13, %p5042_p1 }
  0x64   : > { %p5040_p12 = pneg %p5039_p10 }
  0x66   : > { %p5045_p3 = pnand %p5044_p2, %p5040_p12 }
  0x68   : > { %5048 = shalt.err (!%p5045_p3)
}
  0x69   : > { %s5049_s21 = scalar_lea.vmem %s5551_s30, 3072  ;;  %s5309_s16 = smov [#allocation11]  }
  0x6a   : > { %p5050_p6 = scmp.ne.s32.totalorder %s5551_s30, %s5049_s21  ;;  %s5054_s1 = sshll.u32 %s5309_s16, 4  ;;  %s5055_s1 = int_to_ptr.vmem [resolvable:$false] %s5054_s1 }
  0x6b   : > { %s5056_s14 = scalar_lea.vmem %s5055_s1, 6144  ;;  %p5057_p4 = scmp.lt.s32.totalorder %s5551_s30, %s5055_s1 }
  0x6c   : > { %p5052_p7 = pnand %p5050_p6, %p5526_p5  ;;  %p5058_p9 = scmp.lt.s32.totalorder %s5056_s14, %s5049_s21 }
  0x6e   : > { %p5053_p11 = pneg %p5052_p7  ;;  %p5059_p8 = por %p5058_p9, %p5057_p4 }
  0x70   : > { %p5060_p10 = pnand %p5059_p8, %p5053_p11 }
  0x72   : > { %5063 = shalt.err (!%p5060_p10)
}
  0x73   : > { %s5310_s20 = smov 192   ;;  %s5311_s12 = smov 12  }
  0x74   : > { %4532 = dma.hbm_to_vmem [thread:$0]  (!%p5492_p0), %s5549_s24, 3072, %s5551_s30, %s5520_s3, %s5310_s20, %s5310_s20, %s5311_s12  }
  0x75   : > { %s4224_s15 = sshll.u32 %s5302_s0, 10  ;;  %s6536_s7 = sld [smem:[#allocation34_spill]] }
  0x76   : > { %s556_s21 = scalar_lea.vmem [#allocation12], %s4025_s23 }
  0x77   : > { %s563_s16 = sshll.u32 %s556_s21, 4  ;;  %s5583_s16 = int_to_ptr.vmem [resolvable:$true] %s563_s16 }
  0x7b   : > { %s5579_s19 = scalar_lea.hbm %s6536_s7, %s4224_s15  ;;  %s5069_s14 = scalar_lea.hbm %s6536_s7, 2048 }
  0x7c   : > { %s5064_s1 = scalar_lea.hbm %s5579_s19, 1024  ;;  %p5070_p2 = scmp.lt.s32.totalorder %s5579_s19, %s6536_s7 }
  0x7d   : > { %p5065_p12 = scmp.ne.s32.totalorder %s5579_s19, %s5064_s1  ;;  %p5071_p3 = scmp.lt.s32.totalorder %s5069_s14, %s5064_s1 }
  0x7f   : > { %p5067_p1 = pnand %p5065_p12, %p5526_p5  ;;  %p5072_p6 = por %p5071_p3, %p5070_p2 }
  0x81   : > { %p5068_p13 = pneg %p5067_p1 }
  0x83   : > { %p5073_p7 = pnand %p5072_p6, %p5068_p13 }
  0x85   : > { %5076 = shalt.err (!%p5073_p7)
}
  0x86   : > { %s5077_s23 = scalar_lea.vmem %s5583_s16, 1024  ;;  %s5312_s15 = smov [#allocation12]  }
  0x87   : > { %p5078_p11 = scmp.ne.s32.totalorder %s5583_s16, %s5077_s23  ;;  %s5082_s10 = sshll.u32 %s5312_s15, 4  ;;  %s5083_s10 = int_to_ptr.vmem [resolvable:$false] %s5082_s10 }
  0x88   : > { %s5084_s26 = scalar_lea.vmem %s5083_s10, 2048  ;;  %p5085_p8 = scmp.lt.s32.totalorder %s5583_s16, %s5083_s10 }
  0x89   : > { %p5080_p4 = pnand %p5078_p11, %p5526_p5  ;;  %p5086_p10 = scmp.lt.s32.totalorder %s5084_s26, %s5077_s23 }
  0x8b   : > { %p5081_p9 = pneg %p5080_p4  ;;  %p5087_p12 = por %p5086_p10, %p5085_p8 }
  0x8d   : > { %p5088_p1 = pnand %p5087_p12, %p5081_p9 }
  0x8f   : > { %5091 = shalt.err (!%p5088_p1)
}
  0x90   : > { %s5313_s21 = smov 64   ;;  %s5314_s1 = smov 4  }
  0x91   : > { %4535 = dma.hbm_to_vmem [thread:$0]  (!%p5492_p0), %s5579_s19, 1024, %s5583_s16, %s5520_s3, %s5313_s21, %s5313_s21, %s5314_s1  }
  0x92   : > { %s581_s14 = scalar_lea.hbm %s6485_s8, %s5510_s17  ;;  %s576_s20 = scalar_lea.vmem [#allocation13], %s5488_s27 }
  0x93   : > { %s583_s12 = sshll.u32 %s576_s20, 4  ;;  %s5092_s23 = scalar_lea.hbm %s581_s14, 16  ;;  %s584_s12 = int_to_ptr.vmem [resolvable:$true] %s583_s12 }
  0x94   : > { %p5093_p13 = scmp.ne.s32.totalorder %s581_s14, %s5092_s23  ;;  %s5097_s26 = scalar_lea.hbm %s6485_s8, 32 }
  0x95   : > { %p5098_p6 = scmp.lt.s32.totalorder %s581_s14, %s6485_s8  ;;  %p5099_p7 = scmp.lt.s32.totalorder %s5097_s26, %s5092_s23 }
  0x96   : > { %p5095_p2 = pnand %p5093_p13, %p5526_p5 }
  0x97   : > { %p5100_p11 = por %p5099_p7, %p5098_p6 }
  0x98   : > { %p5096_p3 = pneg %p5095_p2 }
  0x9a   : > { %p5101_p4 = pnand %p5100_p11, %p5096_p3 }
  0x9c   : > { %5104 = shalt.err (!%p5101_p4)
}
  0x9d   : > { %s5105_s19 = scalar_lea.vmem %s584_s12, 16  ;;  %s5315_s16 = smov [#allocation13]  }
  0x9e   : > { %p5106_p9 = scmp.ne.s32.totalorder %s584_s12, %s5105_s19  ;;  %s5110_s30 = sshll.u32 %s5315_s16, 4  ;;  %s5111_s30 = int_to_ptr.vmem [resolvable:$false] %s5110_s30 }
  0x9f   : > { %s5112_s24 = scalar_lea.vmem %s5111_s30, 32  ;;  %p5113_p12 = scmp.lt.s32.totalorder %s584_s12, %s5111_s30 }
  0xa0   : > { %p5108_p8 = pnand %p5106_p9, %p5526_p5  ;;  %p5114_p1 = scmp.lt.s32.totalorder %s5112_s24, %s5105_s19 }
  0xa2   : > { %p5109_p10 = pneg %p5108_p8  ;;  %p5115_p13 = por %p5114_p1, %p5113_p12 }
  0xa4   : > { %p5116_p2 = pnand %p5115_p13, %p5109_p10 }
  0xa6   : > { %5119 = shalt.err (!%p5116_p2)
}
  0xa7   : > { %4538 = dma.hbm_to_vmem [thread:$0]  (!%p5492_p0), %s581_s14, 16, %s584_s12, %s5520_s3  }
  0xa8   : > { %s5631_s20 = scalar_lea.hbm %s6486_s9, %s5510_s17  ;;  %s593_s23 = scalar_lea.vmem [#allocation14], %s5488_s27 }
  0xa9   : > { %s600_s15 = sshll.u32 %s593_s23, 4  ;;  %s4030_s10 = sshll.u32 %s5488_s27, 8  ;;  %s601_s15 = int_to_ptr.vmem [resolvable:$true] %s600_s15 }
  0xaa   : > { %s5120_s26 = scalar_lea.hbm %s5631_s20, 16  ;;  %s5125_s14 = scalar_lea.hbm %s6486_s9, 32 }
  0xab   : > { %p5121_p3 = scmp.ne.s32.totalorder %s5631_s20, %s5120_s26  ;;  %p5126_p11 = scmp.lt.s32.totalorder %s5631_s20, %s6486_s9 }
  0xac   : > { %p5127_p4 = scmp.lt.s32.totalorder %s5125_s14, %s5120_s26 }
  0xad   : > { %p5123_p6 = pnand %p5121_p3, %p5526_p5 }
  0xae   : > { %p5128_p9 = por %p5127_p4, %p5126_p11 }
  0xaf   : > { %p5124_p7 = pneg %p5123_p6 }
  0xb1   : > { %p5129_p8 = pnand %p5128_p9, %p5124_p7 }
  0xb3   : > { %5132 = shalt.err (!%p5129_p8)
}
  0xb4   : > { %s5133_s17 = scalar_lea.vmem %s601_s15, 16  ;;  %s5316_s24 = smov [#allocation14]  }
  0xb5   : > { %p5134_p10 = scmp.ne.s32.totalorder %s601_s15, %s5133_s17  ;;  %s5138_s4 = sshll.u32 %s5316_s24, 4  ;;  %s5139_s4 = int_to_ptr.vmem [resolvable:$false] %s5138_s4 }
  0xb6   : > { %s5140_s5 = scalar_lea.vmem %s5139_s4, 32  ;;  %p5141_p13 = scmp.lt.s32.totalorder %s601_s15, %s5139_s4 }
  0xb7   : > { %p5136_p12 = pnand %p5134_p10, %p5526_p5  ;;  %p5142_p2 = scmp.lt.s32.totalorder %s5140_s5, %s5133_s17 }
  0xb9   : > { %p5137_p1 = pneg %p5136_p12  ;;  %p5143_p3 = por %p5142_p2, %p5141_p13 }
  0xbb   : > { %p5144_p6 = pnand %p5143_p3, %p5137_p1 }
  0xbd   : > { %5147 = shalt.err (!%p5144_p6)
}
  0xbe   : > { %4541 = dma.hbm_to_vmem [thread:$0]  (!%p5492_p0), %s5631_s20, 16, %s601_s15, %s5520_s3  }
  0xbf   : > { %s4225_s23 = sshll.u32 %s5302_s0, 12  ;;  %s617_s14 = scalar_lea.vmem [#allocation15], %s4030_s10 }
  0xc0   : > { %s5658_s16 = scalar_lea.hbm %s6488_s11, %s4225_s23  ;;  %s624_s12 = sshll.u32 %s617_s14, 4  ;;  %s5662_s12 = int_to_ptr.vmem [resolvable:$true] %s624_s12 }
  0xc1   : > { %s5148_s30 = scalar_lea.hbm %s5658_s16, 4096  ;;  %s5153_s17 = scalar_lea.hbm %s6488_s11, 8192 }
  0xc2   : > { %p5149_p7 = scmp.ne.s32.totalorder %s5658_s16, %s5148_s30  ;;  %p5154_p9 = scmp.lt.s32.totalorder %s5658_s16, %s6488_s11 }
  0xc3   : > { %p5155_p8 = scmp.lt.s32.totalorder %s5153_s17, %s5148_s30 }
  0xc4   : > { %p5151_p11 = pnand %p5149_p7, %p5526_p5 }
  0xc5   : > { %p5156_p10 = por %p5155_p8, %p5154_p9 }
  0xc6   : > { %p5152_p4 = pneg %p5151_p11 }
  0xc8   : > { %p5157_p12 = pnand %p5156_p10, %p5152_p4 }
  0xca   : > { %5160 = shalt.err (!%p5157_p12)
}
  0xcb   : > { %s5161_s5 = scalar_lea.vmem %s5662_s12, 4096  ;;  %s5317_s26 = smov [#allocation15]  }
  0xcc   : > { %p5162_p1 = scmp.ne.s32.totalorder %s5662_s12, %s5161_s5  ;;  %s5166_s19 = sshll.u32 %s5317_s26, 4  ;;  %s5167_s19 = int_to_ptr.vmem [resolvable:$false] %s5166_s19 }
  0xcd   : > { %s5168_s14 = scalar_lea.vmem %s5167_s19, 8192  ;;  %p5169_p3 = scmp.lt.s32.totalorder %s5662_s12, %s5167_s19 }
  0xce   : > { %p5164_p13 = pnand %p5162_p1, %p5526_p5  ;;  %p5170_p6 = scmp.lt.s32.totalorder %s5168_s14, %s5161_s5 }
  0xd0   : > { %p5165_p2 = pneg %p5164_p13  ;;  %p5171_p7 = por %p5170_p6, %p5169_p3 }
  0xd2   : > { %p5172_p11 = pnand %p5171_p7, %p5165_p2 }
  0xd4   : > { %5175 = shalt.err (!%p5172_p11)
}
  0xd5   : > { %s5318_s30 = smov 256   ;;  %s5319_s20 = smov 16  }
  0xd6   : > { %4544 = dma.hbm_to_vmem [thread:$0]  (!%p5492_p0), %s5658_s16, 4096, %s5662_s12, %s5520_s3, %s5318_s30, %s5318_s30, %s5319_s20  }
  0xd7   : > { %s5320_s15 = smov [#allocation8]   ;;  %s5690_s5 = scalar_lea.hbm %s6490_s13, %s4225_s23 }
  0xd8   : > { %s481_s17 = sshll.u32 %s5320_s15, 4  ;;  %p6537_p9 = scmp.ne.s32.totalorder %s6530_s25, 0  ;;  %s482_s17 = int_to_ptr.vmem [resolvable:$true] %s481_s17 }
  0xd9   : > { %s5187_s26 = scalar_lea.vmem %s482_s17, 256  ;;  %p5195_p1 = scmp.lt.s32.totalorder %s482_s17, %s482_s17 }
  0xda   : > { %p5188_p4 = scmp.ne.s32.totalorder %s482_s17, %s5187_s26  ;;  %p6538_p8 = pneg %p6537_p9 }
  0xdb   : > { %p5196_p13 = scmp.lt.s32.totalorder %s5187_s26, %s5187_s26 }
  0xdc   : > { %p5190_p10 = pnand %p5188_p4, %p6538_p8 }
  0xdd   : > { %p5197_p2 = por %p5196_p13, %p5195_p1 }
  0xde   : > { %p5191_p12 = pneg %p5190_p10 }
  0xe0   : > { %p5198_p3 = pnand %p5197_p2, %p5191_p12 }
  0xe2   : > { %5201 = shalt.err (!%p5198_p3)
}
  0xe3   : > { %s6539_s16 = smov 8   ;;  %s6540_s0 = smov 128  }
  0xe4   : > { %s6541_s2 = sld [smem:[#allocation29_spill]]  ;;  %s645_s23 = scalar_lea.vmem [#allocation16], %s4030_s10 }
  0xe5   : > { %s652_s14 = sshll.u32 %s645_s23, 4  ;;  %s5202_s30 = scalar_lea.hbm %s5690_s5, 4096  ;;  %s653_s14 = int_to_ptr.vmem [resolvable:$true] %s652_s14 }
  0xe6   : > { %p5203_p6 = scmp.ne.s32.totalorder %s5690_s5, %s5202_s30  ;;  %s5207_s15 = scalar_lea.hbm %s6490_s13, 8192 }
  0xe7   : > { %p5208_p4 = scmp.lt.s32.totalorder %s5690_s5, %s6490_s13  ;;  %p5209_p8 = scmp.lt.s32.totalorder %s5207_s15, %s5202_s30 }
  0xe8   : > { %p5205_p7 = pnand %p5203_p6, %p5526_p5 }
  0xe9   : > { %p5210_p10 = por %p5209_p8, %p5208_p4 }
  0xea   : > { %4525 = dma.hbm_to_vmem [thread:$0]  (!%p6537_p9), %s6541_s2, 256, %s482_s17, [#allocation9], %s6540_s0, %s6540_s0, %s6539_s16  }
  0xeb   : > { %p5206_p11 = pneg %p5205_p7 }
  0xed   : > { %p5211_p9 = pnand %p5210_p10, %p5206_p11 }
  0xef   : > { %5214 = shalt.err (!%p5211_p9)
}
  0xf0   : > { %s5215_s27 = scalar_lea.vmem %s653_s14, 4096  ;;  %s5321_s10 = smov [#allocation16]  }
  0xf1   : > { %p5216_p12 = scmp.ne.s32.totalorder %s653_s14, %s5215_s27  ;;  %s5220_s17 = sshll.u32 %s5321_s10, 4  ;;  %s5221_s17 = int_to_ptr.vmem [resolvable:$false] %s5220_s17 }
  0xf2   : > { %s5222_s26 = scalar_lea.vmem %s5221_s17, 8192  ;;  %p5223_p2 = scmp.lt.s32.totalorder %s653_s14, %s5221_s17 }
  0xf3   : > { %p5218_p1 = pnand %p5216_p12, %p5526_p5  ;;  %p5224_p3 = scmp.lt.s32.totalorder %s5222_s26, %s5215_s27 }
  0xf5   : > { %p5219_p13 = pneg %p5218_p1  ;;  %p5225_p6 = por %p5224_p3, %p5223_p2 }
  0xf7   : > { %p5226_p7 = pnand %p5225_p6, %p5219_p13 }
  0xf9   : > { %5229 = shalt.err (!%p5226_p7)
}
  0xfa   : > { %4547 = dma.hbm_to_vmem [thread:$0]  (!%p5492_p0), %s5690_s5, 4096, %s653_s14, %s5520_s3, %s5313_s21, %s5313_s21, %s5314_s1  }
  0xfb   : > { %p6542_p5 = scmp.ne.s32.totalorder %s6529_s22, 0 }
  0xfc   : > { %p6543_p11 = scmp.eq.s32.totalorder (!%p6542_p5), %s5444_s6, 0 }
  0xfd   : > { %670 = sbr.rel (%p6542_p5) target bundleno = 3071 (0xbff), region = 84 }
 0x102   : > { %5273 = dma.done.wait (%p6543_p11), [#allocation6], 8192   ;;  %p6544_p4 = pmov %p6543_p11 }
 0x104   : > { %5275 = vsyncadd (%p6544_p4), [#allocation6], 4294959104  ;;  %p6545_p8 = pmov %p6544_p4 }
 0x105   : > { %p6546_p10 = pmov %p6544_p4 }
 0x106   : > { %5277 = dma.done.wait (%p6545_p8), [#allocation9], 256  }
 0x107   : > { %5279 = vsyncadd (%p6546_p10), [#allocation9], 4294967040  ;;  %s6547_s18 = sld [smem:[#allocation26_spill]]  ;;  %s680_s29 = sand.u32 1, %s5444_s6  }
 0x108   : > { %s5737_s3 = sand.u32 1, %s5294_s28   ;;  %s681_s22 = scalar_lea.sflag [#allocation6], %s680_s29 }
 0x10d   : > { %p6548_p0 = scmp.ne.s32.totalorder %s6547_s18, 0 }
 0x10f   : > { %5281 = dma.done.wait (%p6548_p0), %s681_s22, 12336  }
 0x110   : > { %5283 = vsyncadd (%p6548_p0), %s681_s22, 4294954960  ;;  %s4491_s1 = smul.u32 192, %s5737_s3  ;;  %s4039_s5 = sshll.u32 %s5737_s3, 6 }
 0x111   : > { %s4040_s16 = sshll.u32 %s5737_s3, 8  ;;  %p823_p9 = scmp.lt.s32.totalorder %s5444_s6, 1 }
 0x112   : > { %s6550_s15 = sld [smem:[#allocation35_spill]]  ;;  %s5775_s14 = scalar_lea.vmem [#allocation11], %s4491_s1 }
 0x113   : > { %s5749_s0 = scalar_select %p823_p9, %s5444_s6, 1 }
 0x114   : > { %s6551_s17 = sld [smem:[#allocation33_spill]]  ;;  %s5777_s7 = scalar_lea.vmem [#allocation12], %s4039_s5 }
 0x115   : > { %s4492_s30 = smul.u32 3, %s5749_s0  ;;  %s4042_s4 = sshll.u32 %s5749_s0, 2 }
 0x116   : > { %s6552_s22 = sld [smem:[#allocation36_spill]]  ;;  %s709_s25 = scalar_lea.vmem [#allocation13], %s5737_s3 }
 0x117   : > { %s6553_s2 = sld [smem:[#allocation37_spill]]  ;;  %s717_s20 = scalar_lea.vmem [#allocation14], %s5737_s3 }
 0x118   : > { %s832_s24 = scalar_lea.vmem %s6550_s15, %s5749_s0  ;;  %s5781_s15 = scalar_lea.vmem [#allocation15], %s4040_s16 }
 0x119   : > { %s5783_s27 = scalar_lea.vmem [#allocation16], %s4040_s16  ;;  %p6554_p12 = scmp.ne.s32.totalorder %s5444_s6, 0 }
 0x11a   : > { %s5764_s26 = scalar_lea.vmem %s6551_s17, %s4492_s30  ;;  %s845_s30 = sld [smem:[#allocation4]] (!%p6554_p12) }
 0x11b   : > { %844 = sbr.rel (%p6554_p12) target bundleno = 333 (0x14d), region = 124  ;;  %s4045_s10 = sld [smem:[#allocation4 + $0x2]] (!%p6554_p12) }
 0x11c   : > { %s5769_s12 = scalar_lea.vmem %s6552_s22, %s4042_s4  ;;  %s4044_s4 = sld [smem:[#allocation4 + $0x1]] (!%p6554_p12) }
 0x11d   : > { %s839_s23 = scalar_lea.vmem %s6553_s2, %s5749_s0  ;;  %s4046_s17 = sld [smem:[#allocation4 + $0x3]] (!%p6554_p12) }
 0x11e   : > { %s5787_s21 = sld [smem:[#allocation4 + $0x4]] (!%p6554_p12) }
 0x11f   : > { %s5789_s2 = sld [smem:[#allocation4 + $0x5]] (!%p6554_p12) }
 0x120   : > { %v848_v0 = vld [vmem:[#allocation8] sm:$0x1]  ;;  %v854_v1 = vld [vmem:[#allocation8 + $0x1] sm:$0x1]  ;;  %v860_v2 = vld [vmem:[#allocation8 + $0x2] sm:$0x1] }
 0x121   : > { %v866_v3 = vld [vmem:[#allocation8 + $0x3] sm:$0x1]  ;;  %s5791_s1 = sld [smem:[#allocation4 + $0x6]]  ;;  %s846_s5 = scalar_lea.vmem [#allocation5], %s845_s30  ;;  %v872_v5 = vld [vmem:[#allocation8 + $0x4] sm:$0x1] }
 0x122   : > { %v847_v4 = vld [vmem:[%s846_s5] sm:$0x1]  ;;  %s5793_s16 = sld [smem:[#allocation4 + $0x7]]  ;;  %s852_s18 = scalar_lea.vmem [#allocation5], %s4044_s4  ;;  %v878_v8 = vld [vmem:[#allocation8 + $0x5] sm:$0x1] }
 0x123   : > { %v849_v6 = vadd.f32 %v848_v0, %v847_v4  ;;  %v853_v7 = vld [vmem:[%s852_s18] sm:$0x1]  ;;  %s5795_s29 = sld [smem:[#allocation4 + $0x8]]  ;;  %s858_s22 = scalar_lea.vmem [#allocation5], %s4045_s10  ;;  %v884_v11 = vld [vmem:[#allocation8 + $0x6] sm:$0x1] }
 0x124   : > { %v855_v9 = vadd.f32 %v854_v1, %v853_v7  ;;  %v859_v10 = vld [vmem:[%s858_s22] sm:$0x1]  ;;  %s5797_s19 = sld [smem:[#allocation4 + $0x9]]  ;;  %s864_s30 = scalar_lea.vmem [#allocation5], %s4046_s17  ;;  %v890_v14 = vld [vmem:[#allocation8 + $0x7] sm:$0x1] }
 0x125   : > { %850 = vst [vmem:[#allocation2] sm:$0x1] %v849_v6  ;;  %v861_v12 = vadd.f32 %v860_v2, %v859_v10  ;;  %v865_v13 = vld [vmem:[%s864_s30] sm:$0x1]  ;;  %s5799_s5 = sld [smem:[#allocation4 + $0xa]]  ;;  %s870_s4 = scalar_lea.vmem [#allocation5], %s5787_s21 }
 0x126   : > { %856 = vst [vmem:[#allocation2 + $0x1] sm:$0x1] %v855_v9  ;;  %v867_v15 = vadd.f32 %v866_v3, %v865_v13  ;;  %v871_v16 = vld [vmem:[%s870_s4] sm:$0x1]  ;;  %s5802_s10 = sld [smem:[#allocation4 + $0xb]]  ;;  %s876_s18 = scalar_lea.vmem [#allocation5], %s5789_s2 }
 0x127   : > { %v896_v17 = vld [vmem:[#allocation8 + $0x8] sm:$0x1]  ;;  %862 = vst [vmem:[#allocation2 + $0x2] sm:$0x1] %v861_v12  ;;  %v873_v18 = vadd.f32 %v872_v5, %v871_v16  ;;  %v902_v20 = vld [vmem:[#allocation8 + $0x9] sm:$0x1] }
 0x128   : > { %v877_v19 = vld [vmem:[%s876_s18] sm:$0x1]  ;;  %s5805_s17 = sld [smem:[#allocation4 + $0xc]]  ;;  %868 = vst [vmem:[#allocation2 + $0x3] sm:$0x1] %v867_v15  ;;  %s882_s22 = scalar_lea.vmem [#allocation5], %s5791_s1 }
 0x129   : > { %v879_v21 = vadd.f32 %v878_v8, %v877_v19  ;;  %v883_v22 = vld [vmem:[%s882_s22] sm:$0x1]  ;;  %v908_v23 = vld [vmem:[#allocation8 + $0xa] sm:$0x1]  ;;  %s5808_s21 = sld [smem:[#allocation4 + $0xd]]  ;;  %s888_s30 = scalar_lea.vmem [#allocation5], %s5793_s16 }
 0x12a   : > { %874 = vst [vmem:[#allocation2 + $0x4] sm:$0x1] %v873_v18  ;;  %v885_v24 = vadd.f32 %v884_v11, %v883_v22  ;;  %v889_v25 = vld [vmem:[%s888_s30] sm:$0x1]  ;;  %v914_v26 = vld [vmem:[#allocation8 + $0xb] sm:$0x1] }
 0x12b   : > { %880 = vst [vmem:[#allocation2 + $0x5] sm:$0x1] %v879_v21  ;;  %v891_v27 = vadd.f32 %v890_v14, %v889_v25  ;;  %s894_s2 = scalar_lea.vmem [#allocation5], %s5795_s29  ;;  %s5812_s4 = sld [smem:[#allocation4 + $0xe]]  ;;  %v920_v31 = vld [vmem:[#allocation8 + $0xc] sm:$0x1] }
 0x12c   : > { %v895_v28 = vld [vmem:[%s894_s2] sm:$0x1]  ;;  %886 = vst [vmem:[#allocation2 + $0x6] sm:$0x1] %v885_v24  ;;  %s900_s1 = scalar_lea.vmem [#allocation5], %s5797_s19  ;;  %s906_s18 = scalar_lea.vmem [#allocation5], %s5799_s5 }
 0x12d   : > { %v897_v29 = vadd.f32 %v896_v17, %v895_v28  ;;  %v901_v30 = vld [vmem:[%s900_s1] sm:$0x1]  ;;  %892 = vst [vmem:[#allocation2 + $0x7] sm:$0x1] %v891_v27  ;;  %s5816_s16 = sld [smem:[#allocation4 + $0xf]]  ;;  %s912_s22 = scalar_lea.vmem [#allocation5], %s5802_s10 }
 0x12e   : > { %v903_v32 = vadd.f32 %v902_v20, %v901_v30  ;;  %v907_v33 = vld [vmem:[%s906_s18] sm:$0x1]  ;;  %v926_v36 = vld [vmem:[#allocation8 + $0xd] sm:$0x1]  ;;  %s918_s29 = scalar_lea.vmem [#allocation5], %s5805_s17  ;;  %s5820_s19 = sld [smem:[#allocation4 + $0x10]] }
 0x12f   : > { %898 = vst [vmem:[#allocation2 + $0x8] sm:$0x1] %v897_v29  ;;  %v909_v34 = vadd.f32 %v908_v23, %v907_v33  ;;  %v913_v35 = vld [vmem:[%s912_s22] sm:$0x1]  ;;  %s924_s30 = scalar_lea.vmem [#allocation5], %s5808_s21  ;;  %s4060_s5 = sld [smem:[#allocation4 + $0x11]] }
 0x130   : > { %904 = vst [vmem:[#allocation2 + $0x9] sm:$0x1] %v903_v32  ;;  %v915_v37 = vadd.f32 %v914_v26, %v913_v35  ;;  %v919_v38 = vld [vmem:[%s918_s29] sm:$0x1]  ;;  %v932_v41 = vld [vmem:[#allocation8 + $0xe] sm:$0x1] }
 0x131   : > { %910 = vst [vmem:[#allocation2 + $0xa] sm:$0x1] %v909_v34  ;;  %v921_v39 = vadd.f32 %v920_v31, %v919_v38  ;;  %v925_v40 = vld [vmem:[%s924_s30] sm:$0x1]  ;;  %v938_v43 = vld [vmem:[#allocation8 + $0xf] sm:$0x1] }
 0x132   : > { %916 = vst [vmem:[#allocation2 + $0xb] sm:$0x1] %v915_v37  ;;  %v927_v42 = vadd.f32 %v926_v36, %v925_v40  ;;  %s4061_s10 = sld [smem:[#allocation4 + $0x12]]  ;;  %s930_s2 = scalar_lea.vmem [#allocation5], %s5812_s4  ;;  %v944_v45 = vld [vmem:[#allocation8] sm:$0x1] }
 0x133   : > { %922 = vst [vmem:[#allocation2 + $0xc] sm:$0x1] %v921_v39  ;;  %v931_v44 = vld [vmem:[%s930_s2] sm:$0x1]  ;;  %s4062_s17 = sld [smem:[#allocation4 + $0x13]]  ;;  %s936_s21 = scalar_lea.vmem [#allocation5], %s5816_s16 }
 0x134   : > { %928 = vst [vmem:[#allocation2 + $0xd] sm:$0x1] %v927_v42  ;;  %v933_v46 = vadd.f32 %v932_v41, %v931_v44  ;;  %v950_v47 = vld [vmem:[#allocation8 + $0x1] sm:$0x1]  ;;  %s5824_s1 = sld [smem:[#allocation4 + $0x14]]  ;;  %s942_s4 = scalar_lea.vmem [#allocation5], %s5820_s19 }
 0x135   : > { %v937_v48 = vld [vmem:[%s936_s21] sm:$0x1]  ;;  %v956_v49 = vld [vmem:[#allocation8 + $0x2] sm:$0x1]  ;;  %s5827_s18 = sld [smem:[#allocation4 + $0x15]]  ;;  %s948_s29 = scalar_lea.vmem [#allocation5], %s4060_s5 }
 0x136   : > { %934 = vst [vmem:[#allocation2 + $0xe] sm:$0x1] %v933_v46  ;;  %v939_v50 = vadd.f32 %v938_v43, %v937_v48  ;;  %v962_v51 = vld [vmem:[#allocation8 + $0x3] sm:$0x1]  ;;  %s5829_s22 = sld [smem:[#allocation4 + $0x16]] }
 0x137   : > { %v943_v52 = vld [vmem:[%s942_s4] sm:$0x1]  ;;  %v968_v53 = vld [vmem:[#allocation8 + $0x4] sm:$0x1]  ;;  %s5832_s30 = sld [smem:[#allocation4 + $0x17]] }
 0x138   : > { %940 = vst [vmem:[#allocation2 + $0xf] sm:$0x1] %v939_v50  ;;  %v945_v54 = vadd.f32 %v944_v45, %v943_v52  ;;  %v949_v55 = vld [vmem:[%s948_s29] sm:$0x1]  ;;  %s954_s16 = scalar_lea.vmem [#allocation5], %s4061_s10  ;;  %s5834_s19 = sld [smem:[#allocation4 + $0x18]] }
 0x139   : > { %v951_v56 = vadd.f32 %v950_v47, %v949_v55  ;;  %v955_v57 = vld [vmem:[%s954_s16] sm:$0x1]  ;;  %v974_v58 = vld [vmem:[#allocation8 + $0x5] sm:$0x1]  ;;  %s960_s2 = scalar_lea.vmem [#allocation5], %s4062_s17  ;;  %s4068_s10 = sld [smem:[#allocation4 + $0x19]] }
 0x13a   : > { %946 = vst [vmem:[#allocation2 + $0x10] sm:$0x1] %v945_v54  ;;  %v957_v59 = vadd.f32 %v956_v49, %v955_v57  ;;  %v961_v60 = vld [vmem:[%s960_s2] sm:$0x1]  ;;  %s966_s21 = scalar_lea.vmem [#allocation5], %s5824_s1  ;;  %s4069_s17 = sld [smem:[#allocation4 + $0x1a]] }
 0x13b   : > { %952 = vst [vmem:[#allocation2 + $0x11] sm:$0x1] %v951_v56  ;;  %v963_v61 = vadd.f32 %v962_v51, %v961_v60  ;;  %v967_v62 = vld [vmem:[%s966_s21] sm:$0x1]  ;;  %v980_v63 = vld [vmem:[#allocation8 + $0x6] sm:$0x1] }
 0x13c   : > { %958 = vst [vmem:[#allocation2 + $0x12] sm:$0x1] %v957_v59  ;;  %v969_v0 = vadd.f32 %v968_v53, %v967_v62  ;;  %s972_s5 = scalar_lea.vmem [#allocation5], %s5827_s18  ;;  %s978_s4 = scalar_lea.vmem [#allocation5], %s5829_s22  ;;  %v986_v4 = vld [vmem:[#allocation8 + $0x7] sm:$0x1] }
 0x13d   : > { %v973_v1 = vld [vmem:[%s972_s5] sm:$0x1]  ;;  %964 = vst [vmem:[#allocation2 + $0x13] sm:$0x1] %v963_v61  ;;  %s4070_s29 = sld [smem:[#allocation4 + $0x1b]]  ;;  %s984_s1 = scalar_lea.vmem [#allocation5], %s5832_s30 }
 0x13e   : > { %v975_v2 = vadd.f32 %v974_v58, %v973_v1  ;;  %v979_v3 = vld [vmem:[%s978_s4] sm:$0x1]  ;;  %970 = vst [vmem:[#allocation2 + $0x14] sm:$0x1] %v969_v0  ;;  %s4071_s16 = sld [smem:[#allocation4 + $0x1c]]  ;;  %s990_s2 = scalar_lea.vmem [#allocation5], %s5834_s19 }
 0x13f   : > { %v981_v5 = vadd.f32 %v980_v63, %v979_v3  ;;  %v985_v6 = vld [vmem:[%s984_s1] sm:$0x1]  ;;  %s5840_s18 = sld [smem:[#allocation4 + $0x1d]]  ;;  %v998_v10 = vld [vmem:[#allocation8 + $0x9] sm:$0x1]  ;;  %s996_s5 = scalar_lea.vmem [#allocation5], %s4068_s10 }
 0x140   : > { %976 = vst [vmem:[#allocation2 + $0x15] sm:$0x1] %v975_v2  ;;  %v992_v7 = vld [vmem:[#allocation8 + $0x8] sm:$0x1]  ;;  %v987_v8 = vadd.f32 %v986_v4, %v985_v6  ;;  %s5843_s21 = sld [smem:[#allocation4 + $0x1e]]  ;;  %s1002_s30 = scalar_lea.vmem [#allocation5], %s4069_s17 }
 0x141   : > { %982 = vst [vmem:[#allocation2 + $0x16] sm:$0x1] %v981_v5  ;;  %v991_v9 = vld [vmem:[%s990_s2] sm:$0x1]  ;;  %v1004_v12 = vld [vmem:[#allocation8 + $0xa] sm:$0x1] }
 0x142   : > { %988 = vst [vmem:[#allocation2 + $0x17] sm:$0x1] %v987_v8  ;;  %v993_v11 = vadd.f32 %v992_v7, %v991_v9  ;;  %s5845_s22 = sld [smem:[#allocation4 + $0x1f]]  ;;  %v997_v13 = vld [vmem:[%s996_s5] sm:$0x1] }
 0x143   : > { %v1010_v14 = vld [vmem:[#allocation8 + $0xb] sm:$0x1]  ;;  %v999_v15 = vadd.f32 %v998_v10, %v997_v13  ;;  %v1003_v16 = vld [vmem:[%s1002_s30] sm:$0x1]  ;;  %v1016_v17 = vld [vmem:[#allocation8 + $0xc] sm:$0x1] }
 0x144   : > { %994 = vst [vmem:[#allocation2 + $0x18] sm:$0x1] %v993_v11  ;;  %v1005_v18 = vadd.f32 %v1004_v12, %v1003_v16  ;;  %s1008_s19 = scalar_lea.vmem [#allocation5], %s4070_s29  ;;  %v1022_v20 = vld [vmem:[#allocation8 + $0xd] sm:$0x1]  ;;  %s1014_s4 = scalar_lea.vmem [#allocation5], %s4071_s16 }
 0x145   : > { %v1009_v19 = vld [vmem:[%s1008_s19] sm:$0x1]  ;;  %1000 = vst [vmem:[#allocation2 + $0x19] sm:$0x1] %v999_v15  ;;  %v1028_v23 = vld [vmem:[#allocation8 + $0xe] sm:$0x1] }
 0x146   : > { %v1011_v21 = vadd.f32 %v1010_v14, %v1009_v19  ;;  %v1015_v22 = vld [vmem:[%s1014_s4] sm:$0x1]  ;;  %1006 = vst [vmem:[#allocation2 + $0x1a] sm:$0x1] %v1005_v18  ;;  %s1020_s10 = scalar_lea.vmem [#allocation5], %s5840_s18  ;;  %s1026_s17 = scalar_lea.vmem [#allocation5], %s5843_s21 }
 0x147   : > { %v1017_v24 = vadd.f32 %v1016_v17, %v1015_v22  ;;  %v1021_v25 = vld [vmem:[%s1020_s10] sm:$0x1]  ;;  %v1034_v26 = vld [vmem:[#allocation8 + $0xf] sm:$0x1] }
 0x148   : > { %1012 = vst [vmem:[#allocation2 + $0x1b] sm:$0x1] %v1011_v21  ;;  %v1023_v27 = vadd.f32 %v1022_v20, %v1021_v25  ;;  %v1027_v28 = vld [vmem:[%s1026_s17] sm:$0x1]  ;;  %s1032_s29 = scalar_lea.vmem [#allocation5], %s5845_s22 }
 0x149   : > { %1018 = vst [vmem:[#allocation2 + $0x1c] sm:$0x1] %v1017_v24  ;;  %v1029_v29 = vadd.f32 %v1028_v23, %v1027_v28  ;;  %v1033_v30 = vld [vmem:[%s1032_s29] sm:$0x1] }
 0x14a   : > { %1024 = vst [vmem:[#allocation2 + $0x1d] sm:$0x1] %v1023_v27  ;;  %v1035_v31 = vadd.f32 %v1034_v26, %v1033_v30 }
 0x14b   : > { %1030 = vst [vmem:[#allocation2 + $0x1e] sm:$0x1] %v1029_v29 }
 0x14c   : > { %1036 = vst [vmem:[#allocation2 + $0x1f] sm:$0x1] %v1035_v31 }
 0x14d PF: > { %v1037_v32 = vld [vmem:[#allocation2] sm:$0xff]  ;;  %v1039_v33 = vld [vmem:[#allocation2 + $0x10] sm:$0xff]  ;;  %v1038_v34 = vld [vmem:[#allocation2 + $0x8] sm:$0xff]  ;;  %v5322_v7 = vmov 0   ;;  %s6555_s16 = sld [smem:[#allocation30_spill]]  ;;  %s6557_s2 = scalar_lea.vmem [#allocation10], %s5737_s3 }
 0x14e   : > { %1043 = vadd.xlane.f32.xlu0 %v1037_v32  ;;  %1047 = vadd.xlane.f32.xlu1 %v1039_v33  ;;  %v4698_v36 = vld [vmem:[%s5775_s14 + $0xac] ss:$12 sps:$4 sm:$0xff]   ;;  %v4700_v37 = vld [vmem:[%s5775_s14 + $0xa8] ss:$12 sps:$4 sm:$0xff]   ;;  %v4703_v55 = vld [vmem:[%s5775_s14 + $0xb0] ss:$12 sps:$4 sm:$0xff]  }
 0x14f   : > { %1287 = vmatprep.subr.bf16.mxu0 %v4698_v36  ;;  %v4701_v54 = vld [vmem:[%s5775_s14 + $0x94] ss:$12 sps:$4 sm:$0xff]   ;;  %v4704_v56 = vld [vmem:[%s5775_s14 + $0x90] ss:$12 sps:$4 sm:$0xff]   ;;  %4341 = vmatprep.subr.bf16.mxu1 %v4703_v55  ;;  %v4707_v58 = vld [vmem:[%s5775_s14 + $0x98] ss:$12 sps:$4 sm:$0xff]  }
 0x150   : > { %1288 = vmatpush1.bf16.msra.mxu0 %v4700_v37  ;;  %4342 = vmatpush3.bf16.msra.mxu1 %v4703_v55  ;;  %v4705_v57 = vld [vmem:[%s5775_s14 + $0x7c] ss:$12 sps:$4 sm:$0xff]   ;;  %v4708_v59 = vld [vmem:[%s5775_s14 + $0x78] ss:$12 sps:$4 sm:$0xff]   ;;  %v4711_v61 = vld [vmem:[%s5775_s14 + $0x80] ss:$12 sps:$4 sm:$0xff]  }
 0x151   : > { %1289 = vmatprep.subr.bf16.mxu0 %v4701_v54  ;;  %4343 = vmatprep.subr.bf16.mxu1 %v4707_v58  ;;  %v4709_v60 = vld [vmem:[%s5775_s14 + $0x64] ss:$12 sps:$4 sm:$0xff]   ;;  %v4712_v62 = vld [vmem:[%s5775_s14 + $0x60] ss:$12 sps:$4 sm:$0xff]   ;;  %v4715_v0 = vld [vmem:[%s5775_s14 + $0x68] ss:$12 sps:$4 sm:$0xff]  }
 0x152   : > { %1045 = vadd.xlane.f32.xlu0 %v1038_v34  ;;  %v4713_v63 = vld [vmem:[%s5775_s14 + $0x4c] ss:$12 sps:$4 sm:$0xff]   ;;  %v4716_v1 = vld [vmem:[%s5775_s14 + $0x48] ss:$12 sps:$4 sm:$0xff]   ;;  %v4719_v3 = vld [vmem:[%s5775_s14 + $0x50] ss:$12 sps:$4 sm:$0xff]   ;;  %1319 = vmatprep.mubr.bf16.mxu0 %v5322_v7 }
 0x153   : > { %v1040_v35 = vld [vmem:[#allocation2 + $0x18] sm:$0xff]  ;;  %v4717_v2 = vld [vmem:[%s5775_s14 + $0x34] ss:$12 sps:$4 sm:$0xff]   ;;  %v4720_v4 = vld [vmem:[%s5775_s14 + $0x30] ss:$12 sps:$4 sm:$0xff]   ;;  %s6556_s18 = scalar_lea.vmem %s6555_s16, %s5749_s0  ;;  %vm5324_vm0 = vmmov 0  }
 0x154   : > { %1049 = vadd.xlane.f32.xlu1 %v1040_v35  ;;  %1290 = vmatpush1.bf16.msra.mxu0 %v4704_v56  ;;  %v4721_v5 = vld [vmem:[%s5775_s14 + $0x1c] ss:$12 sps:$4 sm:$0xff]   ;;  %v4723_v6 = vld [vmem:[%s5775_s14 + $0x38] ss:$12 sps:$4 sm:$0xff]   ;;  %v4727_v10 = vld [vmem:[%s5775_s14 + $0x20] ss:$12 sps:$4 sm:$0xff]  }
 0x155   : > { %1291 = vmatprep.subr.bf16.mxu0 %v4705_v57  ;;  %4344 = vmatpush3.bf16.msra.mxu1 %v4707_v58  ;;  %v4724_v8 = vld [vmem:[%s5775_s14 + $0x18] ss:$12 sps:$4 sm:$0xff]   ;;  %v4728_v11 = vld [vmem:[%s5775_s14] ss:$12 sps:$4 sm:$0xff]   ;;  %v4729_v12 = vld [vmem:[%s5775_s14 + $0x8] ss:$12 sps:$4 sm:$0xff]  }
 0x156   : > { %4345 = vmatprep.subr.bf16.mxu1 %v4711_v61  ;;  %v4725_v9 = vld [vmem:[%s5775_s14 + $0x4] ss:$12 sps:$4 sm:$0xff]   ;;  %v4075_v27 = vld [vmem:[%s6556_s18] ss:$0 sm:$0xff]  ;;  %vm1546_vm1 = vcmask 261120   ;;  %s5326_s21 = smov 64  }
 0x157   : > { %s5327_s22 = smov 32   ;;  %vm1923_vm4 = vcmask 130048   ;;  %p4217_p1 = scmp.ne.s32.totalorder %s5444_s6, 1 }
 0x158   : > { %1292 = vmatpush1.bf16.msra.mxu0 %v4708_v59  ;;  %s6561_s30 = sld [smem:[#allocation39_spill]] (!%p4217_p1) }
 0x159   : > { %1293 = vmatprep.subr.bf16.mxu0 %v4709_v60  ;;  %4346 = vmatpush3.bf16.msra.mxu1 %v4711_v61 }
 0x15a   : > { %4347 = vmatprep.subr.bf16.mxu1 %v4715_v0 }
 0x15c   : > { %1294 = vmatpush1.bf16.msra.mxu0 %v4712_v62 }
 0x15d   : > { %1295 = vmatprep.subr.bf16.mxu0 %v4713_v63  ;;  %4348 = vmatpush3.bf16.msra.mxu1 %v4715_v0 }
 0x15e   : > { %4349 = vmatprep.subr.bf16.mxu1 %v4719_v3 }
 0x160   : > { %1296 = vmatpush1.bf16.msra.mxu0 %v4716_v1 }
 0x161   : > { %1297 = vmatprep.subr.bf16.mxu0 %v4717_v2  ;;  %4350 = vmatpush3.bf16.msra.mxu1 %v4719_v3 }
 0x162   : > { %4351 = vmatprep.subr.bf16.mxu1 %v4723_v6 }
 0x164   : > { %1298 = vmatpush1.bf16.msra.mxu0 %v4720_v4 }
 0x165   : > { %1299 = vmatprep.subr.bf16.mxu0 %v4721_v5  ;;  %4352 = vmatpush3.bf16.msra.mxu1 %v4723_v6 }
 0x166   : > { %4353 = vmatprep.subr.bf16.mxu1 %v4727_v10 }
 0x168   : > { %1300 = vmatpush1.bf16.msra.mxu0 %v4724_v8 }
 0x169   : > { %1301 = vmatprep.subr.bf16.mxu0 %v4725_v9  ;;  %4354 = vmatpush3.bf16.msra.mxu1 %v4727_v10 }
 0x16a   : > { %4355 = vmatprep.subr.bf16.mxu1 %v4729_v12 }
 0x16c   : > { %1302 = vmatpush1.bf16.msra.mxu0 %v4728_v11 }
 0x16d   : > { %4356 = vmatpush3.bf16.msra.mxu1 %v4729_v12 }
 0x1d7   : > { %v1044_v38 = vpop.xlane.xlu0 %1043  ;;  %v1048_v39 = vpop.xlane.xlu1 %1047 }
 0x1d8   : > { %v1052_v40 = vmul.f32 0.0078125, %v1044_v38  ;;  %v1054_v41 = vmul.f32 0.0078125, %v1048_v39 }
 0x1da   : > { %v5852_v42 = vsub.f32 %v1037_v32, %v1052_v40  ;;  %v5854_v43 = vsub.f32 %v1039_v33, %v1054_v41  ;;  %v4076_v32 = vld [vmem:[%s6557_s2] ss:$0 sm:$0xff] }
 0x1db   : > { %v1046_v44 = vpop.xlane.xlu0 %1045 }
 0x1dc   : > { %v1053_v46 = vmul.f32 0.0078125, %v1046_v44  ;;  %v1060_v47 = vmul.f32 %v5852_v42, %v5852_v42  ;;  %v1062_v51 = vmul.f32 %v5854_v43, %v5854_v43 }
 0x1dd   : > { %v1050_v45 = vpop.xlane.xlu1 %1049 }
 0x1de   : > { %v1055_v48 = vmul.f32 0.0078125, %v1050_v45  ;;  %v5858_v49 = vsub.f32 %v1038_v34, %v1053_v46  ;;  %1064 = vadd.xlane.f32.xlu0 %v1060_v47  ;;  %v1144_v46 = vlaneseq }
 0x1e0   : > { %v5860_v50 = vsub.f32 %v1040_v35, %v1055_v48  ;;  %v1061_v52 = vmul.f32 %v5858_v49, %v5858_v49  ;;  %v5910_v47 = vshrl.u32 %v1144_v46, 7 }
 0x1e2   : > { %1068 = vadd.xlane.f32.xlu0 %v1062_v51  ;;  %1066 = vadd.xlane.f32.xlu1 %v1061_v52  ;;  %v1063_v53 = vmul.f32 %v5860_v50, %v5860_v50  ;;  %v1146_v48 = vsub.s32 0, %v5910_v47  ;;  %v1154_v54 = vsub.s32 2, %v5910_v47 }
 0x1e6   : > { %1070 = vadd.xlane.f32.xlu1 %v1063_v53 }
 0x267   : > { %v1065_v13 = vpop.xlane.xlu0 %1064 }
 0x268   : > { %v1072_v14 = vmul.f32 0.0078125, %v1065_v13 }
 0x26a   : > { %v1076_v15 = vadd.f32 1e-05, %v1072_v14 }
 0x26b   : > { %v1067_v16 = vpop.xlane.xlu1 %1066  ;;  %v1069_v17 = vpop.xlane.xlu0 %1068 }
 0x26c   : > { %4818 = vrsqrt.f32 %v1076_v15  ;;  %v1073_v18 = vmul.f32 0.0078125, %v1067_v16  ;;  %v1074_v19 = vmul.f32 0.0078125, %v1069_v17 }
 0x26e   : > { %v1077_v20 = vadd.f32 1e-05, %v1073_v18  ;;  %v1078_v21 = vadd.f32 1e-05, %v1074_v19 }
 0x26f   : > { %v1071_v22 = vpop.xlane.xlu1 %1070 }
 0x270   : > { %4820 = vrsqrt.f32 %v1077_v20  ;;  %v1075_v23 = vmul.f32 0.0078125, %v1071_v22 }
 0x271   : > { %4822 = vrsqrt.f32 %v1078_v21 }
 0x272   : > { %v1079_v24 = vadd.f32 1e-05, %v1075_v23 }
 0x274   : > { %4824 = vrsqrt.f32 %v1079_v24 }
 0x279   : > { %v4819_v25 = vpop.eup %4818 }
 0x27a   : > { %v1084_v26 = vmul.f32 %v4819_v25, %v5852_v42 }
 0x27c   : > { %v1094_v31 = vmul.f32 %v4075_v27, %v1084_v26 }
 0x27d   : > { %v4821_v28 = vpop.eup %4820 }
 0x27e   : > { %v4823_v29 = vpop.eup %4822  ;;  %v1085_v30 = vmul.f32 %v4821_v28, %v5858_v49  ;;  %v1104_v36 = vadd.f32 %v4076_v32, %v1094_v31  ;;  %v1142_v49 = vld [vmem:[%s5764_s26] sm:$0x7]  ;;  %s5325_s26 = smov 96  }
 0x27f   : > { %v1086_v33 = vmul.f32 %v4823_v29, %v5854_v43  ;;  %v5323_v43 = vmov 0.0   ;;  %v1147_v51 = vrot.slane %v1142_v49, %v1146_v48  ;;  %v1155_v60 = vrot.slane %v1142_v49, %v1154_v54 }
 0x280   : > { %v1095_v34 = vmul.f32 %v4075_v27, %v1085_v30  ;;  %4361 = vmatprep.subr.bf16.mxu1 %v5323_v43  ;;  %4367 = vmatprep.subr.bf16.mxu0 %v5323_v43 }
 0x281   : > { %v4825_v35 = vpop.eup %4824  ;;  %v1096_v39 = vmul.f32 %v4075_v27, %v1086_v33 }
 0x282   : > { %v1105_v37 = vadd.f32 %v4076_v32, %v1095_v34  ;;  %v1087_v38 = vmul.f32 %v4825_v35, %v5860_v50  ;;  %v1150_v50 = vsub.s32 1, %v5910_v47 }
 0x283   : > { %v1106_v42 = vadd.f32 %v4076_v32, %v1096_v39 }
 0x284   : > { %v1108_v40 = vpack.c.bf16 %v1105_v37, %v1104_v36  ;;  %v1097_v41 = vmul.f32 %v4075_v27, %v1087_v38  ;;  %v1151_v55 = vrot.slane %v1142_v49, %v1150_v50 }
 0x286   : > { %1320 = vmatmul.mubr.bf16.vlgmr.msra.gmra.mxu0 %v1108_v40  ;;  %4357 = vmatprep.mubr.bf16.mxu1 %v1108_v40  ;;  %v1107_v44 = vadd.f32 %v4076_v32, %v1097_v41 }
 0x287   : > { %1329 = vmatprep.mubr.bf16.mxu0 %v5322_v7 }
 0x288   : > { %v1109_v45 = vpack.c.bf16 %v1107_v44, %v1106_v42 }
 0x28a   : > { %4358 = vmatmul.mubr.bf16.vlgmr.msra.gmra.mxu1 %v1109_v45 }
 0x28b   : > { %4363 = vmatprep.mubr.msk.bf16.mxu1 %vm5324_vm0, %v5323_v43 }
 0x28e   : > { %1330 = vmatmul.mubr.bf16.gmra.mxu0 %v1109_v45 }
 0x28f   : > { %4369 = vmatprep.mubr.msk.bf16.mxu0 %vm5324_vm0, %v5323_v43 }
 0x346   : > { %v1321_v52 = vpop.f32.mrf.mxu0 }
 0x347   : > { %v1322_v56 = vadd.f32 %v1321_v52, %v1147_v51 }
 0x348   : > { %v1323_v53 = vpop.f32.mrf.mxu0 }
 0x349   : > { %v1324_v63 = vadd.f32 %v1323_v53, %v1151_v55  ;;  %v1389_v2 = vmul.f32 0.17677669, %v1322_v56 }
 0x34a   : > { %v1325_v57 = vpop.f32.mrf.mxu0  ;;  %v4359_v58 = vpop.f32.mrf.mxu1 }
 0x34b   : > { %v1326_v59 = vadd.f32 %v1325_v57, %v1147_v51  ;;  %v5924_v8 = vadd.f32 %v4359_v58, %v1155_v60 }
 0x34c   : > { %v1327_v61 = vpop.f32.mrf.mxu0  ;;  %v1374_v62 = vpop.f32.mrf.mxu1 }
 0x34d   : > { %v1390_v0 = vmul.f32 0.17677669, %v1326_v59  ;;  %v1328_v1 = vadd.f32 %v1327_v61, %v1151_v55  ;;  %v5926_v13 = vadd.f32 %v1374_v62, %v1155_v60 }
 0x34e   : > { %v1331_v3 = vpop.f32.mrf.mxu0  ;;  %v4360_v4 = vpop.f32.mrf.mxu1 }
 0x34f   : > { %v5922_v5 = vadd.f32 %v4360_v4, %v1155_v60  ;;  %v4608_v6 = vpack.i.bf16 %v1328_v1, %v1324_v63  ;;  %v4613_v11 = vpack.i.bf16 %v1390_v0, %v1389_v2  ;;  %v1481_v12 = vpack.c.bf16 %v1328_v1, %v1324_v63 }
 0x350   : > { %v1333_v9 = vpop.f32.mrf.mxu0  ;;  %v1377_v10 = vpop.f32.mrf.mxu1  ;;  %v1332_v14 = vadd.f32 %v1331_v3, %v1147_v51  ;;  %v1433_v29 = vpack.c.bf16 %v1390_v0, %v1389_v2 }
 0x351   : > { %v5928_v15 = vadd.f32 %v1377_v10, %v1155_v60  ;;  %4609 = vrot.lane.b32.xlu0 %v4608_v6, %s5325_s26  ;;  %4614 = vrot.lane.b32.xlu1 %v4613_v11, %s5325_s26  ;;  %v1551_v17 = vsel %vm1546_vm1, %v1481_v12, 0  ;;  %v5935_v18 = vpack.i.bf16 %v5922_v5, %v5924_v8  ;;  %v1334_v23 = vadd.f32 %v1333_v9, %v1151_v55 }
 0x352   : > { %v1335_v16 = vpop.f32.mrf.mxu0  ;;  %4362 = vmatpush3.bf16.xpose.msra.mxu1 %v1551_v17  ;;  %v1391_v22 = vmul.f32 0.17677669, %v1332_v14 }
 0x353   : > { %v1336_v19 = vadd.f32 %v1335_v16, %v1147_v51  ;;  %v5939_v20 = vpack.i.bf16 %v5928_v15, %v5926_v13  ;;  %4373 = vmatprep.subr.bf16.mxu1 %v5323_v43 }
 0x354   : > { %v1337_v21 = vpop.f32.mrf.mxu0 }
 0x355   : > { %v1392_v24 = vmul.f32 0.17677669, %v1336_v19  ;;  %v1338_v25 = vadd.f32 %v1337_v21, %v1151_v55 }
 0x357   : > { %v4618_v26 = vpack.i.bf16 %v1338_v25, %v1334_v23  ;;  %v4628_v27 = vpack.i.bf16 %v1392_v24, %v1391_v22  ;;  %v1482_v28 = vpack.c.bf16 %v1338_v25, %v1334_v23  ;;  %v1434_v31 = vpack.c.bf16 %v1392_v24, %v1391_v22 }
 0x359   : > { %4619 = vrot.lane.b32.xlu1 %v4618_v26, %s5325_s26  ;;  %4629 = vrot.lane.b32.xlu0 %v4628_v27, %s5325_s26  ;;  %v1598_v30 = vsel %vm1546_vm1, %v1482_v28, 0 }
 0x35a   : > { %4364 = vmatmul.mubr.msk.bf16.vlgmr.msra.gmra.mxu1 %vm1546_vm1, %v1433_v29  ;;  %4368 = vmatpush3.bf16.xpose.msra.mxu0 %v1598_v30 }
 0x35b   : > { %4375 = vmatprep.mubr.msk.bf16.mxu1 %vm5324_vm0, %v5323_v43  ;;  %4379 = vmatprep.subr.bf16.mxu0 %v5323_v43 }
 0x35d   : > { %4624 = vrot.lane.b32.xlu1 %v4608_v6, %s5326_s21  ;;  %4634 = vrot.lane.b32.xlu0 %v4613_v11, %s5326_s21 }
 0x361   : > { %4639 = vrot.lane.b32.xlu1 %v4618_v26, %s5326_s21  ;;  %4649 = vrot.lane.b32.xlu0 %v4628_v27, %s5326_s21 }
 0x362   : > { %4370 = vmatmul.mubr.msk.bf16.vlgmr.msra.gmra.mxu0 %vm1546_vm1, %v1434_v31 }
 0x363   : > { %4381 = vmatprep.mubr.msk.bf16.mxu0 %vm5324_vm0, %v5323_v43 }
 0x365   : > { %4644 = vrot.lane.b32.xlu1 %v4608_v6, %s5327_s22  ;;  %4659 = vrot.lane.b32.xlu0 %v4613_v11, %s5327_s22 }
 0x369   : > { %4654 = vrot.lane.b32.xlu1 %v4618_v26, %s5327_s22 }
 0x36d   : > { %4664 = vrot.lane.b32.xlu1 %v4628_v27, %s5327_s22 }
 0x3c3   : > { %v4610_v32 = vpop.permute.xlu0 %4609  ;;  %v4615_v36 = vpop.permute.xlu1 %4614 }
 0x3c4   : > { %v4612_v33 = vunpack.i.h.bf16 %v4610_v32  ;;  %v4611_v34 = vunpack.i.l.bf16 %v4610_v32  ;;  %v4617_v38 = vunpack.i.h.bf16 %v4615_v36  ;;  %v4616_v39 = vunpack.i.l.bf16 %v4615_v36 }
 0x3c5   : > { %v1530_v36 = vpack.c.bf16 %v5922_v5, %v5924_v8 }
 0x3c6   : > { %v1483_v35 = vpack.c.bf16 %v4612_v33, %v4611_v34  ;;  %v1435_v45 = vpack.c.bf16 %v4617_v38, %v4616_v39  ;;  %v1529_v34 = vpack.c.bf16 %v5928_v15, %v5926_v13  ;;  %v1541_v13 = vand.u32 127, %v1144_v46 }
 0x3c7   : > { %v1539_v15 = vadd.s32 8, %v5910_v47 }
 0x3c8   : > { %v1645_v37 = vsel %vm1546_vm1, %v1483_v35, 0  ;;  %vm1542_vm2 = vcmp.le.s32.totalorder %v1541_v13, %v5910_v47 }
 0x3c9   : > { %4374 = vmatpush3.bf16.xpose.msra.mxu1 %v1645_v37  ;;  %v5328_v37 = vmov -1e+30   ;;  %vm1543_vm3 = vcmp.le.s32.totalorder %v1541_v13, %v1539_v15 }
 0x3ca   : > { %4385 = vmatprep.subr.bf16.mxu1 %v5323_v43  ;;  %v5999_v38 = vsel %vm1542_vm2, 0.0, %v5328_v37 }
 0x3cb   : > { %v4620_v40 = vpop.permute.xlu1 %4619  ;;  %v4630_v41 = vpop.permute.xlu0 %4629 }
 0x3cc   : > { %v4622_v42 = vunpack.i.h.bf16 %v4620_v40  ;;  %v4621_v44 = vunpack.i.l.bf16 %v4620_v40  ;;  %v4632_v58 = vunpack.i.h.bf16 %v4630_v41  ;;  %v4631_v59 = vunpack.i.l.bf16 %v4630_v41 }
 0x3cd   : > { %v6004_v40 = vsel %vm1543_vm3, 0.0, %v5328_v37 }
 0x3ce   : > { %v1484_v49 = vpack.c.bf16 %v4622_v42, %v4621_v44  ;;  %v1436_v2 = vpack.c.bf16 %v4632_v58, %v4631_v59 }
 0x3cf   : > { %v4625_v51 = vpop.permute.xlu1 %4624  ;;  %v4635_v55 = vpop.permute.xlu0 %4634 }
 0x3d0   : > { %v4627_v52 = vunpack.i.h.bf16 %v4625_v51  ;;  %v4626_v53 = vunpack.i.l.bf16 %v4625_v51  ;;  %4376 = vmatmul.mubr.msk.bf16.vlgmr.msra.gmra.mxu1 %vm1546_vm1, %v1435_v45  ;;  %v1692_v56 = vsel %vm1546_vm1, %v1484_v49, 0  ;;  %v4637_v3 = vunpack.i.h.bf16 %v4635_v55 }
 0x3d1   : > { %4387 = vmatprep.mubr.msk.bf16.mxu1 %vm5324_vm0, %v5323_v43  ;;  %4380 = vmatpush3.bf16.xpose.msra.mxu0 %v1692_v56  ;;  %v4636_v4 = vunpack.i.l.bf16 %v4635_v55 }
 0x3d2   : > { %v1485_v57 = vpack.c.bf16 %v4627_v52, %v4626_v53  ;;  %4391 = vmatprep.subr.bf16.mxu0 %v5323_v43 }
 0x3d3   : > { %v4640_v60 = vpop.permute.xlu1 %4639  ;;  %v4650_v1 = vpop.permute.xlu0 %4649  ;;  %v1437_v14 = vpack.c.bf16 %v4637_v3, %v4636_v4 }
 0x3d4   : > { %v4642_v61 = vunpack.i.h.bf16 %v4640_v60  ;;  %v4641_v62 = vunpack.i.l.bf16 %v4640_v60  ;;  %v1739_v63 = vsel %vm1546_vm1, %v1485_v57, 0  ;;  %v4652_v16 = vunpack.i.h.bf16 %v4650_v1 }
 0x3d5   : > { %4386 = vmatpush3.bf16.xpose.msra.mxu1 %v1739_v63  ;;  %v4651_v17 = vunpack.i.l.bf16 %v4650_v1 }
 0x3d6   : > { %v1486_v0 = vpack.c.bf16 %v4642_v61, %v4641_v62  ;;  %4397 = vmatprep.subr.bf16.mxu1 %v5323_v43 }
 0x3d7   : > { %v4645_v6 = vpop.permute.xlu1 %4644  ;;  %v4660_v21 = vpop.permute.xlu0 %4659  ;;  %v1438_v26 = vpack.c.bf16 %v4652_v16, %v4651_v17 }
 0x3d8   : > { %v4647_v9 = vunpack.i.h.bf16 %v4645_v6  ;;  %v4646_v10 = vunpack.i.l.bf16 %v4645_v6  ;;  %4382 = vmatmul.mubr.msk.bf16.vlgmr.msra.gmra.mxu0 %vm1546_vm1, %v1436_v2  ;;  %v1786_v11 = vsel %vm1546_vm1, %v1486_v0, 0  ;;  %v4662_v27 = vunpack.i.h.bf16 %v4660_v21 }
 0x3d9   : > { %4392 = vmatpush3.bf16.xpose.msra.mxu0 %v1786_v11  ;;  %4393 = vmatprep.mubr.msk.bf16.mxu0 %vm5324_vm0, %v5323_v43  ;;  %v4661_v28 = vunpack.i.l.bf16 %v4660_v21 }
 0x3da   : > { %v1487_v12 = vpack.c.bf16 %v4647_v9, %v4646_v10  ;;  %4403 = vmatprep.subr.bf16.mxu0 %v5323_v43 }
 0x3db   : > { %v4655_v19 = vpop.permute.xlu1 %4654  ;;  %v1439_v31 = vpack.c.bf16 %v4662_v27, %v4661_v28 }
 0x3dc   : > { %v4657_v22 = vunpack.i.h.bf16 %v4655_v19  ;;  %v4656_v23 = vunpack.i.l.bf16 %v4655_v19  ;;  %v1833_v24 = vsel %vm1546_vm1, %v1487_v12, 0  ;;  %4388 = vmatmul.mubr.msk.bf16.vlgmr.msra.gmra.mxu1 %vm1546_vm1, %v1437_v14 }
 0x3dd   : > { %4398 = vmatpush3.bf16.xpose.msra.mxu1 %v1833_v24  ;;  %4399 = vmatprep.mubr.msk.bf16.mxu1 %vm5324_vm0, %v5323_v43 }
 0x3de   : > { %v1488_v25 = vpack.c.bf16 %v4657_v22, %v4656_v23  ;;  %4409 = vmatprep.subr.bf16.mxu1 %v5323_v43 }
 0x3df   : > { %v4665_v29 = vpop.permute.xlu1 %4664 }
 0x3e0   : > { %v1880_v30 = vsel %vm1546_vm1, %v1488_v25, 0  ;;  %4394 = vmatmul.mubr.msk.bf16.vlgmr.msra.gmra.mxu0 %vm1546_vm1, %v1438_v26  ;;  %v4667_v32 = vunpack.i.h.bf16 %v4665_v29  ;;  %v4666_v33 = vunpack.i.l.bf16 %v4665_v29 }
 0x3e1   : > { %4404 = vmatpush3.bf16.xpose.msra.mxu0 %v1880_v30  ;;  %4405 = vmatprep.mubr.msk.bf16.mxu0 %vm5324_vm0, %v5323_v43 }
 0x3e2   : > { %4415 = vmatprep.subr.bf16.mxu0 %v5323_v43  ;;  %v1440_v35 = vpack.c.bf16 %v4667_v32, %v4666_v33 }
 0x3e4   : > { %4400 = vmatmul.mubr.msk.bf16.vlgmr.msra.gmra.mxu1 %vm1546_vm1, %v1439_v31 }
 0x3e5   : > { %4410 = vmatpush3.bf16.msra.mxu1 %v1529_v34  ;;  %4411 = vmatprep.mubr.msk.bf16.mxu1 %vm5324_vm0, %v5323_v43 }
 0x3e6   : > { %4421 = vmatprep.subr.bf16.mxu1 %v5323_v43 }
 0x3e8   : > { %4406 = vmatmul.mubr.msk.bf16.vlgmr.msra.gmra.mxu0 %vm1546_vm1, %v1440_v35 }
 0x3e9   : > { %4416 = vmatpush3.bf16.msra.mxu0 %v1530_v36  ;;  %4417 = vmatprep.mubr.msk.bf16.mxu0 %vm5324_vm0, %v5323_v43 }
 0x3ea   : > { %4427 = vmatprep.subr.bf16.mxu0 %v5323_v43 }
 0x41a   : > { %v1587_v39 = vpop.f32.mrf.mxu1 }
 0x41b   : > { %v6002_v5 = vadd.f32 %v1587_v39, %v5999_v38 }
 0x41c   : > { %v4365_v8 = vpop.f32.mrf.mxu1 }
 0x41d   : > { %v1924_v41 = vsel %vm1923_vm4, %v6002_v5, -inf }
 0x41e   : > { %v1590_v46 = vpop.f32.mrf.mxu1  ;;  %1925 = vmax.xlane.f32.xlu0 %v1924_v41 }
 0x41f   : > { %v6009_v42 = vadd.f32 %v1590_v46, %v6004_v40 }
 0x420   : > { %v4366_v44 = vpop.f32.mrf.mxu1 }
 0x421   : > { %v1927_v45 = vsel %vm1923_vm4, %v6009_v42, -inf }
 0x422   : > { %1928 = vmax.xlane.f32.xlu1 %v1927_v45  ;;  %v1634_v49 = vpop.f32.mrf.mxu0 }
 0x423   : > { %v6014_v51 = vadd.f32 %v1634_v49, %v5999_v38 }
 0x424   : > { %v4371_v52 = vpop.f32.mrf.mxu0 }
 0x425   : > { %v1930_v53 = vsel %vm1923_vm4, %v6014_v51, -inf }
 0x426   : > { %1931 = vmax.xlane.f32.xlu0 %v1930_v53  ;;  %v1637_v55 = vpop.f32.mrf.mxu0 }
 0x427   : > { %v6019_v56 = vadd.f32 %v1637_v55, %v6004_v40 }
 0x428   : > { %v4372_v57 = vpop.f32.mrf.mxu0 }
 0x429   : > { %v1933_v58 = vsel %vm1923_vm4, %v6019_v56, -inf }
 0x42a   : > { %1934 = vmax.xlane.f32.xlu0 %v1933_v58 }
 0x490   : > { %v1681_v59 = vpop.f32.mrf.mxu1 }
 0x491   : > { %v6024_v60 = vadd.f32 %v1681_v59, %v5999_v38 }
 0x492   : > { %v4377_v61 = vpop.f32.mrf.mxu1 }
 0x493   : > { %v1936_v62 = vsel %vm1923_vm4, %v6024_v60, -inf }
 0x494   : > { %1937 = vmax.xlane.f32.xlu0 %v1936_v62  ;;  %v1684_v63 = vpop.f32.mrf.mxu1 }
 0x495   : > { %v6029_v0 = vadd.f32 %v1684_v63, %v6004_v40 }
 0x496   : > { %v4378_v1 = vpop.f32.mrf.mxu1 }
 0x497   : > { %v1939_v2 = vsel %vm1923_vm4, %v6029_v0, -inf }
 0x498   : > { %1940 = vmax.xlane.f32.xlu1 %v1939_v2  ;;  %v1728_v3 = vpop.f32.mrf.mxu0 }
 0x499   : > { %v6034_v4 = vadd.f32 %v1728_v3, %v5999_v38 }
 0x49a   : > { %v4383_v6 = vpop.f32.mrf.mxu0 }
 0x49b   : > { %v1942_v9 = vsel %vm1923_vm4, %v6034_v4, -inf }
 0x49c   : > { %v1731_v10 = vpop.f32.mrf.mxu0  ;;  %1943 = vmax.xlane.f32.xlu0 %v1942_v9  ;;  %v1775_v11 = vpop.f32.mrf.mxu1 }
 0x49d   : > { %v6039_v12 = vadd.f32 %v1731_v10, %v6004_v40  ;;  %v6042_v14 = vadd.f32 %v1775_v11, %v5999_v38 }
 0x49e   : > { %v4384_v16 = vpop.f32.mrf.mxu0  ;;  %v4389_v17 = vpop.f32.mrf.mxu1 }
 0x49f   : > { %v1945_v19 = vsel %vm1923_vm4, %v6039_v12, -inf  ;;  %v1948_v21 = vsel %vm1923_vm4, %v6042_v14, -inf }
 0x4a0   : > { %v1822_v22 = vpop.f32.mrf.mxu0  ;;  %1946 = vmax.xlane.f32.xlu1 %v1945_v19  ;;  %1949 = vmax.xlane.f32.xlu0 %v1948_v21  ;;  %v1778_v23 = vpop.f32.mrf.mxu1 }
 0x4a1   : > { %v6049_v24 = vadd.f32 %v1822_v22, %v5999_v38  ;;  %v6052_v25 = vadd.f32 %v1778_v23, %v6004_v40 }
 0x4a2   : > { %v4390_v26 = vpop.f32.mrf.mxu1  ;;  %v4395_v27 = vpop.f32.mrf.mxu0 }
 0x4a3   : > { %v1954_v28 = vsel %vm1923_vm4, %v6049_v24, -inf  ;;  %v1951_v29 = vsel %vm1923_vm4, %v6052_v25, -inf }
 0x4a4   : > { %v1825_v30 = vpop.f32.mrf.mxu0  ;;  %1955 = vmax.xlane.f32.xlu0 %v1954_v28  ;;  %1952 = vmax.xlane.f32.xlu1 %v1951_v29  ;;  %v1869_v31 = vpop.f32.mrf.mxu1 }
 0x4a5   : > { %v6059_v32 = vadd.f32 %v1825_v30, %v6004_v40  ;;  %v6062_v33 = vadd.f32 %v1869_v31, %v5999_v38 }
 0x4a6   : > { %v4396_v34 = vpop.f32.mrf.mxu0  ;;  %v4401_v35 = vpop.f32.mrf.mxu1 }
 0x4a7   : > { %v1957_v36 = vsel %vm1923_vm4, %v6059_v32, -inf  ;;  %v1960_v13 = vsel %vm1923_vm4, %v6062_v33, -inf }
 0x4a8   : > { %v1916_v15 = vpop.f32.mrf.mxu0  ;;  %1958 = vmax.xlane.f32.xlu1 %v1957_v36  ;;  %1961 = vmax.xlane.f32.xlu0 %v1960_v13  ;;  %v1872_v39 = vpop.f32.mrf.mxu1 }
 0x4a9   : > { %v6069_v37 = vadd.f32 %v1916_v15, %v5999_v38  ;;  %v6072_v8 = vadd.f32 %v1872_v39, %v6004_v40  ;;  %v1926_v38 = vpop.xlane.xlu0 %1925 }
 0x4aa   : > { %v4407_v41 = vpop.f32.mrf.mxu0  ;;  %v4402_v46 = vpop.f32.mrf.mxu1  ;;  %v1972_v53 = vsub.f32 %v6002_v5, %v1926_v38 }
 0x4ab   : > { %v1966_v44 = vsel %vm1923_vm4, %v6069_v37, -inf  ;;  %v1963_v49 = vsel %vm1923_vm4, %v6072_v8, -inf  ;;  %v1929_v2 = vpop.xlane.xlu1 %1928 }
 0x4ac   : > { %v1919_v45 = vpop.f32.mrf.mxu0  ;;  %1967 = vmax.xlane.f32.xlu0 %v1966_v44  ;;  %1964 = vmax.xlane.f32.xlu1 %v1963_v49  ;;  %v1988_v57 = vmul.f32 1.442695, %v1972_v53  ;;  %v1973_v3 = vsub.f32 %v6009_v42, %v1929_v2 }
 0x4ad   : > { %v6093_v1 = vadd.f32 %v1919_v45, %v6004_v40 }
 0x4ae   : > { %v4408_v52 = vpop.f32.mrf.mxu0  ;;  %4826 = vpow2.f32 %v1988_v57  ;;  %v1990_v9 = vmul.f32 1.442695, %v1973_v3 }
 0x4af   : > { %v1932_v55 = vpop.xlane.xlu0 %1931 }
 0x4b0   : > { %v1974_v58 = vsub.f32 %v6014_v51, %v1932_v55  ;;  %v1969_v51 = vsel %vm1923_vm4, %v6093_v1, -inf }
 0x4b2   : > { %v1992_v59 = vmul.f32 1.442695, %v1974_v58 }
 0x4b3   : > { %v1935_v6 = vpop.xlane.xlu0 %1934 }
 0x4b4   : > { %4828 = vpow2.f32 %v1992_v59  ;;  %v1975_v40 = vsub.f32 %v6019_v56, %v1935_v6 }
 0x4b5   : > { %4830 = vpow2.f32 %v1990_v9 }
 0x4b6   : > { %v1994_v10 = vmul.f32 1.442695, %v1975_v40 }
 0x4b8   : > { %4832 = vpow2.f32 %v1994_v10 }
 0x4bb   : > { %v6086_v61 = vpop.eup %4826 }
 0x4bc   : > { %v2020_v62 = vsel %vm1923_vm4, %v6086_v61, 0.0 }
 0x4bd   : > { %4674 = vrot.lane.b32.xlu1 %v5935_v18, %s5325_s26 }
 0x4c1   : > { %4679 = vrot.lane.b32.xlu1 %v5939_v20, %s5326_s21  ;;  %v6090_v63 = vpop.eup %4828 }
 0x4c2   : > { %4669 = vrot.lane.b32.xlu0 %v5939_v20, %s5325_s26  ;;  %v2026_v5 = vsel %vm1923_vm4, %v6090_v63, 0.0  ;;  %v6103_v11 = vpop.eup %4830 }
 0x4c3   : > { %v2023_v16 = vsel %vm1923_vm4, %v6103_v11, 0.0 }
 0x4c5   : > { %v6107_v17 = vpop.eup %4832 }
 0x4c6   : > { %v2029_v42 = vsel %vm1923_vm4, %v6107_v17, 0.0 }
 0x4e1   : > { %2021 = vadd.xlane.f32.xlu0 %v2020_v62 }
 0x4e5   : > { %2027 = vadd.xlane.f32.xlu0 %v2026_v5  ;;  %1970 = vmax.xlane.f32.xlu1 %v1969_v51 }
 0x4f6   : > { %4684 = vrot.lane.b32.xlu1 %v5935_v18, %s5326_s21 }
 0x51a   : > { %2024 = vadd.xlane.f32.xlu1 %v2023_v16 }
 0x51d   : > { %v1938_v19 = vpop.xlane.xlu0 %1937 }
 0x51e   : > { %v1976_v21 = vsub.f32 %v6024_v60, %v1938_v19  ;;  %2030 = vadd.xlane.f32.xlu1 %v2029_v42 }
 0x520   : > { %v1996_v22 = vmul.f32 1.442695, %v1976_v21 }
 0x521   : > { %v1941_v56 = vpop.xlane.xlu1 %1940 }
 0x522   : > { %4834 = vpow2.f32 %v1996_v22  ;;  %v1977_v23 = vsub.f32 %v6029_v0, %v1941_v56 }
 0x524   : > { %v1998_v26 = vmul.f32 1.442695, %v1977_v23 }
 0x525   : > { %v1944_v27 = vpop.xlane.xlu0 %1943 }
 0x526   : > { %4836 = vpow2.f32 %v1998_v26  ;;  %v1978_v28 = vsub.f32 %v6034_v4, %v1944_v27 }
 0x528   : > { %v2000_v29 = vmul.f32 1.442695, %v1978_v28 }
 0x529   : > { %v1947_v30 = vpop.xlane.xlu1 %1946  ;;  %v1950_v31 = vpop.xlane.xlu0 %1949 }
 0x52a   : > { %4838 = vpow2.f32 %v2000_v29  ;;  %v1979_v60 = vsub.f32 %v6039_v12, %v1947_v30  ;;  %v1980_v34 = vsub.f32 %v6042_v14, %v1950_v31 }
 0x52c   : > { %v2002_v35 = vmul.f32 1.442695, %v1979_v60  ;;  %v2004_v36 = vmul.f32 1.442695, %v1980_v34 }
 0x52d   : > { %v1956_v13 = vpop.xlane.xlu0 %1955  ;;  %v1953_v15 = vpop.xlane.xlu1 %1952 }
 0x52e   : > { %4840 = vpow2.f32 %v2002_v35  ;;  %v1982_v0 = vsub.f32 %v6049_v24, %v1956_v13  ;;  %v1981_v41 = vsub.f32 %v6052_v25, %v1953_v15 }
 0x52f   : > { %v6116_v39 = vpop.eup %4834  ;;  %4842 = vpow2.f32 %v2004_v36 }
 0x530   : > { %v2032_v4 = vsel %vm1923_vm4, %v6116_v39, 0.0  ;;  %v2008_v46 = vmul.f32 1.442695, %v1982_v0  ;;  %v2006_v44 = vmul.f32 1.442695, %v1981_v41 }
 0x531   : > { %2033 = vadd.xlane.f32.xlu0 %v2032_v4  ;;  %v1959_v12 = vpop.xlane.xlu1 %1958  ;;  %v1962_v14 = vpop.xlane.xlu0 %1961 }
 0x532   : > { %4844 = vpow2.f32 %v2008_v46  ;;  %v1983_v49 = vsub.f32 %v6059_v32, %v1959_v12  ;;  %v1984_v52 = vsub.f32 %v6062_v33, %v1962_v14 }
 0x533   : > { %v6122_v45 = vpop.eup %4836  ;;  %4846 = vpow2.f32 %v2006_v44 }
 0x534   : > { %v2035_v24 = vsel %vm1923_vm4, %v6122_v45, 0.0  ;;  %v2010_v25 = vmul.f32 1.442695, %v1983_v49  ;;  %v2012_v38 = vmul.f32 1.442695, %v1984_v52 }
 0x535   : > { %2036 = vadd.xlane.f32.xlu1 %v2035_v24  ;;  %v1968_v53 = vpop.xlane.xlu0 %1967  ;;  %v1965_v57 = vpop.xlane.xlu1 %1964 }
 0x536   : > { %4848 = vpow2.f32 %v2010_v25  ;;  %v1986_v55 = vsub.f32 %v6069_v37, %v1968_v53  ;;  %v1985_v59 = vsub.f32 %v6072_v8, %v1965_v57 }
 0x537   : > { %v6129_v58 = vpop.eup %4838  ;;  %4850 = vpow2.f32 %v2012_v38 }
 0x538   : > { %v2016_v32 = vmul.f32 1.442695, %v1986_v55  ;;  %v2038_v33 = vsel %vm1923_vm4, %v6129_v58, 0.0  ;;  %v2014_v62 = vmul.f32 1.442695, %v1985_v59 }
 0x539   : > { %2039 = vadd.xlane.f32.xlu0 %v2038_v33  ;;  %v4675_v23 = vpop.permute.xlu1 %4674  ;;  %v4670_v60 = vpop.permute.xlu0 %4669 }
 0x53a   : > { %4852 = vpow2.f32 %v2016_v32  ;;  %v4672_v0 = vunpack.i.h.bf16 %v4670_v60  ;;  %v4671_v41 = vunpack.i.l.bf16 %v4670_v60  ;;  %v4677_v49 = vunpack.i.h.bf16 %v4675_v23 }
 0x53b   : > { %v6134_v5 = vpop.eup %4840  ;;  %4854 = vpow2.f32 %v2014_v62  ;;  %v4676_v52 = vunpack.i.l.bf16 %v4675_v23 }
 0x53c   : > { %v6136_v51 = vpop.eup %4842  ;;  %v2041_v37 = vsel %vm1923_vm4, %v6134_v5, 0.0  ;;  %v1531_v14 = vpack.c.bf16 %v4672_v0, %v4671_v41 }
 0x53d   : > { %v2044_v2 = vsel %vm1923_vm4, %v6136_v51, 0.0  ;;  %2042 = vadd.xlane.f32.xlu1 %v2041_v37  ;;  %v6168_v26 = vpop.permute.xlu1 %4679 }
 0x53e   : > { %2045 = vadd.xlane.f32.xlu0 %v2044_v2  ;;  %v4682_v32 = vunpack.i.h.bf16 %v6168_v26  ;;  %v4681_v33 = vunpack.i.l.bf16 %v6168_v26 }
 0x53f   : > { %v6142_v8 = vpop.eup %4844 }
 0x540   : > { %v6144_v3 = vpop.eup %4846  ;;  %v2050_v6 = vsel %vm1923_vm4, %v6142_v8, 0.0 }
 0x541   : > { %v2047_v9 = vsel %vm1923_vm4, %v6144_v3, 0.0 }
 0x542   : > { %2051 = vadd.xlane.f32.xlu0 %v2050_v6  ;;  %2048 = vadd.xlane.f32.xlu1 %v2047_v9 }
 0x543   : > { %v6150_v40 = vpop.eup %4848 }
 0x544   : > { %v6152_v10 = vpop.eup %4850  ;;  %v2053_v16 = vsel %vm1923_vm4, %v6150_v40, 0.0 }
 0x545   : > { %v2056_v19 = vsel %vm1923_vm4, %v6152_v10, 0.0 }
 0x546   : > { %2057 = vadd.xlane.f32.xlu0 %v2056_v19  ;;  %2054 = vadd.xlane.f32.xlu1 %v2053_v16  ;;  %v1533_v16 = vpack.c.bf16 %v4682_v32, %v4681_v33 }
 0x547   : > { %v6158_v21 = vpop.eup %4852 }
 0x548   : > { %v6160_v42 = vpop.eup %4854  ;;  %v2062_v22 = vsel %vm1923_vm4, %v6158_v21, 0.0 }
 0x549   : > { %v2059_v56 = vsel %vm1923_vm4, %v6160_v42, 0.0 }
 0x54a   : > { %2063 = vadd.xlane.f32.xlu0 %v2062_v22  ;;  %2060 = vadd.xlane.f32.xlu1 %v2059_v56 }
 0x560   : > { %4689 = vrot.lane.b32.xlu0 %v5939_v20, %s5327_s22 }
 0x56a   : > { %v2022_v34 = vpop.xlane.xlu0 %2021 }
 0x56e   : > { %v1971_v27 = vpop.xlane.xlu1 %1970  ;;  %v2028_v35 = vpop.xlane.xlu0 %2027 }
 0x56f   : > { %v1987_v28 = vsub.f32 %v6093_v1, %v1971_v27 }
 0x571   : > { %v2018_v29 = vmul.f32 1.442695, %v1987_v28 }
 0x572   : > { %v6177_v20 = vpop.permute.xlu1 %4684 }
 0x573   : > { %4856 = vpow2.f32 %v2018_v29  ;;  %v4687_v26 = vunpack.i.h.bf16 %v6177_v20  ;;  %v4686_v27 = vunpack.i.l.bf16 %v6177_v20 }
 0x574   : > { %4858 = vrcp.f32 %v2022_v34 }
 0x580   : > { %v6171_v30 = vpop.eup %4856 }
 0x581   : > { %v2065_v31 = vsel %vm1923_vm4, %v6171_v30, 0.0  ;;  %v4859_v13 = vpop.eup %4858 }
 0x582   : > { %2066 = vadd.xlane.f32.xlu1 %v2065_v31  ;;  %v2069_v4 = vmul.f32 %v4859_v13, %v6086_v61 }
 0x593   : > { %4694 = vrot.lane.b32.xlu1 %v5935_v18, %s5327_s22 }
 0x5a3   : > { %v2025_v36 = vpop.xlane.xlu1 %2024 }
 0x5a4   : > { %4860 = vrcp.f32 %v2025_v36 }
 0x5a5   : > { %4862 = vrcp.f32 %v2028_v35  ;;  %v1534_v35 = vpack.c.bf16 %v4687_v26, %v4686_v27 }
 0x5a7   : > { %v2031_v1 = vpop.xlane.xlu1 %2030 }
 0x5a8   : > { %4864 = vrcp.f32 %v2031_v1 }
 0x5b1   : > { %v4861_v15 = vpop.eup %4860 }
 0x5b2   : > { %v2071_v46 = vmul.f32 %v4861_v15, %v6103_v11  ;;  %v4863_v18 = vpop.eup %4862  ;;  %v1532_v11 = vpack.c.bf16 %v4677_v49, %v4676_v52 }
 0x5b3   : > { %v2073_v24 = vmul.f32 %v4863_v18, %v6090_v63 }
 0x5b4   : > { %v2100_v44 = vpack.c.bf16 %v2071_v46, %v2069_v4 }
 0x5b5   : > { %v4865_v12 = vpop.eup %4864 }
 0x5b6   : > { %4412 = vmatmul.mubr.msk.bf16.vlgmr.msra.gmra.mxu1 %vm1923_vm4, %v2100_v44  ;;  %v2075_v25 = vmul.f32 %v4865_v12, %v6107_v17 }
 0x5b7   : > { %4422 = vmatpush3.bf16.msra.mxu1 %v1531_v14  ;;  %4423 = vmatprep.mubr.msk.bf16.mxu1 %vm5324_vm0, %v5323_v43  ;;  %v4731_v14 = vld [vmem:[%s5777_s7] sm:$0xff]  }
 0x5b8   : > { %v2101_v61 = vpack.c.bf16 %v2075_v25, %v2073_v24  ;;  %4433 = vmatprep.subr.bf16.mxu1 %v5323_v43 }
 0x5ba   : > { %v2034_v38 = vpop.xlane.xlu0 %2033  ;;  %4418 = vmatmul.mubr.msk.bf16.vlgmr.msra.gmra.mxu0 %vm1923_vm4, %v2101_v61 }
 0x5bb   : > { %4866 = vrcp.f32 %v2034_v38  ;;  %4428 = vmatpush3.bf16.msra.mxu0 %v1532_v11  ;;  %4429 = vmatprep.mubr.msk.bf16.mxu0 %vm5324_vm0, %v5323_v43 }
 0x5bc   : > { %4439 = vmatprep.subr.bf16.mxu0 %v5323_v43 }
 0x5be   : > { %v2037_v53 = vpop.xlane.xlu1 %2036 }
 0x5bf   : > { %4868 = vrcp.f32 %v2037_v53 }
 0x5c2   : > { %v2040_v63 = vpop.xlane.xlu0 %2039 }
 0x5c3   : > { %4870 = vrcp.f32 %v2040_v63  ;;  %v4733_v63 = vld [vmem:[%s5777_s7 + $0x10] sm:$0xff]  }
 0x5c6   : > { %v2043_v17 = vpop.xlane.xlu1 %2042 }
 0x5c7   : > { %v2046_v55 = vpop.xlane.xlu0 %2045  ;;  %4872 = vrcp.f32 %v2043_v17  ;;  %v4734_v17 = vld [vmem:[%s5777_s7 + $0x28] sm:$0xff]  }
 0x5c8   : > { %v4867_v57 = vpop.eup %4866  ;;  %4874 = vrcp.f32 %v2046_v55  ;;  %v4736_v55 = vld [vmem:[%s5777_s7 + $0x38] sm:$0xff]  }
 0x5c9   : > { %v2077_v2 = vmul.f32 %v4867_v57, %v6116_v39 }
 0x5cb   : > { %v2052_v62 = vpop.xlane.xlu0 %2051  ;;  %v2049_v37 = vpop.xlane.xlu1 %2048 }
 0x5cc   : > { %v4869_v59 = vpop.eup %4868  ;;  %4876 = vrcp.f32 %v2049_v37 }
 0x5cd   : > { %v2079_v6 = vmul.f32 %v4869_v59, %v6122_v45  ;;  %4878 = vrcp.f32 %v2052_v62 }
 0x5cf   : > { %v2102_v9 = vpack.c.bf16 %v2079_v6, %v2077_v2  ;;  %v2058_v19 = vpop.xlane.xlu0 %2057  ;;  %v2055_v22 = vpop.xlane.xlu1 %2054  ;;  %v4735_v6 = vld [vmem:[%s5777_s7 + $0x20] sm:$0xff]  }
 0x5d0   : > { %4880 = vrcp.f32 %v2055_v22  ;;  %v4871_v56 = vpop.eup %4870 }
 0x5d1   : > { %4424 = vmatmul.mubr.msk.bf16.vlgmr.msra.gmra.mxu1 %vm1923_vm4, %v2102_v9  ;;  %4882 = vrcp.f32 %v2058_v19  ;;  %v2081_v28 = vmul.f32 %v4871_v56, %v6129_v58 }
 0x5d2   : > { %4434 = vmatpush3.bf16.msra.mxu1 %v1533_v16  ;;  %4435 = vmatprep.mubr.msk.bf16.mxu1 %vm5324_vm0, %v5323_v43 }
 0x5d3   : > { %4445 = vmatprep.subr.bf16.mxu1 %v5323_v43  ;;  %v2064_v39 = vpop.xlane.xlu0 %2063  ;;  %v2061_v23 = vpop.xlane.xlu1 %2060 }
 0x5d4   : > { %v4873_v45 = vpop.eup %4872  ;;  %4884 = vrcp.f32 %v2061_v23 }
 0x5d5   : > { %v2083_v29 = vmul.f32 %v4873_v45, %v6134_v5  ;;  %v4875_v34 = vpop.eup %4874  ;;  %4886 = vrcp.f32 %v2064_v39 }
 0x5d6   : > { %v2085_v20 = vmul.f32 %v4875_v34, %v6136_v51 }
 0x5d7   : > { %v4690_v31 = vpop.permute.xlu0 %4689  ;;  %v2103_v60 = vpack.c.bf16 %v2083_v29, %v2081_v28  ;;  %v4737_v28 = vld [vmem:[%s5777_s7 + $0x30] sm:$0xff]  }
 0x5d8   : > { %v4692_v1 = vunpack.i.h.bf16 %v4690_v31  ;;  %v4691_v13 = vunpack.i.l.bf16 %v4690_v31 }
 0x5d9   : > { %4430 = vmatmul.mubr.msk.bf16.vlgmr.msra.gmra.mxu0 %vm1923_vm4, %v2103_v60  ;;  %v4877_v36 = vpop.eup %4876 }
 0x5da   : > { %4440 = vmatpush3.bf16.msra.mxu0 %v1534_v35  ;;  %4441 = vmatprep.mubr.msk.bf16.mxu0 %vm5324_vm0, %v5323_v43  ;;  %v2087_v15 = vmul.f32 %v4877_v36, %v6144_v3  ;;  %v4879_v58 = vpop.eup %4878  ;;  %v1535_v41 = vpack.c.bf16 %v4692_v1, %v4691_v13 }
 0x5db   : > { %4451 = vmatprep.subr.bf16.mxu0 %v5323_v43  ;;  %v2089_v4 = vmul.f32 %v4879_v58, %v6142_v8 }
 0x5dc   : > { %v2104_v5 = vpack.c.bf16 %v2087_v15, %v2085_v20 }
 0x5dd   : > { %v4881_v0 = vpop.eup %4880 }
 0x5de   : > { %4436 = vmatmul.mubr.msk.bf16.vlgmr.msra.gmra.mxu1 %vm1923_vm4, %v2104_v5  ;;  %v2091_v46 = vmul.f32 %v4881_v0, %v6150_v40  ;;  %v4883_v18 = vpop.eup %4882  ;;  %v4730_v40 = vld [vmem:[%s5777_s7 + $0x8] sm:$0xff]  }
 0x5df   : > { %4446 = vmatpush3.bf16.msra.mxu1 %v1535_v41  ;;  %4447 = vmatprep.mubr.msk.bf16.mxu1 %vm5324_vm0, %v5323_v43  ;;  %v2093_v44 = vmul.f32 %v4883_v18, %v6152_v10 }
 0x5e0   : > { %v2105_v51 = vpack.c.bf16 %v2091_v46, %v2089_v4  ;;  %4457 = vmatprep.subr.bf16.mxu1 %v4730_v40 }
 0x5e1   : > { %v4885_v3 = vpop.eup %4884 }
 0x5e2   : > { %4442 = vmatmul.mubr.msk.bf16.vlgmr.msra.gmra.mxu0 %vm1923_vm4, %v2105_v51  ;;  %v2095_v12 = vmul.f32 %v4885_v3, %v6160_v42  ;;  %v4887_v25 = vpop.eup %4886 }
 0x5e3   : > { %4453 = vmatprep.mubr.msk.bf16.mxu0 %vm5324_vm0, %v5323_v43  ;;  %v4732_v43 = vld [vmem:[%s5777_s7 + $0x18] sm:$0xff]   ;;  %v2097_v61 = vmul.f32 %v4887_v25, %v6158_v21 }
 0x5e4   : > { %v2106_v8 = vpack.c.bf16 %v2095_v12, %v2093_v44 }
 0x5e6   : > { %4448 = vmatmul.mubr.msk.bf16.vlgmr.msra.gmra.mxu1 %vm1923_vm4, %v2106_v8 }
 0x5e7   : > { %4458 = vmatpush3.bf16.msra.mxu1 %v4730_v40 }
 0x5e8   : > { %4459 = vmatprep.subr.bf16.mxu1 %v4731_v14 }
 0x5eb   : > { %4460 = vmatpush3.bf16.msra.mxu1 %v4731_v14 }
 0x5ec   : > { %4473 = vmatprep.subr.bf16.mxu1 %v4734_v17 }
 0x60b   : > { %v2067_v49 = vpop.xlane.xlu1 %2066 }
 0x60c   : > { %4888 = vrcp.f32 %v2067_v49 }
 0x60f   : > { %v4695_v10 = vpop.permute.xlu1 %4694 }
 0x610   : > { %v4697_v42 = vunpack.i.h.bf16 %v4695_v10  ;;  %v4696_v52 = vunpack.i.l.bf16 %v4695_v10 }
 0x612   : > { %v1536_v24 = vpack.c.bf16 %v4697_v42, %v4696_v52 }
 0x614   : > { %4452 = vmatpush3.bf16.msra.mxu0 %v1536_v24 }
 0x615   : > { %4465 = vmatprep.subr.bf16.mxu0 %v4732_v43 }
 0x619   : > { %v4889_v38 = vpop.eup %4888 }
 0x61a   : > { %v2099_v11 = vmul.f32 %v4889_v38, %v6171_v30 }
 0x61c   : > { %v2107_v53 = vpack.c.bf16 %v2099_v11, %v2097_v61 }
 0x61e   : > { %4454 = vmatmul.mubr.msk.bf16.vlgmr.msra.gmra.mxu0 %vm1923_vm4, %v2107_v53 }
 0x61f   : > { %4466 = vmatpush3.bf16.msra.mxu0 %v4732_v43 }
 0x620   : > { %4467 = vmatprep.subr.bf16.mxu0 %v4733_v63 }
 0x623   : > { %4468 = vmatpush3.bf16.msra.mxu0 %v4733_v63 }
 0x624   : > { %4481 = vmatprep.subr.bf16.mxu0 %v4736_v55 }
 0x676   : > { %v2145_v57 = vpop.f32.mrf.mxu1 }
 0x678   : > { %v4413_v59 = vpop.f32.mrf.mxu1 }
 0x67a   : > { %v2148_v32 = vpop.f32.mrf.mxu1  ;;  %v2189_v33 = vpop.f32.mrf.mxu0 }
 0x67b   : > { %v2460_v62 = vpack.c.bf16 %v2148_v32, %v2145_v57 }
 0x67c   : > { %v4414_v21 = vpop.f32.mrf.mxu1  ;;  %v4419_v37 = vpop.f32.mrf.mxu0 }
 0x67d   : > { %4461 = vmatprep.mubr.msk.bf16.mxu1 %vm1546_vm1, %v2460_v62  ;;  %v4133_v21 = vld [vmem:[%s709_s25] ss:$0 sm:$0xff] }
 0x67e   : > { %v2192_v30 = vpop.f32.mrf.mxu0 }
 0x67f   : > { %v2461_v2 = vpack.c.bf16 %v2192_v30, %v2189_v33 }
 0x680   : > { %v4420_v9 = vpop.f32.mrf.mxu0 }
 0x681   : > { %4462 = vmatmul.mubr.msk.bf16.vlgmr.msra.gmra.mxu1 %vm1546_vm1, %v2461_v2 }
 0x682   : > { %4474 = vmatpush3.bf16.msra.mxu1 %v4734_v17 }
 0x683   : > { %4475 = vmatprep.subr.bf16.mxu1 %v4735_v6 }
 0x686   : > { %4476 = vmatpush3.bf16.msra.mxu1 %v4735_v6 }
 0x691   : > { %v2233_v16 = vpop.f32.mrf.mxu1 }
 0x693   : > { %v4425_v19 = vpop.f32.mrf.mxu1 }
 0x695   : > { %v2236_v22 = vpop.f32.mrf.mxu1 }
 0x696   : > { %v2462_v56 = vpack.c.bf16 %v2236_v22, %v2233_v16 }
 0x697   : > { %v4426_v39 = vpop.f32.mrf.mxu1 }
 0x698   : > { %4469 = vmatprep.mubr.msk.bf16.mxu0 %vm1546_vm1, %v2462_v56  ;;  %v4962_v56 = vld [vmem:[#allocation2] sm:$0xff] }
 0x699   : > { %v2277_v23 = vpop.f32.mrf.mxu0 }
 0x69b   : > { %v4431_v45 = vpop.f32.mrf.mxu0 }
 0x69d   : > { %v2280_v26 = vpop.f32.mrf.mxu0 }
 0x69e   : > { %v2463_v27 = vpack.c.bf16 %v2280_v26, %v2277_v23  ;;  %v2321_v29 = vpop.f32.mrf.mxu1  ;;  %v4963_v26 = vld [vmem:[#allocation2 + $0x10] sm:$0xff] }
 0x69f   : > { %v4432_v31 = vpop.f32.mrf.mxu0 }
 0x6a0   : > { %4470 = vmatmul.mubr.msk.bf16.vlgmr.msra.gmra.mxu0 %vm1546_vm1, %v2463_v27  ;;  %v4437_v60 = vpop.f32.mrf.mxu1  ;;  %v4965_v31 = vld [vmem:[#allocation2 + $0x18] sm:$0xff] }
 0x6a1   : > { %4482 = vmatpush3.bf16.msra.mxu0 %v4736_v55 }
 0x6a2   : > { %4483 = vmatprep.subr.bf16.mxu0 %v4737_v28  ;;  %v2324_v34 = vpop.f32.mrf.mxu1  ;;  %v2365_v35 = vpop.f32.mrf.mxu0 }
 0x6a3   : > { %v2464_v36 = vpack.c.bf16 %v2324_v34, %v2321_v29  ;;  %v4738_v34 = vld [vmem:[%s5781_s15 + $0xe0] ss:$16 sps:$4 sm:$0xff]  }
 0x6a4   : > { %v4438_v1 = vpop.f32.mrf.mxu1  ;;  %v4443_v13 = vpop.f32.mrf.mxu0 }
 0x6a5   : > { %4484 = vmatpush3.bf16.msra.mxu0 %v4737_v28  ;;  %4477 = vmatprep.mubr.msk.bf16.mxu1 %vm1546_vm1, %v2464_v36  ;;  %v4964_v28 = vld [vmem:[#allocation2 + $0x8] sm:$0xff]  ;;  %v4743_v1 = vld [vmem:[%s5781_s15 + $0xec] ss:$16 sps:$4 sm:$0xff]  }
 0x6a6   : > { %v2368_v20 = vpop.f32.mrf.mxu0  ;;  %v2409_v15 = vpop.f32.mrf.mxu1  ;;  %v4741_v36 = vld [vmem:[%s5781_s15 + $0xe8] ss:$16 sps:$4 sm:$0xff]   ;;  %3114 = vmatprep.subr.bf16.mxu0 %v4743_v1 }
 0x6a7   : > { %v2465_v58 = vpack.c.bf16 %v2368_v20, %v2365_v35  ;;  %v4740_v35 = vld [vmem:[%s5781_s15 + $0xe4] ss:$16 sps:$4 sm:$0xff]  }
 0x6a8   : > { %v4444_v5 = vpop.f32.mrf.mxu0  ;;  %v4449_v0 = vpop.f32.mrf.mxu1  ;;  %3061 = vmatprep.subr.bf16.mxu1 %v4740_v35 }
 0x6a9   : > { %4478 = vmatmul.mubr.msk.bf16.vlgmr.msra.gmra.mxu1 %vm1546_vm1, %v2465_v58 }
 0x6aa   : > { %v2412_v41 = vpop.f32.mrf.mxu1  ;;  %3093 = vmatprep.mubr.bf16.mxu1 %v5322_v7  ;;  %3062 = vmatpush1.bf16.msra.mxu1 %v4738_v34 }
 0x6ab   : > { %v2466_v4 = vpack.c.bf16 %v2412_v41, %v2409_v15 }
 0x6ac   : > { %v4450_v46 = vpop.f32.mrf.mxu1 }
 0x6ad   : > { %4485 = vmatprep.mubr.msk.bf16.mxu0 %vm1546_vm1, %v2466_v4 }
 0x6de   : > { %v2453_v18 = vpop.f32.mrf.mxu0 }
 0x6e0   : > { %v4455_v51 = vpop.f32.mrf.mxu0 }
 0x6e2   : > { %v2456_v3 = vpop.f32.mrf.mxu0 }
 0x6e3   : > { %v2467_v44 = vpack.c.bf16 %v2456_v3, %v2453_v18 }
 0x6e4   : > { %v4456_v12 = vpop.f32.mrf.mxu0 }
 0x6e5   : > { %4486 = vmatmul.mubr.msk.bf16.vlgmr.msra.gmra.mxu0 %vm1546_vm1, %v2467_v44 }
 0x6e6   : > { %3146 = vmatprep.mubr.bf16.mxu0 %v5322_v7  ;;  %3115 = vmatpush1.bf16.msra.mxu0 %v4741_v36 }
 0x741   : > { %v4463_v8 = vpop.f32.mrf.mxu1 }
 0x743   : > { %v2536_v40 = vpop.f32.mrf.mxu1 }
 0x745   : > { %v4464_v14 = vpop.f32.mrf.mxu1 }
 0x747   : > { %v2539_v10 = vpop.f32.mrf.mxu1 }
 0x760   : > { %v4471_v49 = vpop.f32.mrf.mxu0 }
 0x761   : > { %v2758_v61 = vadd.f32 %v4471_v49, %v4463_v8  ;;  %v4749_v49 = vld [vmem:[%s5781_s15 + $0xcc] ss:$16 sps:$4 sm:$0xff]  }
 0x762   : > { %v2603_v42 = vpop.f32.mrf.mxu0  ;;  %3116 = vmatprep.subr.bf16.mxu0 %v4749_v49 }
 0x763   : > { %v2752_v11 = vadd.f32 %v2603_v42, %v2536_v40  ;;  %v4747_v42 = vld [vmem:[%s5781_s15 + $0xc8] ss:$16 sps:$4 sm:$0xff]  }
 0x764   : > { %v4472_v24 = vpop.f32.mrf.mxu0  ;;  %3117 = vmatpush1.bf16.msra.mxu0 %v4747_v42 }
 0x765   : > { %v2761_v59 = vadd.f32 %v4472_v24, %v4464_v14  ;;  %v4746_v14 = vld [vmem:[%s5781_s15 + $0xc4] ss:$16 sps:$4 sm:$0xff]   ;;  %v4755_v24 = vld [vmem:[%s5781_s15 + $0xac] ss:$16 sps:$4 sm:$0xff]  }
 0x766   : > { %v2606_v25 = vpop.f32.mrf.mxu0  ;;  %3063 = vmatprep.subr.bf16.mxu1 %v4746_v14  ;;  %3118 = vmatprep.subr.bf16.mxu0 %v4755_v24 }
 0x767   : > { %v2755_v32 = vadd.f32 %v2606_v25, %v2539_v10  ;;  %v4744_v10 = vld [vmem:[%s5781_s15 + $0xc0] ss:$16 sps:$4 sm:$0xff]   ;;  %v4753_v25 = vld [vmem:[%s5781_s15 + $0xa8] ss:$16 sps:$4 sm:$0xff]  }
 0x768   : > { %3064 = vmatpush1.bf16.msra.mxu1 %v4744_v10  ;;  %3119 = vmatpush1.bf16.msra.mxu0 %v4753_v25  ;;  %v4788_v25 = vld [vmem:[%s5783_s27 + $0x38] sm:$0xff]  }
 0x769   : > { %v4479_v52 = vpop.f32.mrf.mxu1 }
 0x76a   : > { %v2759_v63 = vadd.f32 %v4479_v52, %v2758_v61  ;;  %v4752_v52 = vld [vmem:[%s5781_s15 + $0xa4] ss:$16 sps:$4 sm:$0xff]   ;;  %v4761_v61 = vld [vmem:[%s5781_s15 + $0x8c] ss:$16 sps:$4 sm:$0xff]  }
 0x76b   : > { %v2670_v43 = vpop.f32.mrf.mxu1  ;;  %3065 = vmatprep.subr.bf16.mxu1 %v4752_v52  ;;  %3120 = vmatprep.subr.bf16.mxu0 %v4761_v61  ;;  %v4791_v61 = vld [vmem:[%s5783_s27 + $0xf0] sm:$0xff]  }
 0x76c   : > { %v2753_v17 = vadd.f32 %v2752_v11, %v2670_v43  ;;  %v4750_v43 = vld [vmem:[%s5781_s15 + $0xa0] ss:$16 sps:$4 sm:$0xff]  }
 0x76d   : > { %v4480_v38 = vpop.f32.mrf.mxu1  ;;  %3066 = vmatpush1.bf16.msra.mxu1 %v4750_v43  ;;  %v4756_v11 = vld [vmem:[%s5781_s15 + $0x80] ss:$16 sps:$4 sm:$0xff]   ;;  %v4787_v43 = vld [vmem:[%s5783_s27 + $0xf8] sm:$0xff]  }
 0x76e   : > { %v2762_v30 = vadd.f32 %v4480_v38, %v2761_v59  ;;  %v4758_v38 = vld [vmem:[%s5781_s15 + $0x84] ss:$16 sps:$4 sm:$0xff]  }
 0x76f   : > { %v2673_v55 = vpop.f32.mrf.mxu1  ;;  %3067 = vmatprep.subr.bf16.mxu1 %v4758_v38  ;;  %v4770_v59 = vld [vmem:[%s5781_s15 + $0x44] ss:$16 sps:$4 sm:$0xff]   ;;  %v4789_v38 = vld [vmem:[%s5783_s27 + $0xb8] sm:$0xff]  }
 0x770   : > { %v2756_v2 = vadd.f32 %v2755_v32, %v2673_v55  ;;  %v4765_v55 = vld [vmem:[%s5781_s15 + $0x68] ss:$16 sps:$4 sm:$0xff]   ;;  %v4773_v32 = vld [vmem:[%s5781_s15 + $0x4c] ss:$16 sps:$4 sm:$0xff]  }
 0x771   : > { %3068 = vmatpush1.bf16.msra.mxu1 %v4756_v11  ;;  %v4792_v11 = vld [vmem:[%s5783_s27 + $0x30] sm:$0xff]  }
 0x7a5   : > { %v4487_v53 = vpop.f32.mrf.mxu0 }
 0x7a6   : > { %v2760_v33 = vadd.f32 %v4487_v53, %v2759_v63  ;;  %v4759_v53 = vld [vmem:[%s5781_s15 + $0x88] ss:$16 sps:$4 sm:$0xff]   ;;  %v4764_v63 = vld [vmem:[%s5781_s15 + $0x64] ss:$16 sps:$4 sm:$0xff]  }
 0x7a7   : > { %v2737_v57 = vpop.f32.mrf.mxu0  ;;  %3121 = vmatpush1.bf16.msra.mxu0 %v4759_v53  ;;  %3069 = vmatprep.subr.bf16.mxu1 %v4764_v63  ;;  %v4793_v53 = vld [vmem:[%s5783_s27 + $0xb0] sm:$0xff]   ;;  %v4794_v63 = vld [vmem:[%s5783_s27 + $0x68] sm:$0xff]  }
 0x7a8   : > { %v2754_v62 = vadd.f32 %v2753_v17, %v2737_v57  ;;  %v2773_v16 = vadd.f32 %v4133_v21, %v2760_v33  ;;  %v4762_v17 = vld [vmem:[%s5781_s15 + $0x60] ss:$16 sps:$4 sm:$0xff]   ;;  %v4767_v57 = vld [vmem:[%s5781_s15 + $0x6c] ss:$16 sps:$4 sm:$0xff]  }
 0x7a9   : > { %v4488_v37 = vpop.f32.mrf.mxu0  ;;  %3122 = vmatprep.subr.bf16.mxu0 %v4767_v57  ;;  %3070 = vmatpush1.bf16.msra.mxu1 %v4762_v17  ;;  %v4768_v33 = vld [vmem:[%s5781_s15 + $0x40] ss:$16 sps:$4 sm:$0xff]   ;;  %v4795_v17 = vld [vmem:[%s5783_s27 + $0xe8] sm:$0xff]  }
 0x7aa   : > { %v2771_v6 = vadd.f32 %v4133_v21, %v2754_v62  ;;  %v2763_v19 = vadd.f32 %v4488_v37, %v2762_v30  ;;  %v6246_v27 = vadd.f32 %v4963_v26, %v2773_v16  ;;  %v4771_v62 = vld [vmem:[%s5781_s15 + $0x48] ss:$16 sps:$4 sm:$0xff]   ;;  %3071 = vmatprep.subr.bf16.mxu1 %v4770_v59  ;;  %v4779_v37 = vld [vmem:[%s5781_s15 + $0x2c] ss:$16 sps:$4 sm:$0xff]   ;;  %v4774_v30 = vld [vmem:[%s5781_s15 + $0x20] ss:$16 sps:$4 sm:$0xff]  }
 0x7ab   : > { %v2740_v9 = vpop.f32.mrf.mxu0  ;;  %3123 = vmatpush1.bf16.msra.mxu0 %v4765_v55  ;;  %v4780_v16 = vld [vmem:[%s5781_s15] ss:$16 sps:$4 sm:$0xff]   ;;  %v4796_v55 = vld [vmem:[%s5783_s27 + $0x28] sm:$0xff]  }
 0x7ac   : > { %v2757_v22 = vadd.f32 %v2756_v2, %v2740_v9  ;;  %v6243_v39 = vadd.f32 %v4962_v56, %v2771_v6  ;;  %v2774_v45 = vadd.f32 %v4133_v21, %v2763_v19  ;;  %3124 = vmatprep.subr.bf16.mxu0 %v4773_v32  ;;  %v4777_v2 = vld [vmem:[%s5781_s15 + $0x28] ss:$16 sps:$4 sm:$0xff]   ;;  %v4782_v6 = vld [vmem:[%s5781_s15 + $0x4] ss:$16 sps:$4 sm:$0xff]   ;;  %v4785_v9 = vld [vmem:[%s5781_s15 + $0xc] ss:$16 sps:$4 sm:$0xff]  }
 0x7ad   : > { %3072 = vmatpush1.bf16.msra.mxu1 %v4768_v33  ;;  %v4783_v19 = vld [vmem:[%s5781_s15 + $0x8] ss:$16 sps:$4 sm:$0xff]   ;;  %v4798_v59 = vld [vmem:[%s5783_s27 + $0x60] sm:$0xff]  }
 0x7ae   : > { %v2772_v23 = vadd.f32 %v4133_v21, %v2757_v22  ;;  %2781 = vadd.xlane.f32.xlu0 %v6243_v39  ;;  %v6252_v60 = vadd.f32 %v4965_v31, %v2774_v45  ;;  %v4776_v21 = vld [vmem:[%s5781_s15 + $0x24] ss:$16 sps:$4 sm:$0xff]   ;;  %v4797_v57 = vld [vmem:[%s5783_s27 + $0xa8] sm:$0xff]  }
 0x7af   : > { %3125 = vmatpush1.bf16.msra.mxu0 %v4771_v62  ;;  %3073 = vmatprep.subr.bf16.mxu1 %v4776_v21  ;;  %v4799_v32 = vld [vmem:[%s5783_s27 + $0xe0] sm:$0xff]   ;;  %v4802_v21 = vld [vmem:[%s5783_s27 + $0x58] sm:$0xff]  }
 0x7b0   : > { %v6248_v29 = vadd.f32 %v4964_v28, %v2772_v23  ;;  %3126 = vmatprep.subr.bf16.mxu0 %v4779_v37  ;;  %v4800_v33 = vld [vmem:[%s5783_s27 + $0x20] sm:$0xff]   ;;  %v4803_v37 = vld [vmem:[%s5783_s27 + $0xd8] sm:$0xff]  }
 0x7b1   : > { %3074 = vmatpush1.bf16.msra.mxu1 %v4774_v30  ;;  %v4801_v62 = vld [vmem:[%s5783_s27 + $0xa0] sm:$0xff]   ;;  %v4804_v30 = vld [vmem:[%s5783_s27 + $0x18] sm:$0xff]  }
 0x7b2   : > { %2785 = vadd.xlane.f32.xlu0 %v6246_v27  ;;  %2783 = vadd.xlane.f32.xlu1 %v6248_v29 }
 0x7b3   : > { %3127 = vmatpush1.bf16.msra.mxu0 %v4777_v2  ;;  %3075 = vmatprep.subr.bf16.mxu1 %v4782_v6  ;;  %v4805_v2 = vld [vmem:[%s5783_s27 + $0x98] sm:$0xff]   ;;  %v4806_v6 = vld [vmem:[%s5783_s27 + $0x50] sm:$0xff]  }
 0x7b4   : > { %3128 = vmatprep.subr.bf16.mxu0 %v4785_v9  ;;  %v4807_v9 = vld [vmem:[%s5783_s27 + $0xd0] sm:$0xff]  }
 0x7b5   : > { %3076 = vmatpush1.bf16.msra.mxu1 %v4780_v16  ;;  %v4808_v16 = vld [vmem:[%s5783_s27 + $0x10] sm:$0xff]  }
 0x7b6   : > { %2787 = vadd.xlane.f32.xlu0 %v6252_v60 }
 0x7b7   : > { %3129 = vmatpush1.bf16.msra.mxu0 %v4783_v19  ;;  %v4809_v19 = vld [vmem:[%s5783_s27 + $0x90] sm:$0xff]  }
 0x7b8   : > { %4313 = vmatprep.subr.bf16.mxu0 %v4787_v43 }
 0x837   : > { %v2782_v13 = vpop.xlane.xlu0 %2781 }
 0x838   : > { %v2789_v20 = vmul.f32 0.0078125, %v2782_v13 }
 0x83a   : > { %v6260_v15 = vsub.f32 %v6243_v39, %v2789_v20 }
 0x83b   : > { %v2786_v58 = vpop.xlane.xlu0 %2785  ;;  %v2784_v5 = vpop.xlane.xlu1 %2783 }
 0x83c   : > { %v2791_v0 = vmul.f32 0.0078125, %v2786_v58  ;;  %v2790_v41 = vmul.f32 0.0078125, %v2784_v5  ;;  %v2797_v4 = vmul.f32 %v6260_v15, %v6260_v15  ;;  %v4134_v5 = vld [vmem:[%s717_s20] ss:$0 sm:$0xff]  ;;  %s6560_s20 = sld [smem:[#allocation38_spill]] (!%p4217_p1) }
 0x83e   : > { %v6265_v46 = vsub.f32 %v6246_v27, %v2791_v0  ;;  %v6268_v18 = vsub.f32 %v6248_v29, %v2790_v41  ;;  %2801 = vadd.xlane.f32.xlu0 %v2797_v4 }
 0x83f   : > { %v2788_v51 = vpop.xlane.xlu0 %2787 }
 0x840   : > { %v2792_v3 = vmul.f32 0.0078125, %v2788_v51  ;;  %v2799_v44 = vmul.f32 %v6265_v46, %v6265_v46  ;;  %v2798_v12 = vmul.f32 %v6268_v18, %v6268_v18 }
 0x842   : > { %v6275_v8 = vsub.f32 %v6252_v60, %v2792_v3  ;;  %2805 = vadd.xlane.f32.xlu0 %v2799_v44  ;;  %2803 = vadd.xlane.f32.xlu1 %v2798_v12  ;;  %v4135_v3 = vld [vmem:[%s832_s24] ss:$0 sm:$0xff] }
 0x844   : > { %v2800_v40 = vmul.f32 %v6275_v8, %v6275_v8 }
 0x846   : > { %2807 = vadd.xlane.f32.xlu1 %v2800_v40 }
 0x8c7   : > { %v2802_v22 = vpop.xlane.xlu0 %2801 }
 0x8c8   : > { %v2809_v56 = vmul.f32 0.0078125, %v2802_v22  ;;  %v4810_v22 = vld [vmem:[%s5783_s27 + $0x48] sm:$0xff]  }
 0x8ca   : > { %v2813_v23 = vadd.f32 1e-05, %v2809_v56  ;;  %v4811_v56 = vld [vmem:[%s5783_s27 + $0xc8] sm:$0xff]  }
 0x8cb   : > { %v2806_v45 = vpop.xlane.xlu0 %2805  ;;  %v2804_v26 = vpop.xlane.xlu1 %2803 }
 0x8cc   : > { %4890 = vrsqrt.f32 %v2813_v23  ;;  %v2811_v28 = vmul.f32 0.0078125, %v2806_v45  ;;  %v2810_v31 = vmul.f32 0.0078125, %v2804_v26  ;;  %v4812_v23 = vld [vmem:[%s5783_s27 + $0x8] sm:$0xff]   ;;  %v4814_v26 = vld [vmem:[%s5783_s27 + $0x40] sm:$0xff]  }
 0x8cd   : > { %v4813_v45 = vld [vmem:[%s5783_s27 + $0x88] sm:$0xff]  }
 0x8ce   : > { %v2814_v34 = vadd.f32 1e-05, %v2810_v31  ;;  %v2815_v35 = vadd.f32 1e-05, %v2811_v28  ;;  %v4815_v28 = vld [vmem:[%s5783_s27 + $0xc0] sm:$0xff]  }
 0x8cf   : > { %v2808_v36 = vpop.xlane.xlu1 %2807  ;;  %v4816_v31 = vld [vmem:[%s5783_s27] sm:$0xff]  }
 0x8d0   : > { %v2812_v1 = vmul.f32 0.0078125, %v2808_v36  ;;  %4892 = vrsqrt.f32 %v2814_v34  ;;  %v4817_v34 = vld [vmem:[%s5783_s27 + $0x80] sm:$0xff]   ;;  %v2895_v36 = vsub.s32 3, %v5910_v47 }
 0x8d1   : > { %4894 = vrsqrt.f32 %v2815_v35  ;;  %v2879_v35 = vld [vmem:[%s5769_s12] sm:$0xf] }
 0x8d2   : > { %v2816_v13 = vadd.f32 1e-05, %v2812_v1  ;;  %v2884_v1 = vrot.slane %v2879_v35, %v1146_v48 }
 0x8d4   : > { %4896 = vrsqrt.f32 %v2816_v13  ;;  %v2892_v13 = vrot.slane %v2879_v35, %v1154_v54 }
 0x8d9   : > { %v4891_v20 = vpop.eup %4890 }
 0x8da   : > { %v2821_v58 = vmul.f32 %v4891_v20, %v6260_v15  ;;  %v6360_v20 = vrot.slane %v2879_v35, %v1150_v50 }
 0x8dc   : > { %v2831_v4 = vmul.f32 %v4134_v5, %v2821_v58  ;;  %v6362_v58 = vrot.slane %v2879_v35, %v2895_v36 }
 0x8dd   : > { %v4893_v0 = vpop.eup %4892 }
 0x8de   : > { %v2822_v41 = vmul.f32 %v4893_v0, %v6268_v18  ;;  %v4895_v51 = vpop.eup %4894  ;;  %v2841_v14 = vadd.f32 %v4135_v3, %v2831_v4 }
 0x8df   : > { %v2823_v49 = vmul.f32 %v4895_v51, %v6265_v46  ;;  %v4786_v46 = vld [vmem:[%s5783_s27 + $0x78] sm:$0xff]  }
 0x8e0   : > { %v2832_v12 = vmul.f32 %v4134_v5, %v2822_v41  ;;  %4285 = vmatprep.subr.bf16.mxu1 %v4786_v46 }
 0x8e1   : > { %v4897_v44 = vpop.eup %4896  ;;  %v2833_v42 = vmul.f32 %v4134_v5, %v2823_v49 }
 0x8e2   : > { %v2824_v40 = vmul.f32 %v4897_v44, %v6275_v8  ;;  %v2842_v15 = vadd.f32 %v4135_v3, %v2832_v12 }
 0x8e3   : > { %v2843_v52 = vadd.f32 %v4135_v3, %v2833_v42 }
 0x8e4   : > { %v2845_v18 = vpack.c.bf16 %v2842_v15, %v2841_v14  ;;  %v2834_v10 = vmul.f32 %v4134_v5, %v2824_v40 }
 0x8e6   : > { %3094 = vmatmul.mubr.bf16.vlgmr.msra.gmra.mxu1 %v2845_v18  ;;  %3147 = vmatmul.mubr.bf16.vlgmr.msra.gmra.mxu0 %v2845_v18  ;;  %v2844_v8 = vadd.f32 %v4135_v3, %v2834_v10 }
 0x8e7   : > { %3103 = vmatprep.mubr.bf16.mxu1 %v5322_v7  ;;  %3156 = vmatprep.mubr.bf16.mxu0 %v5322_v7  ;;  %v4790_v7 = vld [vmem:[%s5783_s27 + $0x70] sm:$0xff]  }
 0x8e8   : > { %v2846_v24 = vpack.c.bf16 %v2844_v8, %v2843_v52  ;;  %4286 = vmatpush3.bf16.msra.mxu1 %v4788_v25  ;;  %4314 = vmatpush3.bf16.msra.mxu0 %v4789_v38 }
 0x8e9   : > { %4287 = vmatprep.subr.bf16.mxu1 %v4790_v7  ;;  %4315 = vmatprep.subr.bf16.mxu0 %v4791_v61 }
 0x8ec   : > { %4288 = vmatpush3.bf16.msra.mxu1 %v4792_v11  ;;  %4316 = vmatpush3.bf16.msra.mxu0 %v4793_v53 }
 0x8ed   : > { %4289 = vmatprep.subr.bf16.mxu1 %v4794_v63  ;;  %4317 = vmatprep.subr.bf16.mxu0 %v4795_v17 }
 0x8ee   : > { %3104 = vmatmul.mubr.bf16.gmra.mxu1 %v2846_v24  ;;  %3157 = vmatmul.mubr.bf16.gmra.mxu0 %v2846_v24 }
 0x8f0   : > { %4290 = vmatpush3.bf16.msra.mxu1 %v4796_v55  ;;  %4318 = vmatpush3.bf16.msra.mxu0 %v4797_v57 }
 0x8f1   : > { %4291 = vmatprep.subr.bf16.mxu1 %v4798_v59  ;;  %4319 = vmatprep.subr.bf16.mxu0 %v4799_v32 }
 0x8f4   : > { %4292 = vmatpush3.bf16.msra.mxu1 %v4800_v33  ;;  %4320 = vmatpush3.bf16.msra.mxu0 %v4801_v62 }
 0x8f5   : > { %4293 = vmatprep.subr.bf16.mxu1 %v4802_v21  ;;  %4321 = vmatprep.subr.bf16.mxu0 %v4803_v37 }
 0x8f8   : > { %4294 = vmatpush3.bf16.msra.mxu1 %v4804_v30  ;;  %4322 = vmatpush3.bf16.msra.mxu0 %v4805_v2 }
 0x8f9   : > { %4295 = vmatprep.subr.bf16.mxu1 %v4806_v6  ;;  %4323 = vmatprep.subr.bf16.mxu0 %v4807_v9 }
 0x8fc   : > { %4296 = vmatpush3.bf16.msra.mxu1 %v4808_v16  ;;  %4324 = vmatpush3.bf16.msra.mxu0 %v4809_v19 }
 0x8fd   : > { %4297 = vmatprep.subr.bf16.mxu1 %v4810_v22  ;;  %4325 = vmatprep.subr.bf16.mxu0 %v4811_v56 }
 0x900   : > { %4298 = vmatpush3.bf16.msra.mxu1 %v4812_v23  ;;  %4326 = vmatpush3.bf16.msra.mxu0 %v4813_v45 }
 0x901   : > { %4299 = vmatprep.subr.bf16.mxu1 %v4814_v26  ;;  %4327 = vmatprep.subr.bf16.mxu0 %v4815_v28 }
 0x904   : > { %4300 = vmatpush3.bf16.msra.mxu1 %v4816_v31  ;;  %4328 = vmatpush3.bf16.msra.mxu0 %v4817_v34 }
 0x9a6   : > { %v3095_v5 = vpop.f32.mrf.mxu1  ;;  %v3148_v0 = vpop.f32.mrf.mxu0 }
 0x9a7   : > { %v6364_v41 = vadd.f32 %v3095_v5, %v2884_v1  ;;  %v6366_v4 = vadd.f32 %v3148_v0, %v2892_v13 }
 0x9a8   : > { %v3097_v51 = vpop.f32.mrf.mxu1  ;;  %v3150_v3 = vpop.f32.mrf.mxu0 }
 0x9a9   : > { %v4168_v44 = vmul.f32 -1.702, %v6364_v41  ;;  %v4170_v48 = vmul.f32 -1.702, %v6366_v4  ;;  %v6371_v54 = vadd.f32 %v3097_v51, %v6360_v20  ;;  %v6374_v47 = vadd.f32 %v3150_v3, %v6362_v58 }
 0x9aa   : > { %v3099_v50 = vpop.f32.mrf.mxu1  ;;  %v3152_v12 = vpop.f32.mrf.mxu0 }
 0x9ab   : > { %v3199_v40 = vmul.f32 1.442695, %v4168_v44  ;;  %v3203_v14 = vmul.f32 1.442695, %v4170_v48  ;;  %v4169_v15 = vmul.f32 -1.702, %v6371_v54  ;;  %v6377_v49 = vadd.f32 %v3099_v50, %v2884_v1 }
 0x9ac   : > { %v4171_v18 = vmul.f32 -1.702, %v6374_v47  ;;  %v6380_v10 = vadd.f32 %v3152_v12, %v2892_v13  ;;  %v3101_v42 = vpop.f32.mrf.mxu1  ;;  %v3154_v8 = vpop.f32.mrf.mxu0 }
 0x9ad   : > { %4898 = vpow2.f32 %v3199_v40  ;;  %v3201_v52 = vmul.f32 1.442695, %v4169_v15  ;;  %v4172_v24 = vmul.f32 -1.702, %v6377_v49  ;;  %v6384_v46 = vadd.f32 %v3101_v42, %v6360_v20 }
 0x9ae   : > { %4900 = vpow2.f32 %v3203_v14  ;;  %v3205_v43 = vmul.f32 1.442695, %v4171_v18  ;;  %v4174_v25 = vmul.f32 -1.702, %v6380_v10  ;;  %v6388_v38 = vadd.f32 %v3154_v8, %v6362_v58  ;;  %v3105_v7 = vpop.f32.mrf.mxu1  ;;  %v3158_v61 = vpop.f32.mrf.mxu0 }
 0x9af   : > { %4902 = vpow2.f32 %v3201_v52  ;;  %v3207_v11 = vmul.f32 1.442695, %v4172_v24  ;;  %v4173_v53 = vmul.f32 -1.702, %v6384_v46  ;;  %v6391_v63 = vadd.f32 %v3105_v7, %v2884_v1 }
 0x9b0   : > { %4904 = vpow2.f32 %v3205_v43  ;;  %v3211_v17 = vmul.f32 1.442695, %v4174_v25  ;;  %v4175_v55 = vmul.f32 -1.702, %v6388_v38  ;;  %v6394_v57 = vadd.f32 %v3158_v61, %v2892_v13  ;;  %v3107_v59 = vpop.f32.mrf.mxu1  ;;  %v3160_v32 = vpop.f32.mrf.mxu0 }
 0x9b1   : > { %4906 = vpow2.f32 %v3207_v11  ;;  %v3209_v33 = vmul.f32 1.442695, %v4173_v53  ;;  %v4176_v62 = vmul.f32 -1.702, %v6391_v63  ;;  %v6398_v21 = vadd.f32 %v3107_v59, %v6360_v20 }
 0x9b2   : > { %4908 = vpow2.f32 %v3211_v17  ;;  %v3213_v37 = vmul.f32 1.442695, %v4175_v55  ;;  %v4178_v30 = vmul.f32 -1.702, %v6394_v57  ;;  %v6402_v2 = vadd.f32 %v3160_v32, %v6362_v58  ;;  %v3109_v6 = vpop.f32.mrf.mxu1  ;;  %v3162_v9 = vpop.f32.mrf.mxu0 }
 0x9b3   : > { %4910 = vpow2.f32 %v3209_v33  ;;  %v3215_v16 = vmul.f32 1.442695, %v4176_v62  ;;  %v4177_v19 = vmul.f32 -1.702, %v6398_v21  ;;  %v6405_v22 = vadd.f32 %v3109_v6, %v2884_v1 }
 0x9b4   : > { %4912 = vpow2.f32 %v3213_v37  ;;  %v3219_v56 = vmul.f32 1.442695, %v4178_v30  ;;  %v4179_v23 = vmul.f32 -1.702, %v6402_v2  ;;  %v6408_v45 = vadd.f32 %v3162_v9, %v2892_v13  ;;  %v3111_v26 = vpop.f32.mrf.mxu1  ;;  %v3164_v28 = vpop.f32.mrf.mxu0 }
 0x9b5   : > { %4914 = vpow2.f32 %v3215_v16  ;;  %v3217_v31 = vmul.f32 1.442695, %v4177_v19  ;;  %v4180_v34 = vmul.f32 -1.702, %v6405_v22  ;;  %v6412_v35 = vadd.f32 %v3111_v26, %v6360_v20 }
 0x9b6   : > { %4916 = vpow2.f32 %v3219_v56  ;;  %v3221_v36 = vmul.f32 1.442695, %v4179_v23  ;;  %v4182_v1 = vmul.f32 -1.702, %v6408_v45  ;;  %v6416_v5 = vadd.f32 %v3164_v28, %v6362_v58 }
 0x9b7   : > { %4918 = vpow2.f32 %v3217_v31  ;;  %v3223_v0 = vmul.f32 1.442695, %v4180_v34  ;;  %v4181_v13 = vmul.f32 -1.702, %v6412_v35 }
 0x9b8   : > { %4920 = vpow2.f32 %v3221_v36  ;;  %v3227_v51 = vmul.f32 1.442695, %v4182_v1  ;;  %v4183_v3 = vmul.f32 -1.702, %v6416_v5 }
 0x9b9   : > { %4922 = vpow2.f32 %v3223_v0  ;;  %v3225_v44 = vmul.f32 1.442695, %v4181_v13 }
 0x9ba   : > { %v4899_v48 = vpop.eup %4898  ;;  %4924 = vpow2.f32 %v3227_v51  ;;  %v3229_v20 = vmul.f32 1.442695, %v4183_v3 }
 0x9bb   : > { %v4901_v50 = vpop.eup %4900  ;;  %v3231_v12 = vadd.f32 1.0, %v4899_v48  ;;  %4926 = vpow2.f32 %v3225_v44 }
 0x9bc   : > { %v4903_v40 = vpop.eup %4902  ;;  %v3233_v14 = vadd.f32 1.0, %v4901_v50  ;;  %4928 = vpow2.f32 %v3229_v20 }
 0x9bd   : > { %v4905_v58 = vpop.eup %4904  ;;  %4930 = vrcp.f32 %v3231_v12  ;;  %v3232_v15 = vadd.f32 1.0, %v4903_v40 }
 0x9be   : > { %v4907_v18 = vpop.eup %4906  ;;  %4932 = vrcp.f32 %v3233_v14  ;;  %v3234_v42 = vadd.f32 1.0, %v4905_v58 }
 0x9bf   : > { %v4909_v8 = vpop.eup %4908  ;;  %4934 = vrcp.f32 %v3232_v15  ;;  %v3235_v52 = vadd.f32 1.0, %v4907_v18 }
 0x9c0   : > { %v4911_v24 = vpop.eup %4910  ;;  %4936 = vrcp.f32 %v3234_v42  ;;  %v3237_v43 = vadd.f32 1.0, %v4909_v8 }
 0x9c1   : > { %v4913_v25 = vpop.eup %4912  ;;  %4938 = vrcp.f32 %v3235_v52  ;;  %v3236_v7 = vadd.f32 1.0, %v4911_v24 }
 0x9c2   : > { %v4915_v61 = vpop.eup %4914  ;;  %4940 = vrcp.f32 %v3237_v43  ;;  %v3238_v11 = vadd.f32 1.0, %v4913_v25 }
 0x9c3   : > { %v4917_v53 = vpop.eup %4916  ;;  %4942 = vrcp.f32 %v3236_v7  ;;  %v3239_v17 = vadd.f32 1.0, %v4915_v61 }
 0x9c4   : > { %v4919_v55 = vpop.eup %4918  ;;  %4944 = vrcp.f32 %v3238_v11  ;;  %v3241_v59 = vadd.f32 1.0, %v4917_v53 }
 0x9c5   : > { %v4921_v32 = vpop.eup %4920  ;;  %4946 = vrcp.f32 %v3239_v17  ;;  %v3240_v33 = vadd.f32 1.0, %v4919_v55 }
 0x9c6   : > { %v4923_v62 = vpop.eup %4922  ;;  %4948 = vrcp.f32 %v3241_v59  ;;  %v3242_v37 = vadd.f32 1.0, %v4921_v32 }
 0x9c7   : > { %v4925_v30 = vpop.eup %4924  ;;  %4950 = vrcp.f32 %v3240_v33  ;;  %v3243_v6 = vadd.f32 1.0, %v4923_v62 }
 0x9c8   : > { %v4927_v9 = vpop.eup %4926  ;;  %4952 = vrcp.f32 %v3242_v37  ;;  %v3245_v16 = vadd.f32 1.0, %v4925_v30 }
 0x9c9   : > { %v4929_v19 = vpop.eup %4928  ;;  %4954 = vrcp.f32 %v3243_v6  ;;  %v3244_v56 = vadd.f32 1.0, %v4927_v9 }
 0x9ca   : > { %v4931_v23 = vpop.eup %4930  ;;  %4956 = vrcp.f32 %v3245_v16  ;;  %v3246_v26 = vadd.f32 1.0, %v4929_v19 }
 0x9cb   : > { %v4933_v28 = vpop.eup %4932  ;;  %4958 = vrcp.f32 %v3244_v56  ;;  %v3279_v50 = vmul.f32 %v4931_v23, %v6364_v41 }
 0x9cc   : > { %v4935_v31 = vpop.eup %4934  ;;  %4960 = vrcp.f32 %v3246_v26  ;;  %v3281_v58 = vmul.f32 %v4933_v28, %v6366_v4 }
 0x9cd   : > { %v4937_v34 = vpop.eup %4936  ;;  %v3280_v3 = vmul.f32 %v4935_v31, %v6371_v54 }
 0x9ce   : > { %v4939_v36 = vpop.eup %4938  ;;  %v3282_v12 = vmul.f32 %v4937_v34, %v6374_v47 }
 0x9cf   : > { %v4941_v1 = vpop.eup %4940  ;;  %v3283_v13 = vmul.f32 %v4939_v36, %v6377_v49 }
 0x9d0   : > { %v4943_v0 = vpop.eup %4942  ;;  %v3285_v44 = vmul.f32 %v4941_v1, %v6380_v10 }
 0x9d1   : > { %v4945_v51 = vpop.eup %4944  ;;  %v3284_v48 = vmul.f32 %v4943_v0, %v6384_v46  ;;  %v3295_v49 = vpack.c.bf16 %v3283_v13, %v3279_v50 }
 0x9d2   : > { %v4947_v20 = vpop.eup %4946  ;;  %v3286_v40 = vmul.f32 %v4945_v51, %v6388_v38  ;;  %v3297_v54 = vpack.c.bf16 %v3285_v44, %v3281_v58 }
 0x9d3   : > { %v4949_v14 = vpop.eup %4948  ;;  %v3296_v15 = vpack.c.bf16 %v3284_v48, %v3280_v3  ;;  %v3287_v43 = vmul.f32 %v4947_v20, %v6391_v63  ;;  %v4184_v63 = vld [vmem:[%s839_s23] ss:$0 sm:$0xff] }
 0x9d4   : > { %v4951_v18 = vpop.eup %4950  ;;  %v3298_v42 = vpack.c.bf16 %v3286_v40, %v3282_v12  ;;  %v3289_v61 = vmul.f32 %v4949_v14, %v6394_v57 }
 0x9d5   : > { %v4953_v8 = vpop.eup %4952  ;;  %3598 = vmatprep.mubr.bf16.mxu1 %v3296_v15  ;;  %v3288_v38 = vmul.f32 %v4951_v18, %v6398_v21 }
 0x9d6   : > { %v4955_v10 = vpop.eup %4954  ;;  %3647 = vmatprep.mubr.bf16.mxu0 %v3298_v42  ;;  %3599 = vmatmul.mubr.bf16.vlgmr.msra.gmra.mxu1 %v3295_v49  ;;  %v3290_v25 = vmul.f32 %v4953_v8, %v6402_v2 }
 0x9d7   : > { %v4957_v46 = vpop.eup %4956  ;;  %3648 = vmatmul.mubr.bf16.vlgmr.msra.gmra.mxu0 %v3297_v54  ;;  %v3291_v47 = vmul.f32 %v4955_v10, %v6405_v22 }
 0x9d8   : > { %v4959_v41 = vpop.eup %4958  ;;  %v3293_v4 = vmul.f32 %v4957_v46, %v6408_v45 }
 0x9d9   : > { %v4961_v52 = vpop.eup %4960  ;;  %v3292_v24 = vmul.f32 %v4959_v41, %v6412_v35  ;;  %v3299_v17 = vpack.c.bf16 %v3291_v47, %v3287_v43 }
 0x9da   : > { %v3294_v7 = vmul.f32 %v4961_v52, %v6416_v5  ;;  %v3301_v22 = vpack.c.bf16 %v3293_v4, %v3289_v61 }
 0x9db   : > { %v3300_v11 = vpack.c.bf16 %v3292_v24, %v3288_v38 }
 0x9dc   : > { %v3302_v53 = vpack.c.bf16 %v3294_v7, %v3290_v25 }
 0x9dd   : > { %3606 = vmatprep.mubr.bf16.mxu1 %v3300_v11 }
 0x9de   : > { %3655 = vmatprep.mubr.bf16.mxu0 %v3302_v53  ;;  %3607 = vmatmul.mubr.bf16.gmra.mxu1 %v3299_v17 }
 0x9df   : > { %3656 = vmatmul.mubr.bf16.gmra.mxu0 %v3301_v22 }
 0xa96   : > { %v4301_v21 = vpop.f32.mrf.mxu1 }
 0xa97   : > { %v4329_v45 = vpop.f32.mrf.mxu0 }
 0xa98   : > { %v4302_v2 = vpop.f32.mrf.mxu1 }
 0xa99   : > { %v4303_v35 = vadd.f32 %v4302_v2, %v4301_v21  ;;  %v4330_v5 = vpop.f32.mrf.mxu0 }
 0xa9a   : > { %v4304_v55 = vpop.f32.mrf.mxu1  ;;  %v4331_v59 = vadd.f32 %v4330_v5, %v4329_v45 }
 0xa9b   : > { %v3601_v57 = vadd.f32 %v4303_v35, %v4184_v63  ;;  %v4332_v32 = vpop.f32.mrf.mxu0 }
 0xa9c   : > { %v4305_v33 = vpop.f32.mrf.mxu1 }
 0xa9d   : > { %v3650_v62 = vadd.f32 %v4331_v59, %v3601_v57  ;;  %v4306_v37 = vadd.f32 %v4305_v33, %v4304_v55  ;;  %v4333_v30 = vpop.f32.mrf.mxu0 }
 0xa9e   : > { %v4307_v6 = vpop.f32.mrf.mxu1  ;;  %v4334_v19 = vadd.f32 %v4333_v30, %v4332_v32 }
 0xa9f   : > { %v3664_v9 = vadd.f32 %v3650_v62, %v6243_v39  ;;  %v3604_v16 = vadd.f32 %v4306_v37, %v4184_v63  ;;  %v4335_v56 = vpop.f32.mrf.mxu0 }
 0xaa0   : > { %v4308_v23 = vpop.f32.mrf.mxu1 }
 0xaa1   : > { %3668 = vst [vmem:[#allocation2] sm:$0xff] %v3664_v9  ;;  %v3653_v26 = vadd.f32 %v4334_v19, %v3604_v16  ;;  %v4309_v28 = vadd.f32 %v4308_v23, %v4307_v6  ;;  %v4336_v31 = vpop.f32.mrf.mxu0 }
 0xaa2   : > { %v4310_v34 = vpop.f32.mrf.mxu1  ;;  %v4337_v0 = vadd.f32 %v4336_v31, %v4335_v56 }
 0xaa3   : > { %v3665_v36 = vadd.f32 %v3653_v26, %v6248_v29  ;;  %v3609_v1 = vadd.f32 %v4309_v28, %v4184_v63  ;;  %v4338_v13 = vpop.f32.mrf.mxu0 }
 0xaa4   : > { %v4311_v51 = vpop.f32.mrf.mxu1 }
 0xaa5   : > { %3669 = vst [vmem:[#allocation2 + $0x8] sm:$0xff] %v3665_v36  ;;  %v3658_v3 = vadd.f32 %v4337_v0, %v3609_v1  ;;  %v4312_v44 = vadd.f32 %v4311_v51, %v4310_v34  ;;  %v4339_v48 = vpop.f32.mrf.mxu0 }
 0xaa6   : > { %v4340_v50 = vadd.f32 %v4339_v48, %v4338_v13 }
 0xaa7   : > { %v3666_v39 = vadd.f32 %v3658_v3, %v6246_v27  ;;  %v3612_v20 = vadd.f32 %v4312_v44, %v4184_v63 }
 0xaa9   : > { %3670 = vst [vmem:[#allocation2 + $0x10] sm:$0xff] %v3666_v39  ;;  %v3661_v12 = vadd.f32 %v4340_v50, %v3612_v20  ;;  %3675 = sbr.rel (%p4217_p1) target bundleno = 3049 (0xbe9), region = 128 }
 0xaab   : > { %v3667_v40 = vadd.f32 %v3661_v12, %v6252_v60 }
 0xaad   : > { %3671 = vst [vmem:[#allocation2 + $0x18] sm:$0xff] %v3667_v40 }
 0xaae   : > { %3678 = vadd.xlane.f32.xlu0 %v3664_v9  ;;  %3682 = vadd.xlane.f32.xlu1 %v3666_v39  ;;  %v4218_v63 = vld [vmem:[%s6560_s20] ss:$0 sm:$0xff] }
 0xaaf   : > { %v4219_v35 = vld [vmem:[%s6561_s30] ss:$0 sm:$0xff] }
 0xab2   : > { %3680 = vadd.xlane.f32.xlu0 %v3665_v36  ;;  %3684 = vadd.xlane.f32.xlu1 %v3667_v40 }
 0xb37   : > { %v3679_v29 = vpop.xlane.xlu0 %3678  ;;  %v3683_v14 = vpop.xlane.xlu1 %3682 }
 0xb38   : > { %v3686_v58 = vmul.f32 0.0078125, %v3679_v29  ;;  %v3688_v15 = vmul.f32 0.0078125, %v3683_v14 }
 0xb3a   : > { %v3690_v18 = vsub.f32 %v3664_v9, %v3686_v58  ;;  %v3692_v27 = vsub.f32 %v3666_v39, %v3688_v15 }
 0xb3b   : > { %v3681_v49 = vpop.xlane.xlu0 %3680  ;;  %v3685_v42 = vpop.xlane.xlu1 %3684 }
 0xb3c   : > { %v3687_v8 = vmul.f32 0.0078125, %v3681_v49  ;;  %v3694_v54 = vmul.f32 %v3690_v18, %v3690_v18  ;;  %v3689_v10 = vmul.f32 0.0078125, %v3685_v42  ;;  %v3696_v41 = vmul.f32 %v3692_v27, %v3692_v27 }
 0xb3e   : > { %v3691_v60 = vsub.f32 %v3665_v36, %v3687_v8  ;;  %3698 = vadd.xlane.f32.xlu0 %v3694_v54  ;;  %v3693_v46 = vsub.f32 %v3667_v40, %v3689_v10 }
 0xb40   : > { %v3695_v47 = vmul.f32 %v3691_v60, %v3691_v60  ;;  %v3697_v52 = vmul.f32 %v3693_v46, %v3693_v46 }
 0xb42   : > { %3702 = vadd.xlane.f32.xlu0 %v3696_v41  ;;  %3700 = vadd.xlane.f32.xlu1 %v3695_v47 }
 0xb46   : > { %3704 = vadd.xlane.f32.xlu1 %v3697_v52 }
 0xbc7   : > { %v3699_v38 = vpop.xlane.xlu0 %3698 }
 0xbc8   : > { %v3706_v4 = vmul.f32 0.0078125, %v3699_v38 }
 0xbca   : > { %v3710_v24 = vadd.f32 1e-05, %v3706_v4 }
 0xbcb   : > { %v3701_v43 = vpop.xlane.xlu1 %3700  ;;  %v3703_v25 = vpop.xlane.xlu0 %3702 }
 0xbcc   : > { %4966 = vrsqrt.f32 %v3710_v24  ;;  %v3707_v7 = vmul.f32 0.0078125, %v3701_v43  ;;  %v3708_v61 = vmul.f32 0.0078125, %v3703_v25 }
 0xbce   : > { %v3711_v11 = vadd.f32 1e-05, %v3707_v7  ;;  %v3712_v53 = vadd.f32 1e-05, %v3708_v61 }
 0xbcf   : > { %v3705_v17 = vpop.xlane.xlu1 %3704 }
 0xbd0   : > { %4968 = vrsqrt.f32 %v3711_v11  ;;  %v3709_v22 = vmul.f32 0.0078125, %v3705_v17 }
 0xbd1   : > { %4970 = vrsqrt.f32 %v3712_v53 }
 0xbd2   : > { %v3713_v21 = vadd.f32 1e-05, %v3709_v22 }
 0xbd4   : > { %4972 = vrsqrt.f32 %v3713_v21 }
 0xbd9   : > { %v4967_v45 = vpop.eup %4966 }
 0xbda   : > { %v3718_v2 = vmul.f32 %v4967_v45, %v3690_v18 }
 0xbdc   : > { %v3728_v5 = vmul.f32 %v4218_v63, %v3718_v2 }
 0xbdd   : > { %v4969_v55 = vpop.eup %4968 }
 0xbde   : > { %v4971_v57 = vpop.eup %4970  ;;  %v3738_v59 = vadd.f32 %v4219_v35, %v3728_v5  ;;  %v3719_v32 = vmul.f32 %v4969_v55, %v3691_v60 }
 0xbdf   : > { %v3720_v33 = vmul.f32 %v4971_v57, %v3692_v27 }
 0xbe0   : > { %3742 = vst [vmem:[#allocation17] sm:$0xff] %v3738_v59  ;;  %v3729_v62 = vmul.f32 %v4218_v63, %v3719_v32 }
 0xbe1   : > { %v4973_v37 = vpop.eup %4972  ;;  %v3730_v30 = vmul.f32 %v4218_v63, %v3720_v33 }
 0xbe2   : > { %v3739_v6 = vadd.f32 %v4219_v35, %v3729_v62  ;;  %v3721_v9 = vmul.f32 %v4973_v37, %v3693_v46 }
 0xbe3   : > { %v3740_v16 = vadd.f32 %v4219_v35, %v3730_v30 }
 0xbe4   : > { %3743 = vst [vmem:[#allocation17 + $0x8] sm:$0xff] %v3739_v6  ;;  %v3731_v19 = vmul.f32 %v4218_v63, %v3721_v9 }
 0xbe5   : > { %3744 = vst [vmem:[#allocation17 + $0x10] sm:$0xff] %v3740_v16 }
 0xbe6   : > { %v3741_v56 = vadd.f32 %v4219_v35, %v3731_v19 }
 0xbe8   : > { %3745 = vst [vmem:[#allocation17 + $0x18] sm:$0xff] %v3741_v56 }
 0xbe9 PF: > { %p4553_p13 = scmp.eq.s32.totalorder %s5444_s6, 1  ;;  %s5329_s19 = smov [#allocation17]  }
 0xbea   : > { %s3752_s4 = sshll.u32 %s5329_s19, 4  ;;  %s3753_s4 = int_to_ptr.vmem [resolvable:$true] %s3752_s4 }
 0xbeb   : > { %s5230_s10 = scalar_lea.vmem %s3753_s4, 512  ;;  %p5237_p7 = scmp.lt.s32.totalorder %s3753_s4, %s3753_s4 }
 0xbec   : > { %p5231_p2 = scmp.ne.s32.totalorder %s3753_s4, %s5230_s10  ;;  %p5238_p5 = scmp.lt.s32.totalorder %s5230_s10, %s5230_s10 }
 0xbee   : > { %p5232_p3 = pnand %p5231_p2, %p4553_p13  ;;  %p5239_p11 = por %p5238_p5, %p5237_p7 }
 0xbf0   : > { %p5233_p6 = pneg %p5232_p3 }
 0xbf2   : > { %p5240_p4 = pnand %p5239_p11, %p5233_p6 }
 0xbf4   : > { %5243 = shalt.err (!%p5240_p4)
}
 0xbf5   : > { %s5330_s17 = smov 128   ;;  %s5331_s29 = smov 8  }
 0xbf6   : > { %s6562_s16 = sld [smem:[#allocation40_spill]] }
 0xbfc   : > { %4516 = dma.vmem_to_hbm [thread:$0]  (%p4553_p13), %s3753_s4, 512, %s6562_s16, [#allocation7], %s5330_s17, %s5330_s17, %s5331_s29  }
 0xbfd   : > { %5285 = dma.done.wait (%p4553_p13), [#allocation7], 512  }
 0xbfe   : > { %5287 = vsyncadd (%p4553_p13), [#allocation7], 4294966784 }
 0xbff PF: > { %s6563_s0 = sld [smem:[#allocation24_spill]]  ;;  %s6566_s27 = smov %s5294_s28 }
 0xc00   : > { %s6564_s18 = sld [smem:[#allocation23_spill]] }
 0xc01   : > { %s6565_s29 = sld [smem:[#allocation25_spill]] }
 0xc05   : > { %p31_p8 = scmp.ge.s32.totalorder %s6563_s0, 4  }
 0xc06   : > { %s6567_s28 = smov %s6564_s18 }
 0xc07   :  { %33 = sbr.rel (!%p31_p8) target bundleno = 29 (0x1d), region = 249 }
 0xc0c   :  { %3768 = vsyncpa [#allocation6], 1 }
 0xc0d   :  { %3770 = vsyncpa [#allocation6 + $0x1], 1 }
 0xc0e   :  { %3771 = vsyncpa [#allocation9], 1 }
 0xc0f   :  { %3772 = vsyncpa [#allocation7], 1 }
 0xc10   :  { %3774 = vsyncpa [#allocation7 + $0x1], 1 }

</bundles_post_ra>
